<compile_context>
chip_gen: v5e
topology: v5e:2x2
jax: 0.10.0
libtpu: 0.0.40
codegen_flags: <defaults>
</compile_context>

<pallas_src>
import jax
import jax.numpy as jnp
from jax import lax
from jax.experimental import pallas as pl
from jax.experimental.pallas import tpu as pltpu


# ----------------------------------------------------------------------------
# Config (synthetic, small)
# ----------------------------------------------------------------------------
BATCH = 2
IN_CH = 3
CIN_PAD = 8                 # 1x1-conv contraction dim padded for sublane tiling
IM_H = IM_W = 16            # feature-map resolution (stride-1 synthetic base)
DOUT_BASE = 32              # dout_base_model
POOL = 4                    # cfg.POOLING_SIZE
SPATIAL_SCALE = 1.0 / 16.0  # rois are given in 256x256 "image" coordinates
ROIS_PER_IMG = 8
HIDDEN = 64                 # _head_to_tail output width
N_MAIN = 4                  # len(main_classes)
N_SUB = 8                   # len(sub_classes); sub i -> main i // 2
CASECADE_TYPE = "add_score"

FEAT_DIM = POOL * POOL * DOUT_BASE            # 512  (flattened pooled feature)
H2 = 2 * HIDDEN                               # 128  (packed main|sub hidden)

# packed output-slab column layout (lane-dense 128-wide slab)
COL_CLS_MAIN = 0
COL_BBOX_MAIN = COL_CLS_MAIN + N_MAIN         # 4
COL_CLS_SUB = COL_BBOX_MAIN + 4 * N_MAIN      # 20
COL_BBOX_SUB = COL_CLS_SUB + N_SUB            # 28
SLAB_USED = COL_BBOX_SUB + 4 * N_SUB          # 60
SLAB_W = ((SLAB_USED + 127) // 128) * 128     # 128
assert SLAB_W >= 128


def _round_up(x, m):
    return ((x + m - 1) // m) * m


def _default_tile_r():
    # MXU-native M tile: 128 on v5e (4x128^2 MXU), 256 on v6e/v7x (2x256^2).
    try:
        kind = jax.devices()[0].device_kind.lower()
    except Exception:
        kind = ""
    return 128 if "v5" in kind else 256


# ----------------------------------------------------------------------------
# Pallas kernels
# ----------------------------------------------------------------------------
def _base_conv_kernel(x_ref, w_ref, b_ref, o_ref):
    # NHWC-direct 1x1 conv: (tile_pix, Cin_pad) @ (Cin_pad, Cout) + b, ReLU.
    # Lane dim = Cout; no feature-map transpose needed afterwards.
    o_ref[...] = jnp.maximum(
        jnp.dot(x_ref[...].astype(jnp.bfloat16), w_ref[...],
                preferred_element_type=jnp.float32)
        + b_ref[...],
        0.0,
    )


def _head_kernel(pooled_ref, w1_ref, b1_ref, w2_ref, b2_ref, o_ref, h_acc):
    # Grid = (row_tiles, k_tiles). K axis accumulates FC1 into a VMEM f32
    # scratch so a large FEAT_DIM never needs a resident (tile_r, FEAT_DIM)
    # block (v7x VMEM safe). Finalize (FC2 + fused dual softmax + store) only
    # on the last K step.
    k = pl.program_id(1)

    @pl.when(k == 0)
    def _():
        h_acc[...] = jnp.zeros_like(h_acc)

    h_acc[...] += jnp.dot(
        pooled_ref[...].astype(jnp.bfloat16), w1_ref[...],
        preferred_element_type=jnp.float32)

    @pl.when(k == pl.num_programs(1) - 1)
    def _():
        # first FC epilogue: h = relu(acc + [b1m | b1s]); cols 0:64 main,
        # 64:128 sub, packed in the same lanes.
        h = jnp.maximum(h_acc[...] + b1_ref[...], 0.0)

        # second stage: one block-structured (128, 128) matmul produces
        #   cols [0:4)   cls_main
        #   cols [4:20)  bbox_main
        #   cols [20:28) cls_sub + cascade 'add_score' (m2s folded in weights)
        #   cols [28:60) bbox_sub
        #   cols [60:128) zero padding
        slab = (
            jnp.dot(h.astype(jnp.bfloat16), w2_ref[...],
                    preferred_element_type=jnp.float32)
            + b2_ref[...]
        )

        col = lax.broadcasted_iota(jnp.int32, slab.shape, 1)
        mask_main = (col >= COL_CLS_MAIN) & (col < COL_CLS_MAIN + N_MAIN)
        mask_sub = (col >= COL_CLS_SUB) & (col < COL_CLS_SUB + N_SUB)
        mask_any = mask_main | mask_sub

        # Fused dual-group softmax: one exp pass over the slab.
        neg = jnp.float32(-1e30)
        m_main = jnp.max(jnp.where(mask_main, slab, neg), axis=-1, keepdims=True)
        m_sub = jnp.max(jnp.where(mask_sub, slab, neg), axis=-1, keepdims=True)
        shift = jnp.where(mask_main, m_main, jnp.where(mask_sub, m_sub, slab))
        e = jnp.exp(slab - shift)                      # == 1 on non-softmax cols
        s_main = jnp.sum(jnp.where(mask_main, e, 0.0), axis=-1, keepdims=True)
        s_sub = jnp.sum(jnp.where(mask_sub, e, 0.0), axis=-1, keepdims=True)
        inv = jnp.where(
            mask_main, pl.reciprocal(s_main, approx=False),
            jnp.where(mask_sub, pl.reciprocal(s_sub, approx=False), 1.0))

        # single lane-dense (tile_r, 128) store (no masked partial stores).
        o_ref[...] = jnp.where(mask_any, e * inv, slab)


def base_conv_nhwc(x_pix, w, b, *, tile_pix=1024):
    # x_pix: (N*H*W, Cin); w: (CIN_PAD, Cout) bf16; b: (1, Cout) f32.
    # Returns (N*H*W, Cout) f32, i.e. the NHWC-flattened feature map directly.
    npix, cin = x_pix.shape
    cout = w.shape[1]
    npix_pad = _round_up(npix, tile_pix)
    x_pix = jnp.pad(x_pix, ((0, npix_pad - npix), (0, CIN_PAD - cin)))
    out = pl.pallas_call(
        _base_conv_kernel,
        out_shape=jax.ShapeDtypeStruct((npix_pad, cout), jnp.float32),
        grid=(npix_pad // tile_pix,),
        in_specs=[
            pl.BlockSpec((tile_pix, CIN_PAD), lambda i: (i, 0)),
            pl.BlockSpec((CIN_PAD, cout), lambda i: (0, 0)),
            pl.BlockSpec((1, cout), lambda i: (0, 0)),
        ],
        out_specs=pl.BlockSpec((tile_pix, cout), lambda i: (i, 0)),
        compiler_params=pltpu.CompilerParams(
            dimension_semantics=("parallel",)),
    )(x_pix, w, b)
    return out[:npix]


def rcnn_heads(pooled_flat, w1, b1, w2, b2, *, tile_r=None, tile_k=256):
    # pooled_flat: (R, FEAT_DIM) f32; w1/w2 bf16; returns (R, SLAB_W) slab.
    r, feat_dim = pooled_flat.shape
    out_w = w2.shape[1]
    if tile_r is None:
        tile_r = _default_tile_r()
    tile_k = min(tile_k, _round_up(feat_dim, 128))
    r_pad = _round_up(r, tile_r)
    k_pad = _round_up(feat_dim, tile_k)
    pooled_flat = jnp.pad(pooled_flat,
                          ((0, r_pad - r), (0, k_pad - feat_dim)))
    if k_pad != feat_dim:
        w1 = jnp.pad(w1, ((0, k_pad - feat_dim), (0, 0)))

    slab = pl.pallas_call(
        _head_kernel,
        out_shape=jax.ShapeDtypeStruct((r_pad, out_w), jnp.float32),
        grid=(r_pad // tile_r, k_pad // tile_k),
        in_specs=[
            pl.BlockSpec((tile_r, tile_k), lambda i, k: (i, k)),
            pl.BlockSpec((tile_k, w1.shape[1]), lambda i, k: (k, 0)),
            pl.BlockSpec(b1.shape, lambda i, k: (0, 0)),
            pl.BlockSpec(w2.shape, lambda i, k: (0, 0)),
            pl.BlockSpec(b2.shape, lambda i, k: (0, 0)),
        ],
        out_specs=pl.BlockSpec((tile_r, out_w), lambda i, k: (i, 0)),
        scratch_shapes=[pltpu.VMEM((tile_r, H2), jnp.float32)],
        compiler_params=pltpu.CompilerParams(
            dimension_semantics=("parallel", "arbitrary")),
    )(pooled_flat, w1, b1, w2, b2)
    return slab[:r]


# ----------------------------------------------------------------------------
# Plain-JAX glue
# ----------------------------------------------------------------------------
def roi_align_nhwc(feat, rois, pool_size, spatial_scale):
    # TODO(synk): RoIAlignAvg is a data-dependent bilinear gather; kept in
    # plain JAX (single bilinear sample per bin). A fully fused
    # roi_align+head pallas_call (rois as scalar-prefetch, feature map in HBM
    # via memory_space=pl.ANY + manual make_async_copy gather) is the next
    # step at realistic sizes.
    n, h, w, c = feat.shape
    r = rois.shape[0]
    p = pool_size
    bidx = rois[:, 0].astype(jnp.int32)
    x1 = rois[:, 1] * spatial_scale
    y1 = rois[:, 2] * spatial_scale
    x2 = rois[:, 3] * spatial_scale
    y2 = rois[:, 4] * spatial_scale
    bin_w = jnp.maximum(x2 - x1, 1.0) / p
    bin_h = jnp.maximum(y2 - y1, 1.0) / p
    centers = jnp.arange(p, dtype=jnp.float32) + 0.5
    cx = x1[:, None] + centers[None, :] * bin_w[:, None]     # (R, P)
    cy = y1[:, None] + centers[None, :] * bin_h[:, None]     # (R, P)
    yy = jnp.broadcast_to(cy[:, :, None], (r, p, p))
    xx = jnp.broadcast_to(cx[:, None, :], (r, p, p))
    y0f = jnp.clip(jnp.floor(yy), 0, h - 1)
    x0f = jnp.clip(jnp.floor(xx), 0, w - 1)
    y0 = y0f.astype(jnp.int32)
    x0 = x0f.astype(jnp.int32)
    y1i = jnp.clip(y0 + 1, 0, h - 1)
    x1i = jnp.clip(x0 + 1, 0, w - 1)
    wy = jnp.clip(yy - y0f, 0.0, 1.0)[..., None]
    wx = jnp.clip(xx - x0f, 0.0, 1.0)[..., None]
    # Index the four bilinear corners directly -- no (R, H, W, C) gathered copy.
    b3 = bidx[:, None, None]
    v00 = feat[b3, y0, x0]
    v01 = feat[b3, y0, x1i]
    v10 = feat[b3, y1i, x0]
    v11 = feat[b3, y1i, x1i]
    out = (v00 * (1 - wy) * (1 - wx) + v01 * (1 - wy) * wx
           + v10 * wy * (1 - wx) + v11 * wy * wx)            # (R, P, P, C)
    return out


def make_rois(key, batch, rois_per_img, im_size):
    # TODO(synk): RPN (anchor generation + NMS) has no clean Pallas
    # equivalent; deterministic synthetic proposals are generated instead.
    k1, k2 = jax.random.split(key)
    xy1 = jax.random.uniform(k1, (batch, rois_per_img, 2), minval=0.0,
                             maxval=im_size * 0.7)
    wh = jax.random.uniform(k2, (batch, rois_per_img, 2), minval=im_size * 0.1,
                            maxval=im_size * 0.3)
    xy2 = jnp.minimum(xy1 + wh, im_size - 1.0)
    bidx = jnp.broadcast_to(
        jnp.arange(batch, dtype=jnp.float32)[:, None, None],
        (batch, rois_per_img, 1),
    )
    return jnp.concatenate([bidx, xy1, xy2], axis=-1)        # (B, R, 5)


def make_main2sub_matrix():
    # sub class i maps to main class i // 2  ->  M[i // 2, i] = 1
    m = jnp.zeros((N_MAIN, N_SUB), jnp.float32)
    sub_idx = jnp.arange(N_SUB)
    main_idx = sub_idx // 2
    return m.at[main_idx, sub_idx].set(1.0)


def init_params(key):
    # normal_init(mean=0, std=0.01) for cls/fc, std=0.001 for bbox preds,
    # biases zero -- matches _init_weights semantics deterministically.
    ks = jax.random.split(key, 8)
    return {
        "wbase": 0.01 * jax.random.normal(ks[0], (IN_CH, DOUT_BASE), jnp.float32),
        "bbase": jnp.zeros((1, DOUT_BASE), jnp.float32),
        "w1m": 0.01 * jax.random.normal(ks[1], (FEAT_DIM, HIDDEN), jnp.float32),
        "b1m": jnp.zeros((1, HIDDEN), jnp.float32),
        "wbm": 0.001 * jax.random.normal(ks[2], (HIDDEN, 4 * N_MAIN), jnp.float32),
        "bbm": jnp.zeros((1, 4 * N_MAIN), jnp.float32),
        "wcm": 0.01 * jax.random.normal(ks[3], (HIDDEN, N_MAIN), jnp.float32),
        "bcm": jnp.zeros((1, N_MAIN), jnp.float32),
        "w1s": 0.01 * jax.random.normal(ks[4], (FEAT_DIM, HIDDEN), jnp.float32),
        "b1s": jnp.zeros((1, HIDDEN), jnp.float32),
        "wbs": 0.001 * jax.random.normal(ks[5], (HIDDEN, 4 * N_SUB), jnp.float32),
        "bbs": jnp.zeros((1, 4 * N_SUB), jnp.float32),
        "wcs": 0.01 * jax.random.normal(ks[6], (HIDDEN, N_SUB), jnp.float32),
        "bcs": jnp.zeros((1, N_SUB), jnp.float32),
    }


def pack_params(p):
    """Fold the cascade mapping into the classifier weights, pack all FC
    weights lane-dense, cast matmul weights to bf16 (run once, offline)."""
    m2s = make_main2sub_matrix()                               # (N_MAIN, N_SUB)

    # ---- first FC packed: [w1m | w1s] -> (FEAT_DIM, 128) -------------------
    w1 = jnp.concatenate([p["w1m"], p["w1s"]], axis=1)
    b1 = jnp.concatenate([p["b1m"], p["b1s"]], axis=1)

    # ---- second stage packed: (128, SLAB_W) block-structured weight --------
    # rows 0:64 act on h_main, rows 64:128 act on h_sub.
    # 'add_score' adds RAW main scores to sub scores pre-softmax in the
    # reference, so folding wcm@m2s / bcm@m2s is an exact linear equivalence.
    w_top = jnp.concatenate([
        p["wcm"],                                              # cls_main
        p["wbm"],                                              # bbox_main
        p["wcm"] @ m2s,                                        # cascade add_score
        jnp.zeros((HIDDEN, 4 * N_SUB), jnp.float32),           # bbox_sub (none)
    ], axis=1)
    w_bot = jnp.concatenate([
        jnp.zeros((HIDDEN, N_MAIN), jnp.float32),
        jnp.zeros((HIDDEN, 4 * N_MAIN), jnp.float32),
        p["wcs"],                                              # cls_sub
        p["wbs"],                                              # bbox_sub
    ], axis=1)
    w2 = jnp.concatenate([w_top, w_bot], axis=0)               # (128, SLAB_USED)
    b2 = jnp.concatenate([
        p["bcm"], p["bbm"], p["bcs"] + p["bcm"] @ m2s, p["bbs"]
    ], axis=1)                                                 # (1, SLAB_USED)
    w2 = jnp.pad(w2, ((0, 0), (0, SLAB_W - SLAB_USED)))
    b2 = jnp.pad(b2, ((0, 0), (0, SLAB_W - SLAB_USED)))

    # ---- base conv: pad Cin 3 -> 8 (sublane tiling), NHWC-direct layout ----
    wbase = jnp.pad(p["wbase"], ((0, CIN_PAD - IN_CH), (0, 0)))  # (8, DOUT_BASE)

    return {
        "wbase": wbase.astype(jnp.bfloat16),
        "bbase": p["bbase"],                                   # (1, DOUT_BASE) f32
        "w1": w1.astype(jnp.bfloat16), "b1": b1,
        "w2": w2.astype(jnp.bfloat16), "b2": b2,
    }


# ----------------------------------------------------------------------------
# Full forward (inference mode)
# ----------------------------------------------------------------------------
@jax.jit
def hierarchy_cascade_forward(im_data, im_info, gt_boxes, num_boxes,
                              rois, packed):
    del im_info, gt_boxes, num_boxes  # only used on the training path
    batch_size = im_data.shape[0]

    # ---- RCNN_base: 1x1 conv + ReLU, NHWC emitted directly by the kernel ---
    # only the tiny 3-channel input is transposed; the 32-channel feature map
    # is produced already NHWC-flattened (no XLA transpose pass over it).
    x_pix = jnp.transpose(im_data, (0, 2, 3, 1)).reshape(-1, IN_CH)
    feat_flat = base_conv_nhwc(x_pix, packed["wbase"], packed["bbase"])
    base_feat = feat_flat.reshape(batch_size, IM_H, IM_W, DOUT_BASE)

    # ---- RoIAlign (channels-last, plain JAX) --------------------------------
    rois_flat = rois.reshape(-1, 5)
    pooled = roi_align_nhwc(base_feat, rois_flat, POOL, SPATIAL_SCALE)
    # TODO(synk): flatten order is (P, P, C) (channels-last); porting real
    # PyTorch fc weights (which expect (C, P, P)) would need a permutation.
    pooled_flat = pooled.reshape(pooled.shape[0], -1)               # (R, FEAT_DIM)

    # ---- heads + cascade: one fused, K-tiled, lane-dense Pallas kernel ------
    slab = rcnn_heads(pooled_flat, packed["w1"], packed["b1"],
                      packed["w2"], packed["b2"])

    cls_prob_main = slab[:, COL_CLS_MAIN:COL_CLS_MAIN + N_MAIN]
    bbox_pred_main = slab[:, COL_BBOX_MAIN:COL_BBOX_MAIN + 4 * N_MAIN]
    cls_prob_sub = slab[:, COL_CLS_SUB:COL_CLS_SUB + N_SUB]
    bbox_pred_sub = slab[:, COL_BBOX_SUB:COL_BBOX_SUB + 4 * N_SUB]

    rois_per_img = rois.shape[1]
    cls_prob_main = cls_prob_main.reshape(batch_size, rois_per_img, -1)
    bbox_pred_main = bbox_pred_main.reshape(batch_size, rois_per_img, -1)
    cls_prob_sub = cls_prob_sub.reshape(batch_size, rois_per_img, -1)
    bbox_pred_sub = bbox_pred_sub.reshape(batch_size, rois_per_img, -1)

    rpn_loss_cls = jnp.float32(0.0)
    rpn_loss_bbox = jnp.float32(0.0)
    rcnn_loss_cls_sub = jnp.float32(0.0)
    rcnn_loss_bbox_sub = jnp.float32(0.0)
    rcnn_loss_cls_main = jnp.float32(0.0)
    rcnn_loss_bbox_main = jnp.float32(0.0)

    return (rois, cls_prob_main, bbox_pred_main, cls_prob_sub, bbox_pred_sub,
            rpn_loss_cls, rpn_loss_bbox, rcnn_loss_cls_sub, rcnn_loss_bbox_sub,
            rcnn_loss_cls_main, rcnn_loss_bbox_main)


# ----------------------------------------------------------------------------
if __name__ == "__main__":
    key = jax.random.PRNGKey(0)
    k_im, k_roi, k_par = jax.random.split(key, 3)

    im_data = jax.random.normal(k_im, (BATCH, IN_CH, IM_H, IM_W), jnp.float32)
    im_info = jnp.tile(
        jnp.array([[IM_H * 16.0, IM_W * 16.0, 1.0]], jnp.float32), (BATCH, 1)
    )
    gt_boxes = jnp.zeros((BATCH, 5, 5), jnp.float32)
    num_boxes = jnp.zeros((BATCH,), jnp.int32)

    rois = make_rois(k_roi, BATCH, ROIS_PER_IMG, im_size=IM_H * 16.0)
    params = init_params(k_par)
    packed = pack_params(params)

    outs = hierarchy_cascade_forward(
        im_data, im_info, gt_boxes, num_boxes, rois, packed
    )
    outs = jax.block_until_ready(outs)

    (rois_o, cls_prob_main, bbox_pred_main, cls_prob_sub, bbox_pred_sub,
     *_losses) = outs
    assert rois_o.shape == (BATCH, ROIS_PER_IMG, 5)
    assert cls_prob_main.shape == (BATCH, ROIS_PER_IMG, N_MAIN)
    assert bbox_pred_main.shape == (BATCH, ROIS_PER_IMG, 4 * N_MAIN)
    assert cls_prob_sub.shape == (BATCH, ROIS_PER_IMG, N_SUB)
    assert bbox_pred_sub.shape == (BATCH, ROIS_PER_IMG, 4 * N_SUB)
    # softmax rows must sum to 1 (exact reciprocal kept in-kernel)
    assert jnp.allclose(cls_prob_main.sum(-1), 1.0, atol=1e-5)
    assert jnp.allclose(cls_prob_sub.sum(-1), 1.0, atol=1e-5)

    print("KERNEL_OK")
</pallas_src>

<mosaic_0001>
module attributes {stable_mosaic.version = 11 : i64} {
  func.func @_base_conv_kernel(%arg0: i32, %arg1: memref<1024x8xf32, #tpu.memory_space<vmem>>, %arg2: memref<8x32xbf16, #tpu.memory_space<vmem>>, %arg3: memref<1x32xf32, #tpu.memory_space<vmem>>, %arg4: memref<1024x32xf32, #tpu.memory_space<vmem>>) attributes {dimension_semantics = [#tpu.dimension_semantics<parallel>], iteration_bounds = array<i64: 1>, scalar_prefetch = 0 : i64, scratch_operands = 0 : i64, tpu.core_type = #tpu.core_type<tc>, window_params = [{transform_indices = @transform_0, window_bounds = array<i64: 1024, 8>}, {pipeline_mode = #tpu.pipeline_mode<synchronous>, transform_indices = @transform_1, window_bounds = array<i64: 8, 32>}, {pipeline_mode = #tpu.pipeline_mode<synchronous>, transform_indices = @transform_2, window_bounds = array<i64: 1, 32>}, {transform_indices = @transform_3, window_bounds = array<i64: 1024, 32>}]} {
    %c0 = arith.constant 0 : index
    %c0_0 = arith.constant 0 : index
    %0 = vector.load %arg1[%c0, %c0_0] : memref<1024x8xf32, #tpu.memory_space<vmem>>, vector<1024x8xf32>
    %1 = arith.truncf %0 : vector<1024x8xf32> to vector<1024x8xbf16>
    %c0_1 = arith.constant 0 : index
    %c0_2 = arith.constant 0 : index
    %2 = vector.load %arg2[%c0_1, %c0_2] : memref<8x32xbf16, #tpu.memory_space<vmem>>, vector<8x32xbf16>
    %cst = arith.constant dense<0.000000e+00> : vector<1024x32xf32>
    %3 = tpu.matmul %1, %2, %cst {dimension_numbers = #tpu.dot_dimension_numbers<[1], [0], [0], [1], [0, 0, 1, 1], [], []>} : vector<1024x8xbf16>, vector<8x32xbf16>, vector<1024x32xf32> -> vector<1024x32xf32>
    %c0_3 = arith.constant 0 : index
    %c0_4 = arith.constant 0 : index
    %4 = vector.load %arg3[%c0_3, %c0_4] : memref<1x32xf32, #tpu.memory_space<vmem>>, vector<1x32xf32>
    %5 = vector.broadcast %4 : vector<1x32xf32> to vector<1024x32xf32>
    %6 = arith.addf %3, %5 : vector<1024x32xf32>
    %cst_5 = arith.constant 0.000000e+00 : f32
    %7 = vector.broadcast %cst_5 : f32 to vector<1024x32xf32>
    %8 = arith.maximumf %6, %7 : vector<1024x32xf32>
    %c0_6 = arith.constant 0 : index
    %c0_7 = arith.constant 0 : index
    %9 = vector.load %arg4[%c0_6, %c0_7] : memref<1024x32xf32, #tpu.memory_space<vmem>>, vector<1024x32xf32>
    tpu.vector_store %arg4[%c0_6, %c0_7], %8 {strides = array<i32>} : memref<1024x32xf32, #tpu.memory_space<vmem>>, vector<1024x32xf32>,
    return
  }
  func.func @transform_0(%arg0: i32) -> (i32, i32) {
    %c0_i32 = arith.constant 0 : i32
    %c0_i32_0 = arith.constant 0 : i32
    return %arg0, %c0_i32 : i32, i32
  }
  func.func @transform_1(%arg0: i32) -> (i32, i32) {
    %c0_i32 = arith.constant 0 : i32
    %c0_i32_0 = arith.constant 0 : i32
    %c0_i32_1 = arith.constant 0 : i32
    return %c0_i32, %c0_i32_0 : i32, i32
  }
  func.func @transform_2(%arg0: i32) -> (i32, i32) {
    %c0_i32 = arith.constant 0 : i32
    %c0_i32_0 = arith.constant 0 : i32
    %c0_i32_1 = arith.constant 0 : i32
    return %c0_i32, %c0_i32_0 : i32, i32
  }
  func.func @transform_3(%arg0: i32) -> (i32, i32) {
    %c0_i32 = arith.constant 0 : i32
    %c0_i32_0 = arith.constant 0 : i32
    return %arg0, %c0_i32 : i32, i32
  }
}

module attributes {stable_mosaic.version = 11 : i64} {
  func.func @_head_kernel(%arg0: i32, %arg1: i32, %arg2: memref<256x256xf32, #tpu.memory_space<vmem>>, %arg3: memref<256x128xbf16, #tpu.memory_space<vmem>>, %arg4: memref<1x128xf32, #tpu.memory_space<vmem>>, %arg5: memref<128x128xbf16, #tpu.memory_space<vmem>>, %arg6: memref<1x128xf32, #tpu.memory_space<vmem>>, %arg7: memref<256x128xf32, #tpu.memory_space<vmem>>, %arg8: memref<256x128xf32, #tpu.memory_space<vmem>>) attributes {dimension_semantics = [#tpu.dimension_semantics<parallel>, #tpu.dimension_semantics<arbitrary>], iteration_bounds = array<i64: 1, 2>, scalar_prefetch = 0 : i64, scratch_operands = 1 : i64, tpu.core_type = #tpu.core_type<tc>, window_params = [{transform_indices = @transform_0, window_bounds = array<i64: 256, 256>}, {transform_indices = @transform_1, window_bounds = array<i64: 256, 128>}, {pipeline_mode = #tpu.pipeline_mode<synchronous>, transform_indices = @transform_2, window_bounds = array<i64: 1, 128>}, {pipeline_mode = #tpu.pipeline_mode<synchronous>, transform_indices = @transform_3, window_bounds = array<i64: 128, 128>}, {pipeline_mode = #tpu.pipeline_mode<synchronous>, transform_indices = @transform_4, window_bounds = array<i64: 1, 128>}, {transform_indices = @transform_5, window_bounds = array<i64: 256, 128>}]} {
    %c0_i32 = arith.constant 0 : i32
    %0 = arith.cmpi eq, %arg1, %c0_i32 : i32
    %1 = arith.extui %0 : i1 to i32
    %c0_i32_0 = arith.constant 0 : i32
    %2 = arith.cmpi ne, %1, %c0_i32_0 : i32
    scf.if %2 {
      %cst_9 = arith.constant 0.000000e+00 : f32
      %13 = vector.broadcast %cst_9 : f32 to vector<256x128xf32>
      %c0_10 = arith.constant 0 : index
      %c0_11 = arith.constant 0 : index
      %14 = vector.load %arg8[%c0_10, %c0_11] : memref<256x128xf32, #tpu.memory_space<vmem>>, vector<256x128xf32>
      tpu.vector_store %arg8[%c0_10, %c0_11], %13 {strides = array<i32>} : memref<256x128xf32, #tpu.memory_space<vmem>>, vector<256x128xf32>,
    } else {
    }
    %c0 = arith.constant 0 : index
    %c0_1 = arith.constant 0 : index
    %3 = vector.load %arg8[%c0, %c0_1] : memref<256x128xf32, #tpu.memory_space<vmem>>, vector<256x128xf32>
    %c0_2 = arith.constant 0 : index
    %c0_3 = arith.constant 0 : index
    %4 = vector.load %arg2[%c0_2, %c0_3] : memref<256x256xf32, #tpu.memory_space<vmem>>, vector<256x256xf32>
    %5 = arith.truncf %4 : vector<256x256xf32> to vector<256x256xbf16>
    %c0_4 = arith.constant 0 : index
    %c0_5 = arith.constant 0 : index
    %6 = vector.load %arg3[%c0_4, %c0_5] : memref<256x128xbf16, #tpu.memory_space<vmem>>, vector<256x128xbf16>
    %cst = arith.constant dense<0.000000e+00> : vector<256x128xf32>
    %7 = tpu.matmul %5, %6, %cst {dimension_numbers = #tpu.dot_dimension_numbers<[1], [0], [0], [1], [0, 0, 1, 1], [], []>} : vector<256x256xbf16>, vector<256x128xbf16>, vector<256x128xf32> -> vector<256x128xf32>
    %8 = arith.addf %3, %7 : vector<256x128xf32>
    %c0_6 = arith.constant 0 : index
    %c0_7 = arith.constant 0 : index
    %9 = vector.load %arg8[%c0_6, %c0_7] : memref<256x128xf32, #tpu.memory_space<vmem>>, vector<256x128xf32>
    tpu.vector_store %arg8[%c0_6, %c0_7], %8 {strides = array<i32>} : memref<256x128xf32, #tpu.memory_space<vmem>>, vector<256x128xf32>,
    %c1_i32 = arith.constant 1 : i32
    %10 = arith.cmpi eq, %arg1, %c1_i32 : i32
    %11 = arith.extui %10 : i1 to i32
    %c0_i32_8 = arith.constant 0 : i32
    %12 = arith.cmpi ne, %11, %c0_i32_8 : i32
    scf.if %12 {
      %c0_9 = arith.constant 0 : index
      %c0_10 = arith.constant 0 : index
      %13 = vector.load %arg8[%c0_9, %c0_10] : memref<256x128xf32, #tpu.memory_space<vmem>>, vector<256x128xf32>
      %c0_11 = arith.constant 0 : index
      %c0_12 = arith.constant 0 : index
      %14 = vector.load %arg4[%c0_11, %c0_12] : memref<1x128xf32, #tpu.memory_space<vmem>>, vector<1x128xf32>
      %15 = vector.broadcast %14 : vector<1x128xf32> to vector<256x128xf32>
      %16 = arith.addf %13, %15 : vector<256x128xf32>
      %cst_13 = arith.constant 0.000000e+00 : f32
      %17 = vector.broadcast %cst_13 : f32 to vector<256x128xf32>
      %18 = arith.maximumf %16, %17 : vector<256x128xf32>
      %19 = arith.truncf %18 : vector<256x128xf32> to vector<256x128xbf16>
      %c0_14 = arith.constant 0 : index
      %c0_15 = arith.constant 0 : index
      %20 = vector.load %arg5[%c0_14, %c0_15] : memref<128x128xbf16, #tpu.memory_space<vmem>>, vector<128x128xbf16>
      %cst_16 = arith.constant dense<0.000000e+00> : vector<256x128xf32>
      %21 = tpu.matmul %19, %20, %cst_16 {dimension_numbers = #tpu.dot_dimension_numbers<[1], [0], [0], [1], [0, 0, 1, 1], [], []>} : vector<256x128xbf16>, vector<128x128xbf16>, vector<256x128xf32> -> vector<256x128xf32>
      %c0_17 = arith.constant 0 : index
      %c0_18 = arith.constant 0 : index
      %22 = vector.load %arg6[%c0_17, %c0_18] : memref<1x128xf32, #tpu.memory_space<vmem>>, vector<1x128xf32>
      %23 = vector.broadcast %22 : vector<1x128xf32> to vector<256x128xf32>
      %24 = arith.addf %21, %23 : vector<256x128xf32>
      %25 = tpu.iota {dimensions = array<i32: 1>} : vector<256x128xi32>
      %c0_i32_19 = arith.constant 0 : i32
      %26 = vector.broadcast %c0_i32_19 : i32 to vector<256x128xi32>
      %27 = arith.cmpi sge, %25, %26 : vector<256x128xi32>
      %c4_i32 = arith.constant 4 : i32
      %28 = vector.broadcast %c4_i32 : i32 to vector<256x128xi32>
      %29 = arith.cmpi slt, %25, %28 : vector<256x128xi32>
      %30 = arith.andi %27, %29 : vector<256x128xi1>
      %c20_i32 = arith.constant 20 : i32
      %31 = vector.broadcast %c20_i32 : i32 to vector<256x128xi32>
      %32 = arith.cmpi sge, %25, %31 : vector<256x128xi32>
      %c28_i32 = arith.constant 28 : i32
      %33 = vector.broadcast %c28_i32 : i32 to vector<256x128xi32>
      %34 = arith.cmpi slt, %25, %33 : vector<256x128xi32>
      %35 = arith.andi %32, %34 : vector<256x128xi1>
      %36 = arith.ori %30, %35 : vector<256x128xi1>
      %cst_20 = arith.constant -1.000000e+30 : f32
      %37 = vector.broadcast %cst_20 : f32 to vector<256x128xf32>
      %38 = arith.select %30, %24, %37 : vector<256x128xi1>, vector<256x128xf32>
      %cst_21 = arith.constant dense<0xFF800000> : vector<256xf32>
      %39 = vector.multi_reduction <maximumf>, %38, %cst_21 [1] : vector<256x128xf32> to vector<256xf32>
      %40 = vector.shape_cast %39 : vector<256xf32> to vector<256x1xf32>
      %cst_22 = arith.constant -1.000000e+30 : f32
      %41 = vector.broadcast %cst_22 : f32 to vector<256x128xf32>
      %42 = arith.select %35, %24, %41 : vector<256x128xi1>, vector<256x128xf32>
      %cst_23 = arith.constant dense<0xFF800000> : vector<256xf32>
      %43 = vector.multi_reduction <maximumf>, %42, %cst_23 [1] : vector<256x128xf32> to vector<256xf32>
      %44 = vector.shape_cast %43 : vector<256xf32> to vector<256x1xf32>
      %45 = vector.shape_cast %44 : vector<256x1xf32> to vector<256x1xf32>
      %46 = vector.broadcast %45 : vector<256x1xf32> to vector<256x128xf32>
      %47 = arith.select %35, %46, %24 : vector<256x128xi1>, vector<256x128xf32>
      %48 = vector.shape_cast %40 : vector<256x1xf32> to vector<256x1xf32>
      %49 = vector.broadcast %48 : vector<256x1xf32> to vector<256x128xf32>
      %50 = arith.select %30, %49, %47 : vector<256x128xi1>, vector<256x128xf32>
      %51 = arith.subf %24, %50 : vector<256x128xf32>
      %52 = math.exp %51 : vector<256x128xf32>
      %cst_24 = arith.constant 0.000000e+00 : f32
      %53 = vector.broadcast %cst_24 : f32 to vector<256x128xf32>
      %54 = arith.select %30, %52, %53 : vector<256x128xi1>, vector<256x128xf32>
      %cst_25 = arith.constant dense<0.000000e+00> : vector<256xf32>
      %55 = vector.multi_reduction <add>, %54, %cst_25 [1] : vector<256x128xf32> to vector<256xf32>
      %56 = vector.shape_cast %55 : vector<256xf32> to vector<256x1xf32>
      %cst_26 = arith.constant 0.000000e+00 : f32
      %57 = vector.broadcast %cst_26 : f32 to vector<256x128xf32>
      %58 = arith.select %35, %52, %57 : vector<256x128xi1>, vector<256x128xf32>
      %cst_27 = arith.constant dense<0.000000e+00> : vector<256xf32>
      %59 = vector.multi_reduction <add>, %58, %cst_27 [1] : vector<256x128xf32> to vector<256xf32>
      %60 = vector.shape_cast %59 : vector<256xf32> to vector<256x1xf32>
      %61 = tpu.reciprocal %56 : vector<256x1xf32> -> vector<256x1xf32>
      %62 = tpu.reciprocal %60 : vector<256x1xf32> -> vector<256x1xf32>
      %cst_28 = arith.constant 1.000000e+00 : f32
      %63 = vector.shape_cast %62 : vector<256x1xf32> to vector<256x1xf32>
      %64 = vector.broadcast %63 : vector<256x1xf32> to vector<256x128xf32>
      %65 = vector.broadcast %cst_28 : f32 to vector<256x128xf32>
      %66 = arith.select %35, %64, %65 : vector<256x128xi1>, vector<256x128xf32>
      %67 = vector.shape_cast %61 : vector<256x1xf32> to vector<256x1xf32>
      %68 = vector.broadcast %67 : vector<256x1xf32> to vector<256x128xf32>
      %69 = arith.select %30, %68, %66 : vector<256x128xi1>, vector<256x128xf32>
      %70 = arith.mulf %52, %69 : vector<256x128xf32>
      %71 = arith.select %36, %70, %24 : vector<256x128xi1>, vector<256x128xf32>
      %c0_29 = arith.constant 0 : index
      %c0_30 = arith.constant 0 : index
      %72 = vector.load %arg7[%c0_29, %c0_30] : memref<256x128xf32, #tpu.memory_space<vmem>>, vector<256x128xf32>
      tpu.vector_store %arg7[%c0_29, %c0_30], %71 {strides = array<i32>} : memref<256x128xf32, #tpu.memory_space<vmem>>, vector<256x128xf32>,
    } else {
    }
    return
  }
  func.func @transform_0(%arg0: i32, %arg1: i32) -> (i32, i32) {
    %c0_i32 = arith.constant 0 : i32
    return %arg0, %arg1 : i32, i32
  }
  func.func @transform_1(%arg0: i32, %arg1: i32) -> (i32, i32) {
    %c0_i32 = arith.constant 0 : i32
    %c0_i32_0 = arith.constant 0 : i32
    return %arg1, %c0_i32 : i32, i32
  }
  func.func @transform_2(%arg0: i32, %arg1: i32) -> (i32, i32) {
    %c0_i32 = arith.constant 0 : i32
    %c0_i32_0 = arith.constant 0 : i32
    %c0_i32_1 = arith.constant 0 : i32
    return %c0_i32, %c0_i32_0 : i32, i32
  }
  func.func @transform_3(%arg0: i32, %arg1: i32) -> (i32, i32) {
    %c0_i32 = arith.constant 0 : i32
    %c0_i32_0 = arith.constant 0 : i32
    %c0_i32_1 = arith.constant 0 : i32
    return %c0_i32, %c0_i32_0 : i32, i32
  }
  func.func @transform_4(%arg0: i32, %arg1: i32) -> (i32, i32) {
    %c0_i32 = arith.constant 0 : i32
    %c0_i32_0 = arith.constant 0 : i32
    %c0_i32_1 = arith.constant 0 : i32
    return %c0_i32, %c0_i32_0 : i32, i32
  }
  func.func @transform_5(%arg0: i32, %arg1: i32) -> (i32, i32) {
    %c0_i32 = arith.constant 0 : i32
    %c0_i32_0 = arith.constant 0 : i32
    return %arg0, %c0_i32 : i32, i32
  }
}

</mosaic_0001>

<bundles_post_ra>
// kernel: hierarchy_cascade_forward.2
= control target key start
LH: loop header
LB: loop body
LE: loop exit
PB: predicated region body
PF: predicated region fallthrough
CT: control target
= control target key end

     0   :  { %vm405_vm0 = vcmask 1043456   ;;  %vm212_vm1 = vcmask 64512   ;;  %vm866_vm2 = vcmask 261120   ;;  %s2189_s1 = inlined_call_operand.vmem [shape: bf16[8,32], index: 1, kind: input, shape index: {}]   ;;  %s2190_s0 = inlined_call_operand.vmem [shape: f32[1024,8], index: 0, kind: input, shape index: {}]   ;;  %s2191_s2 = inlined_call_operand.vmem [shape: f32[1,32], index: 2, kind: input, shape index: {}]   ;;  %s2192_s3 = inlined_call_operand.vmem [shape: f32[1024,32], index: 3, kind: output, shape index: {}]  }
   0x1   :  { %v207_v0 = vld [vmem:[%s2189_s1] sm:$0xf]  ;;  %v16_v2 = vld [vmem:[%s2190_s0 + $0x8] sm:$0xff]  ;;  %v17_v14 = vld [vmem:[%s2190_s0 + $0x10] sm:$0xff] }
   0x2   :  { %v15_v1 = vld [vmem:[%s2190_s0] sm:$0xff]  ;;  %v407_v3 = vsel %vm405_vm0, %v207_v0, 0  ;;  %v48_v6 = vld [vmem:[%s2190_s0 + $0x108] sm:$0xff]  ;;  %v18_v15 = vld [vmem:[%s2190_s0 + $0x18] sm:$0xff] }
   0x3   :  { %v143_v4 = vpack.c.bf16 %v16_v2, %v15_v1  ;;  %v47_v5 = vld [vmem:[%s2190_s0 + $0x100] sm:$0xff]  ;;  %416 = vmatpush.bf16.msra.mxu0 %v407_v3  ;;  %1063 = vmatpush.bf16.msra.mxu1 %v407_v3  ;;  %v80_v9 = vld [vmem:[%s2190_s0 + $0x208] sm:$0xff]  ;;  %v49_v16 = vld [vmem:[%s2190_s0 + $0x110] sm:$0xff]  ;;  %v144_v22 = vpack.c.bf16 %v18_v15, %v17_v14 }
   0x4   :  { %v79_v7 = vld [vmem:[%s2190_s0 + $0x200] sm:$0xff]  ;;  %v159_v8 = vpack.c.bf16 %v48_v6, %v47_v5  ;;  %v112_v11 = vld [vmem:[%s2190_s0 + $0x308] sm:$0xff]  ;;  %1064 = vmatpush.bf16.msra.mxu2 %v407_v3  ;;  %1065 = vmatpush.bf16.msra.mxu3 %v407_v3  ;;  %v50_v17 = vld [vmem:[%s2190_s0 + $0x118] sm:$0xff] }
   0x5   :  { %v111_v10 = vld [vmem:[%s2190_s0 + $0x300] sm:$0xff]  ;;  %v175_v12 = vpack.c.bf16 %v80_v9, %v79_v7  ;;  %v81_v18 = vld [vmem:[%s2190_s0 + $0x210] sm:$0xff]  ;;  %v82_v19 = vld [vmem:[%s2190_s0 + $0x218] sm:$0xff]  ;;  %v160_v23 = vpack.c.bf16 %v50_v17, %v49_v16 }
   0x6   :  { %v191_v13 = vpack.c.bf16 %v112_v11, %v111_v10  ;;  %999 = vmatmul.msk.bf16.vlgmr.msra.gmra.mxu0 %vm212_vm1, %v143_v4  ;;  %1015 = vmatmul.msk.bf16.vlgmr.msra.gmra.mxu1 %vm212_vm1, %v159_v8  ;;  %v113_v20 = vld [vmem:[%s2190_s0 + $0x310] sm:$0xff]  ;;  %v114_v21 = vld [vmem:[%s2190_s0 + $0x318] sm:$0xff]  ;;  %v176_v24 = vpack.c.bf16 %v82_v19, %v81_v18  ;;  %v19_v26 = vld [vmem:[%s2190_s0 + $0x20] sm:$0xff] }
   0x7   :  { %1031 = vmatmul.msk.bf16.vlgmr.msra.gmra.mxu2 %vm212_vm1, %v175_v12  ;;  %v192_v25 = vpack.c.bf16 %v114_v21, %v113_v20  ;;  %v20_v27 = vld [vmem:[%s2190_s0 + $0x28] sm:$0xff]  ;;  %v51_v28 = vld [vmem:[%s2190_s0 + $0x120] sm:$0xff]  ;;  %v21_v38 = vld [vmem:[%s2190_s0 + $0x30] sm:$0xff] }
   0x8   :  { %1047 = vmatmul.msk.bf16.vlgmr.msra.gmra.mxu3 %vm212_vm1, %v191_v13  ;;  %v52_v29 = vld [vmem:[%s2190_s0 + $0x128] sm:$0xff]  ;;  %v83_v30 = vld [vmem:[%s2190_s0 + $0x220] sm:$0xff]  ;;  %v145_v34 = vpack.c.bf16 %v20_v27, %v19_v26  ;;  %v22_v39 = vld [vmem:[%s2190_s0 + $0x38] sm:$0xff] }
   0x9   :  { %v84_v31 = vld [vmem:[%s2190_s0 + $0x228] sm:$0xff]  ;;  %v115_v32 = vld [vmem:[%s2190_s0 + $0x320] sm:$0xff]  ;;  %v161_v35 = vpack.c.bf16 %v52_v29, %v51_v28  ;;  %v53_v40 = vld [vmem:[%s2190_s0 + $0x130] sm:$0xff]  ;;  %v146_v46 = vpack.c.bf16 %v22_v39, %v21_v38 }
   0xa   :  { %v116_v33 = vld [vmem:[%s2190_s0 + $0x328] sm:$0xff]  ;;  %v177_v36 = vpack.c.bf16 %v84_v31, %v83_v30  ;;  %v54_v41 = vld [vmem:[%s2190_s0 + $0x138] sm:$0xff]  ;;  %v85_v42 = vld [vmem:[%s2190_s0 + $0x230] sm:$0xff] }
   0xb   :  { %v193_v37 = vpack.c.bf16 %v116_v33, %v115_v32  ;;  %v86_v43 = vld [vmem:[%s2190_s0 + $0x238] sm:$0xff]  ;;  %v117_v44 = vld [vmem:[%s2190_s0 + $0x330] sm:$0xff]  ;;  %v162_v47 = vpack.c.bf16 %v54_v41, %v53_v40  ;;  %v23_v50 = vld [vmem:[%s2190_s0 + $0x40] sm:$0xff] }
   0xc   :  { %v118_v45 = vld [vmem:[%s2190_s0 + $0x338] sm:$0xff]  ;;  %v178_v48 = vpack.c.bf16 %v86_v43, %v85_v42  ;;  %v24_v51 = vld [vmem:[%s2190_s0 + $0x48] sm:$0xff]  ;;  %v55_v52 = vld [vmem:[%s2190_s0 + $0x140] sm:$0xff] }
   0xd   :  { %v194_v49 = vpack.c.bf16 %v118_v45, %v117_v44  ;;  %v56_v53 = vld [vmem:[%s2190_s0 + $0x148] sm:$0xff]  ;;  %v87_v54 = vld [vmem:[%s2190_s0 + $0x240] sm:$0xff]  ;;  %v147_v58 = vpack.c.bf16 %v24_v51, %v23_v50  ;;  %v25_v62 = vld [vmem:[%s2190_s0 + $0x50] sm:$0xff] }
   0xe   :  { %v88_v55 = vld [vmem:[%s2190_s0 + $0x248] sm:$0xff]  ;;  %v119_v56 = vld [vmem:[%s2190_s0 + $0x340] sm:$0xff]  ;;  %v163_v59 = vpack.c.bf16 %v56_v53, %v55_v52  ;;  %v26_v63 = vld [vmem:[%s2190_s0 + $0x58] sm:$0xff] }
   0xf   :  { %v120_v57 = vld [vmem:[%s2190_s0 + $0x348] sm:$0xff]  ;;  %v179_v60 = vpack.c.bf16 %v88_v55, %v87_v54  ;;  %v57_v0 = vld [vmem:[%s2190_s0 + $0x150] sm:$0xff]  ;;  %v58_v1 = vld [vmem:[%s2190_s0 + $0x158] sm:$0xff]  ;;  %v148_v6 = vpack.c.bf16 %v26_v63, %v25_v62 }
  0x10   :  { %v195_v61 = vpack.c.bf16 %v120_v57, %v119_v56  ;;  %v89_v2 = vld [vmem:[%s2190_s0 + $0x250] sm:$0xff]  ;;  %v90_v3 = vld [vmem:[%s2190_s0 + $0x258] sm:$0xff]  ;;  %v164_v7 = vpack.c.bf16 %v58_v1, %v57_v0  ;;  %v27_v10 = vld [vmem:[%s2190_s0 + $0x60] sm:$0xff] }
  0x11   :  { %v121_v4 = vld [vmem:[%s2190_s0 + $0x350] sm:$0xff]  ;;  %v122_v5 = vld [vmem:[%s2190_s0 + $0x358] sm:$0xff]  ;;  %v180_v8 = vpack.c.bf16 %v90_v3, %v89_v2  ;;  %v28_v11 = vld [vmem:[%s2190_s0 + $0x68] sm:$0xff] }
  0x12   :  { %v196_v9 = vpack.c.bf16 %v122_v5, %v121_v4  ;;  %v59_v12 = vld [vmem:[%s2190_s0 + $0x160] sm:$0xff]  ;;  %v60_v13 = vld [vmem:[%s2190_s0 + $0x168] sm:$0xff]  ;;  %v149_v18 = vpack.c.bf16 %v28_v11, %v27_v10  ;;  %v93_v26 = vld [vmem:[%s2190_s0 + $0x270] sm:$0xff] }
  0x13   :  { %v91_v14 = vld [vmem:[%s2190_s0 + $0x260] sm:$0xff]  ;;  %v92_v15 = vld [vmem:[%s2190_s0 + $0x268] sm:$0xff]  ;;  %v165_v19 = vpack.c.bf16 %v60_v13, %v59_v12  ;;  %v94_v27 = vld [vmem:[%s2190_s0 + $0x278] sm:$0xff] }
  0x14   :  { %v123_v16 = vld [vmem:[%s2190_s0 + $0x360] sm:$0xff]  ;;  %v124_v17 = vld [vmem:[%s2190_s0 + $0x368] sm:$0xff]  ;;  %v181_v20 = vpack.c.bf16 %v92_v15, %v91_v14  ;;  %v125_v28 = vld [vmem:[%s2190_s0 + $0x370] sm:$0xff]  ;;  %v182_v32 = vpack.c.bf16 %v94_v27, %v93_v26 }
  0x15   :  { %v197_v21 = vpack.c.bf16 %v124_v17, %v123_v16  ;;  %v126_v29 = vld [vmem:[%s2190_s0 + $0x378] sm:$0xff]  ;;  %v64_v38 = vld [vmem:[%s2190_s0 + $0x188] sm:$0xff]  ;;  %v95_v39 = vld [vmem:[%s2190_s0 + $0x280] sm:$0xff] }
  0x16   :  { %1000 = vmatmul.msk.bf16.gmra.mxu0 %vm212_vm1, %v144_v22  ;;  %1016 = vmatmul.msk.bf16.gmra.mxu1 %vm212_vm1, %v160_v23  ;;  %v29_v22 = vld [vmem:[%s2190_s0 + $0x70] sm:$0xff]  ;;  %v30_v23 = vld [vmem:[%s2190_s0 + $0x78] sm:$0xff]  ;;  %v198_v33 = vpack.c.bf16 %v126_v29, %v125_v28  ;;  %v96_v40 = vld [vmem:[%s2190_s0 + $0x288] sm:$0xff] }
  0x17   :  { %1032 = vmatmul.msk.bf16.gmra.mxu2 %vm212_vm1, %v176_v24  ;;  %v61_v24 = vld [vmem:[%s2190_s0 + $0x170] sm:$0xff]  ;;  %v150_v30 = vpack.c.bf16 %v30_v23, %v29_v22  ;;  %v127_v41 = vld [vmem:[%s2190_s0 + $0x380] sm:$0xff]  ;;  %v128_v42 = vld [vmem:[%s2190_s0 + $0x388] sm:$0xff] }
  0x18   :  { %1048 = vmatmul.msk.bf16.gmra.mxu3 %vm212_vm1, %v192_v25  ;;  %v62_v25 = vld [vmem:[%s2190_s0 + $0x178] sm:$0xff]  ;;  %v33_v1 = vld [vmem:[%s2190_s0 + $0x90] sm:$0xff] }
  0x19   :  { %v166_v31 = vpack.c.bf16 %v62_v25, %v61_v24  ;;  %v34_v2 = vld [vmem:[%s2190_s0 + $0x98] sm:$0xff]  ;;  %v65_v3 = vld [vmem:[%s2190_s0 + $0x190] sm:$0xff] }
  0x1a   :  { %v66_v4 = vld [vmem:[%s2190_s0 + $0x198] sm:$0xff]  ;;  %v97_v5 = vld [vmem:[%s2190_s0 + $0x290] sm:$0xff]  ;;  %v152_v11 = vpack.c.bf16 %v34_v2, %v33_v1 }
  0x1b   :  { %v168_v12 = vpack.c.bf16 %v66_v4, %v65_v3 }
  0x26   :  { %1001 = vmatmul.msk.bf16.gmra.mxu0 %vm212_vm1, %v145_v34  ;;  %1017 = vmatmul.msk.bf16.gmra.mxu1 %vm212_vm1, %v161_v35  ;;  %v1318_v34 = vld [vmem:[%s2191_s2] ss:$0 sm:$0xff] }
  0x27   :  { %1033 = vmatmul.msk.bf16.gmra.mxu2 %vm212_vm1, %v177_v36  ;;  %v31_v35 = vld [vmem:[%s2190_s0 + $0x80] sm:$0xff]  ;;  %v32_v36 = vld [vmem:[%s2190_s0 + $0x88] sm:$0xff] }
  0x28   :  { %1049 = vmatmul.msk.bf16.gmra.mxu3 %vm212_vm1, %v193_v37  ;;  %v63_v37 = vld [vmem:[%s2190_s0 + $0x180] sm:$0xff]  ;;  %v151_v43 = vpack.c.bf16 %v32_v36, %v31_v35 }
  0x29   :  { %v167_v44 = vpack.c.bf16 %v64_v38, %v63_v37  ;;  %v35_v38 = vld [vmem:[%s2190_s0 + $0xa0] sm:$0xff] }
  0x36   :  { %1002 = vmatmul.msk.bf16.gmra.mxu0 %vm212_vm1, %v146_v46  ;;  %1018 = vmatmul.msk.bf16.gmra.mxu1 %vm212_vm1, %v162_v47  ;;  %v183_v47 = vpack.c.bf16 %v96_v40, %v95_v39  ;;  %v36_v39 = vld [vmem:[%s2190_s0 + $0xa8] sm:$0xff]  ;;  %v67_v40 = vld [vmem:[%s2190_s0 + $0x1a0] sm:$0xff] }
  0x37   :  { %1034 = vmatmul.msk.bf16.gmra.mxu2 %vm212_vm1, %v178_v48  ;;  %v199_v48 = vpack.c.bf16 %v128_v42, %v127_v41  ;;  %v68_v41 = vld [vmem:[%s2190_s0 + $0x1a8] sm:$0xff]  ;;  %v99_v42 = vld [vmem:[%s2190_s0 + $0x2a0] sm:$0xff] }
  0x38   :  { %1050 = vmatmul.msk.bf16.gmra.mxu3 %vm212_vm1, %v194_v49 }
  0x46   :  { %1003 = vmatmul.msk.bf16.gmra.mxu0 %vm212_vm1, %v147_v58  ;;  %1019 = vmatmul.msk.bf16.gmra.mxu1 %vm212_vm1, %v163_v59 }
  0x47   :  { %1035 = vmatmul.msk.bf16.gmra.mxu2 %vm212_vm1, %v179_v60 }
  0x48   :  { %1051 = vmatmul.msk.bf16.gmra.mxu3 %vm212_vm1, %v195_v61 }
  0x56   :  { %1004 = vmatmul.msk.bf16.gmra.mxu0 %vm212_vm1, %v148_v6  ;;  %1020 = vmatmul.msk.bf16.gmra.mxu1 %vm212_vm1, %v164_v7  ;;  %v98_v6 = vld [vmem:[%s2190_s0 + $0x298] sm:$0xff]  ;;  %v129_v7 = vld [vmem:[%s2190_s0 + $0x390] sm:$0xff] }
  0x57   :  { %1036 = vmatmul.msk.bf16.gmra.mxu2 %vm212_vm1, %v180_v8  ;;  %v130_v8 = vld [vmem:[%s2190_s0 + $0x398] sm:$0xff]  ;;  %v184_v17 = vpack.c.bf16 %v98_v6, %v97_v5 }
  0x58   :  { %1052 = vmatmul.msk.bf16.gmra.mxu3 %vm212_vm1, %v196_v9 }
  0x66   :  { %1005 = vmatmul.msk.bf16.gmra.mxu0 %vm212_vm1, %v149_v18  ;;  %1021 = vmatmul.msk.bf16.gmra.mxu1 %vm212_vm1, %v165_v19  ;;  %v200_v18 = vpack.c.bf16 %v130_v8, %v129_v7 }
  0x67   :  { %1037 = vmatmul.msk.bf16.gmra.mxu2 %vm212_vm1, %v181_v20 }
  0x68   :  { %1053 = vmatmul.msk.bf16.gmra.mxu3 %vm212_vm1, %v197_v21 }
  0x76   :  { %1006 = vmatmul.msk.bf16.gmra.mxu0 %vm212_vm1, %v150_v30  ;;  %1022 = vmatmul.msk.bf16.gmra.mxu1 %vm212_vm1, %v166_v31 }
  0x77   :  { %1038 = vmatmul.msk.bf16.gmra.mxu2 %vm212_vm1, %v182_v32 }
  0x78   :  { %1054 = vmatmul.msk.bf16.gmra.mxu3 %vm212_vm1, %v198_v33 }
  0x83   :  { %v418_v45 = vpop.f32.mrf.mxu0  ;;  %v498_v46 = vpop.f32.mrf.mxu1 }
  0x84   :  { %v419_v49 = vadd.f32 %v1318_v34, %v418_v45  ;;  %v499_v50 = vadd.f32 %v1318_v34, %v498_v46  ;;  %v132_v45 = vld [vmem:[%s2190_s0 + $0x3a8] sm:$0xff] }
  0x86   :  { %v738_v51 = vmax.f32 %v419_v49, 0.0  ;;  %v770_v52 = vmax.f32 %v499_v50, 0.0  ;;  %1007 = vmatmul.msk.bf16.gmra.mxu0 %vm212_vm1, %v151_v43  ;;  %1023 = vmatmul.msk.bf16.gmra.mxu1 %vm212_vm1, %v167_v44  ;;  %v100_v43 = vld [vmem:[%s2190_s0 + $0x2a8] sm:$0xff]  ;;  %v131_v44 = vld [vmem:[%s2190_s0 + $0x3a0] sm:$0xff]  ;;  %v169_v49 = vpack.c.bf16 %v68_v41, %v67_v40 }
  0x87   :  { %1039 = vmatmul.msk.bf16.gmra.mxu2 %vm212_vm1, %v183_v47 }
  0x88   :  { %1055 = vmatmul.msk.bf16.gmra.mxu3 %vm212_vm1, %v199_v48  ;;  %867 = vst.msk [vmem:[%s2192_s3] sm:$0xff] %vm866_vm2, %v738_v51  ;;  %v153_v48 = vpack.c.bf16 %v36_v39, %v35_v38 }
  0x89   :  { %899 = vst.msk [vmem:[%s2192_s3 + $0x100] sm:$0xff] %vm866_vm2, %v770_v52 }
  0x8a   :  { %v578_v53 = vpop.f32.mrf.mxu2 }
  0x8b   :  { %v658_v54 = vpop.f32.mrf.mxu3  ;;  %v579_v55 = vadd.f32 %v1318_v34, %v578_v53  ;;  %v420_v57 = vpop.f32.mrf.mxu0 }
  0x8c   :  { %v659_v56 = vadd.f32 %v1318_v34, %v658_v54  ;;  %v500_v58 = vpop.f32.mrf.mxu1  ;;  %v421_v59 = vadd.f32 %v1318_v34, %v420_v57  ;;  %v185_v54 = vpack.c.bf16 %v100_v43, %v99_v42 }
  0x8d   :  { %v501_v60 = vadd.f32 %v1318_v34, %v500_v58  ;;  %v802_v61 = vmax.f32 %v579_v55, 0.0  ;;  %v201_v55 = vpack.c.bf16 %v132_v45, %v131_v44 }
  0x8e   :  { %v834_v62 = vmax.f32 %v659_v56, 0.0  ;;  %v739_v63 = vmax.f32 %v421_v59, 0.0 }
  0x8f   :  { %v771_v0 = vmax.f32 %v501_v60, 0.0  ;;  %931 = vst.msk [vmem:[%s2192_s3 + $0x200] sm:$0xff] %vm866_vm2, %v802_v61 }
  0x90   :  { %963 = vst.msk [vmem:[%s2192_s3 + $0x300] sm:$0xff] %vm866_vm2, %v834_v62 }
  0x91   :  { %868 = vst.msk [vmem:[%s2192_s3 + $0x8] sm:$0xff] %vm866_vm2, %v739_v63 }
  0x92   :  { %900 = vst.msk [vmem:[%s2192_s3 + $0x108] sm:$0xff] %vm866_vm2, %v771_v0  ;;  %v580_v9 = vpop.f32.mrf.mxu2 }
  0x93   :  { %v660_v10 = vpop.f32.mrf.mxu3  ;;  %v581_v13 = vadd.f32 %v1318_v34, %v580_v9  ;;  %v423_v15 = vpop.f32.mrf.mxu0 }
  0x94   :  { %v661_v14 = vadd.f32 %v1318_v34, %v660_v10  ;;  %v503_v16 = vpop.f32.mrf.mxu1  ;;  %v424_v19 = vadd.f32 %v1318_v34, %v423_v15  ;;  %v37_v10 = vld [vmem:[%s2190_s0 + $0xb0] sm:$0xff]  ;;  %v102_v15 = vld [vmem:[%s2190_s0 + $0x2b8] sm:$0xff] }
  0x95   :  { %v504_v20 = vadd.f32 %v1318_v34, %v503_v16  ;;  %v803_v21 = vmax.f32 %v581_v13, 0.0  ;;  %v70_v13 = vld [vmem:[%s2190_s0 + $0x1b8] sm:$0xff]  ;;  %v133_v16 = vld [vmem:[%s2190_s0 + $0x3b0] sm:$0xff] }
  0x96   :  { %v835_v22 = vmax.f32 %v661_v14, 0.0  ;;  %v740_v23 = vmax.f32 %v424_v19, 0.0  ;;  %1008 = vmatmul.msk.bf16.gmra.mxu0 %vm212_vm1, %v152_v11  ;;  %1024 = vmatmul.msk.bf16.gmra.mxu1 %vm212_vm1, %v168_v12  ;;  %v38_v11 = vld [vmem:[%s2190_s0 + $0xb8] sm:$0xff]  ;;  %v69_v12 = vld [vmem:[%s2190_s0 + $0x1b0] sm:$0xff] }
  0x97   :  { %v772_v24 = vmax.f32 %v504_v20, 0.0  ;;  %932 = vst.msk [vmem:[%s2192_s3 + $0x208] sm:$0xff] %vm866_vm2, %v803_v21  ;;  %1040 = vmatmul.msk.bf16.gmra.mxu2 %vm212_vm1, %v184_v17  ;;  %v101_v14 = vld [vmem:[%s2190_s0 + $0x2b0] sm:$0xff]  ;;  %v134_v17 = vld [vmem:[%s2190_s0 + $0x3b8] sm:$0xff]  ;;  %v154_v20 = vpack.c.bf16 %v38_v11, %v37_v10  ;;  %v170_v21 = vpack.c.bf16 %v70_v13, %v69_v12 }
  0x98   :  { %1056 = vmatmul.msk.bf16.gmra.mxu3 %vm212_vm1, %v200_v18  ;;  %964 = vst.msk [vmem:[%s2192_s3 + $0x308] sm:$0xff] %vm866_vm2, %v835_v22 }
  0x99   :  { %869 = vst.msk [vmem:[%s2192_s3 + $0x10] sm:$0xff] %vm866_vm2, %v740_v23 }
  0x9a   :  { %901 = vst.msk [vmem:[%s2192_s3 + $0x110] sm:$0xff] %vm866_vm2, %v772_v24  ;;  %v583_v25 = vpop.f32.mrf.mxu2 }
  0x9b   :  { %v663_v26 = vpop.f32.mrf.mxu3  ;;  %v584_v27 = vadd.f32 %v1318_v34, %v583_v25  ;;  %v425_v29 = vpop.f32.mrf.mxu0 }
  0x9c   :  { %v664_v28 = vadd.f32 %v1318_v34, %v663_v26  ;;  %v505_v30 = vpop.f32.mrf.mxu1  ;;  %v426_v31 = vadd.f32 %v1318_v34, %v425_v29  ;;  %v186_v26 = vpack.c.bf16 %v102_v15, %v101_v14 }
  0x9d   :  { %v506_v32 = vadd.f32 %v1318_v34, %v505_v30  ;;  %v804_v33 = vmax.f32 %v584_v27, 0.0  ;;  %v202_v27 = vpack.c.bf16 %v134_v17, %v133_v16 }
  0x9e   :  { %v836_v35 = vmax.f32 %v664_v28, 0.0  ;;  %v741_v36 = vmax.f32 %v426_v31, 0.0 }
  0x9f   :  { %v773_v37 = vmax.f32 %v506_v32, 0.0  ;;  %933 = vst.msk [vmem:[%s2192_s3 + $0x210] sm:$0xff] %vm866_vm2, %v804_v33 }
  0xa0   :  { %965 = vst.msk [vmem:[%s2192_s3 + $0x310] sm:$0xff] %vm866_vm2, %v836_v35 }
  0xa1   :  { %870 = vst.msk [vmem:[%s2192_s3 + $0x18] sm:$0xff] %vm866_vm2, %v741_v36 }
  0xa2   :  { %902 = vst.msk [vmem:[%s2192_s3 + $0x118] sm:$0xff] %vm866_vm2, %v773_v37  ;;  %v585_v46 = vpop.f32.mrf.mxu2 }
  0xa3   :  { %v665_v47 = vpop.f32.mrf.mxu3  ;;  %v586_v50 = vadd.f32 %v1318_v34, %v585_v46  ;;  %v428_v52 = vpop.f32.mrf.mxu0 }
  0xa4   :  { %v666_v51 = vadd.f32 %v1318_v34, %v665_v47  ;;  %v508_v53 = vpop.f32.mrf.mxu1  ;;  %v429_v56 = vadd.f32 %v1318_v34, %v428_v52  ;;  %v39_v47 = vld [vmem:[%s2190_s0 + $0xc0] sm:$0xff]  ;;  %v104_v52 = vld [vmem:[%s2190_s0 + $0x2c8] sm:$0xff] }
  0xa5   :  { %v509_v57 = vadd.f32 %v1318_v34, %v508_v53  ;;  %v805_v58 = vmax.f32 %v586_v50, 0.0  ;;  %v72_v50 = vld [vmem:[%s2190_s0 + $0x1c8] sm:$0xff]  ;;  %v135_v53 = vld [vmem:[%s2190_s0 + $0x3c0] sm:$0xff] }
  0xa6   :  { %v837_v59 = vmax.f32 %v666_v51, 0.0  ;;  %v742_v60 = vmax.f32 %v429_v56, 0.0  ;;  %1009 = vmatmul.msk.bf16.gmra.mxu0 %vm212_vm1, %v153_v48  ;;  %1025 = vmatmul.msk.bf16.gmra.mxu1 %vm212_vm1, %v169_v49  ;;  %v40_v48 = vld [vmem:[%s2190_s0 + $0xc8] sm:$0xff]  ;;  %v71_v49 = vld [vmem:[%s2190_s0 + $0x1c0] sm:$0xff] }
  0xa7   :  { %v774_v61 = vmax.f32 %v509_v57, 0.0  ;;  %934 = vst.msk [vmem:[%s2192_s3 + $0x218] sm:$0xff] %vm866_vm2, %v805_v58  ;;  %1041 = vmatmul.msk.bf16.gmra.mxu2 %vm212_vm1, %v185_v54  ;;  %v103_v51 = vld [vmem:[%s2190_s0 + $0x2c0] sm:$0xff]  ;;  %v136_v54 = vld [vmem:[%s2190_s0 + $0x3c8] sm:$0xff]  ;;  %v155_v57 = vpack.c.bf16 %v40_v48, %v39_v47  ;;  %v171_v58 = vpack.c.bf16 %v72_v50, %v71_v49 }
  0xa8   :  { %1057 = vmatmul.msk.bf16.gmra.mxu3 %vm212_vm1, %v201_v55  ;;  %966 = vst.msk [vmem:[%s2192_s3 + $0x318] sm:$0xff] %vm866_vm2, %v837_v59 }
  0xa9   :  { %871 = vst.msk [vmem:[%s2192_s3 + $0x20] sm:$0xff] %vm866_vm2, %v742_v60 }
  0xaa   :  { %903 = vst.msk [vmem:[%s2192_s3 + $0x120] sm:$0xff] %vm866_vm2, %v774_v61  ;;  %v588_v62 = vpop.f32.mrf.mxu2 }
  0xab   :  { %v668_v63 = vpop.f32.mrf.mxu3  ;;  %v589_v0 = vadd.f32 %v1318_v34, %v588_v62  ;;  %v430_v2 = vpop.f32.mrf.mxu0 }
  0xac   :  { %v669_v1 = vadd.f32 %v1318_v34, %v668_v63  ;;  %v510_v3 = vpop.f32.mrf.mxu1  ;;  %v431_v4 = vadd.f32 %v1318_v34, %v430_v2  ;;  %v187_v63 = vpack.c.bf16 %v104_v52, %v103_v51 }
  0xad   :  { %v511_v5 = vadd.f32 %v1318_v34, %v510_v3  ;;  %v806_v6 = vmax.f32 %v589_v0, 0.0  ;;  %v203_v0 = vpack.c.bf16 %v136_v54, %v135_v53 }
  0xae   :  { %v838_v7 = vmax.f32 %v669_v1, 0.0  ;;  %v743_v8 = vmax.f32 %v431_v4, 0.0 }
  0xaf   :  { %v775_v9 = vmax.f32 %v511_v5, 0.0  ;;  %935 = vst.msk [vmem:[%s2192_s3 + $0x220] sm:$0xff] %vm866_vm2, %v806_v6 }
  0xb0   :  { %967 = vst.msk [vmem:[%s2192_s3 + $0x320] sm:$0xff] %vm866_vm2, %v838_v7 }
  0xb1   :  { %872 = vst.msk [vmem:[%s2192_s3 + $0x28] sm:$0xff] %vm866_vm2, %v743_v8 }
  0xb2   :  { %904 = vst.msk [vmem:[%s2192_s3 + $0x128] sm:$0xff] %vm866_vm2, %v775_v9  ;;  %v590_v18 = vpop.f32.mrf.mxu2 }
  0xb3   :  { %v670_v19 = vpop.f32.mrf.mxu3  ;;  %v591_v22 = vadd.f32 %v1318_v34, %v590_v18  ;;  %v433_v24 = vpop.f32.mrf.mxu0 }
  0xb4   :  { %v671_v23 = vadd.f32 %v1318_v34, %v670_v19  ;;  %v513_v25 = vpop.f32.mrf.mxu1  ;;  %v434_v28 = vadd.f32 %v1318_v34, %v433_v24  ;;  %v41_v19 = vld [vmem:[%s2190_s0 + $0xd0] sm:$0xff]  ;;  %v106_v24 = vld [vmem:[%s2190_s0 + $0x2d8] sm:$0xff] }
  0xb5   :  { %v514_v29 = vadd.f32 %v1318_v34, %v513_v25  ;;  %v807_v30 = vmax.f32 %v591_v22, 0.0  ;;  %v74_v22 = vld [vmem:[%s2190_s0 + $0x1d8] sm:$0xff]  ;;  %v137_v25 = vld [vmem:[%s2190_s0 + $0x3d0] sm:$0xff] }
  0xb6   :  { %v839_v31 = vmax.f32 %v671_v23, 0.0  ;;  %v744_v32 = vmax.f32 %v434_v28, 0.0  ;;  %1010 = vmatmul.msk.bf16.gmra.mxu0 %vm212_vm1, %v154_v20  ;;  %1026 = vmatmul.msk.bf16.gmra.mxu1 %vm212_vm1, %v170_v21  ;;  %v42_v20 = vld [vmem:[%s2190_s0 + $0xd8] sm:$0xff]  ;;  %v73_v21 = vld [vmem:[%s2190_s0 + $0x1d0] sm:$0xff] }
  0xb7   :  { %v776_v33 = vmax.f32 %v514_v29, 0.0  ;;  %936 = vst.msk [vmem:[%s2192_s3 + $0x228] sm:$0xff] %vm866_vm2, %v807_v30  ;;  %1042 = vmatmul.msk.bf16.gmra.mxu2 %vm212_vm1, %v186_v26  ;;  %v105_v23 = vld [vmem:[%s2190_s0 + $0x2d0] sm:$0xff]  ;;  %v138_v26 = vld [vmem:[%s2190_s0 + $0x3d8] sm:$0xff]  ;;  %v156_v29 = vpack.c.bf16 %v42_v20, %v41_v19  ;;  %v172_v30 = vpack.c.bf16 %v74_v22, %v73_v21 }
  0xb8   :  { %1058 = vmatmul.msk.bf16.gmra.mxu3 %vm212_vm1, %v202_v27  ;;  %968 = vst.msk [vmem:[%s2192_s3 + $0x328] sm:$0xff] %vm866_vm2, %v839_v31 }
  0xb9   :  { %873 = vst.msk [vmem:[%s2192_s3 + $0x30] sm:$0xff] %vm866_vm2, %v744_v32 }
  0xba   :  { %905 = vst.msk [vmem:[%s2192_s3 + $0x130] sm:$0xff] %vm866_vm2, %v776_v33  ;;  %v593_v35 = vpop.f32.mrf.mxu2 }
  0xbb   :  { %v673_v36 = vpop.f32.mrf.mxu3  ;;  %v594_v37 = vadd.f32 %v1318_v34, %v593_v35  ;;  %v435_v39 = vpop.f32.mrf.mxu0 }
  0xbc   :  { %v674_v38 = vadd.f32 %v1318_v34, %v673_v36  ;;  %v515_v40 = vpop.f32.mrf.mxu1  ;;  %v436_v41 = vadd.f32 %v1318_v34, %v435_v39  ;;  %v188_v36 = vpack.c.bf16 %v106_v24, %v105_v23 }
  0xbd   :  { %v516_v42 = vadd.f32 %v1318_v34, %v515_v40  ;;  %v808_v43 = vmax.f32 %v594_v37, 0.0  ;;  %v204_v37 = vpack.c.bf16 %v138_v26, %v137_v25 }
  0xbe   :  { %v840_v44 = vmax.f32 %v674_v38, 0.0  ;;  %v745_v45 = vmax.f32 %v436_v41, 0.0 }
  0xbf   :  { %v777_v46 = vmax.f32 %v516_v42, 0.0  ;;  %937 = vst.msk [vmem:[%s2192_s3 + $0x230] sm:$0xff] %vm866_vm2, %v808_v43 }
  0xc0   :  { %969 = vst.msk [vmem:[%s2192_s3 + $0x330] sm:$0xff] %vm866_vm2, %v840_v44 }
  0xc1   :  { %874 = vst.msk [vmem:[%s2192_s3 + $0x38] sm:$0xff] %vm866_vm2, %v745_v45 }
  0xc2   :  { %906 = vst.msk [vmem:[%s2192_s3 + $0x138] sm:$0xff] %vm866_vm2, %v777_v46  ;;  %v595_v55 = vpop.f32.mrf.mxu2 }
  0xc3   :  { %v675_v56 = vpop.f32.mrf.mxu3  ;;  %v596_v59 = vadd.f32 %v1318_v34, %v595_v55  ;;  %v438_v61 = vpop.f32.mrf.mxu0 }
  0xc4   :  { %v676_v60 = vadd.f32 %v1318_v34, %v675_v56  ;;  %v518_v62 = vpop.f32.mrf.mxu1  ;;  %v439_v1 = vadd.f32 %v1318_v34, %v438_v61  ;;  %v43_v56 = vld [vmem:[%s2190_s0 + $0xe0] sm:$0xff]  ;;  %v108_v61 = vld [vmem:[%s2190_s0 + $0x2e8] sm:$0xff] }
  0xc5   :  { %v519_v2 = vadd.f32 %v1318_v34, %v518_v62  ;;  %v809_v3 = vmax.f32 %v596_v59, 0.0  ;;  %v76_v59 = vld [vmem:[%s2190_s0 + $0x1e8] sm:$0xff]  ;;  %v139_v62 = vld [vmem:[%s2190_s0 + $0x3e0] sm:$0xff] }
  0xc6   :  { %v841_v4 = vmax.f32 %v676_v60, 0.0  ;;  %v746_v5 = vmax.f32 %v439_v1, 0.0  ;;  %1011 = vmatmul.msk.bf16.gmra.mxu0 %vm212_vm1, %v155_v57  ;;  %1027 = vmatmul.msk.bf16.gmra.mxu1 %vm212_vm1, %v171_v58  ;;  %v44_v57 = vld [vmem:[%s2190_s0 + $0xe8] sm:$0xff]  ;;  %v75_v58 = vld [vmem:[%s2190_s0 + $0x1e0] sm:$0xff] }
  0xc7   :  { %v778_v6 = vmax.f32 %v519_v2, 0.0  ;;  %938 = vst.msk [vmem:[%s2192_s3 + $0x238] sm:$0xff] %vm866_vm2, %v809_v3  ;;  %1043 = vmatmul.msk.bf16.gmra.mxu2 %vm212_vm1, %v187_v63  ;;  %v107_v60 = vld [vmem:[%s2190_s0 + $0x2e0] sm:$0xff]  ;;  %v140_v63 = vld [vmem:[%s2190_s0 + $0x3e8] sm:$0xff]  ;;  %v157_v2 = vpack.c.bf16 %v44_v57, %v43_v56  ;;  %v173_v3 = vpack.c.bf16 %v76_v59, %v75_v58 }
  0xc8   :  { %1059 = vmatmul.msk.bf16.gmra.mxu3 %vm212_vm1, %v203_v0  ;;  %970 = vst.msk [vmem:[%s2192_s3 + $0x338] sm:$0xff] %vm866_vm2, %v841_v4 }
  0xc9   :  { %875 = vst.msk [vmem:[%s2192_s3 + $0x40] sm:$0xff] %vm866_vm2, %v746_v5 }
  0xca   :  { %907 = vst.msk [vmem:[%s2192_s3 + $0x140] sm:$0xff] %vm866_vm2, %v778_v6  ;;  %v598_v7 = vpop.f32.mrf.mxu2 }
  0xcb   :  { %v678_v8 = vpop.f32.mrf.mxu3  ;;  %v599_v9 = vadd.f32 %v1318_v34, %v598_v7  ;;  %v440_v11 = vpop.f32.mrf.mxu0 }
  0xcc   :  { %v679_v10 = vadd.f32 %v1318_v34, %v678_v8  ;;  %v520_v12 = vpop.f32.mrf.mxu1  ;;  %v441_v13 = vadd.f32 %v1318_v34, %v440_v11  ;;  %v189_v8 = vpack.c.bf16 %v108_v61, %v107_v60 }
  0xcd   :  { %v521_v14 = vadd.f32 %v1318_v34, %v520_v12  ;;  %v810_v15 = vmax.f32 %v599_v9, 0.0  ;;  %v205_v9 = vpack.c.bf16 %v140_v63, %v139_v62 }
  0xce   :  { %v842_v16 = vmax.f32 %v679_v10, 0.0  ;;  %v747_v17 = vmax.f32 %v441_v13, 0.0 }
  0xcf   :  { %v779_v18 = vmax.f32 %v521_v14, 0.0  ;;  %939 = vst.msk [vmem:[%s2192_s3 + $0x240] sm:$0xff] %vm866_vm2, %v810_v15 }
  0xd0   :  { %971 = vst.msk [vmem:[%s2192_s3 + $0x340] sm:$0xff] %vm866_vm2, %v842_v16 }
  0xd1   :  { %876 = vst.msk [vmem:[%s2192_s3 + $0x48] sm:$0xff] %vm866_vm2, %v747_v17 }
  0xd2   :  { %908 = vst.msk [vmem:[%s2192_s3 + $0x148] sm:$0xff] %vm866_vm2, %v779_v18  ;;  %v600_v27 = vpop.f32.mrf.mxu2 }
  0xd3   :  { %v680_v28 = vpop.f32.mrf.mxu3  ;;  %v601_v31 = vadd.f32 %v1318_v34, %v600_v27  ;;  %v443_v33 = vpop.f32.mrf.mxu0 }
  0xd4   :  { %v681_v32 = vadd.f32 %v1318_v34, %v680_v28  ;;  %v523_v35 = vpop.f32.mrf.mxu1  ;;  %v444_v38 = vadd.f32 %v1318_v34, %v443_v33  ;;  %v45_v28 = vld [vmem:[%s2190_s0 + $0xf0] sm:$0xff]  ;;  %v110_v33 = vld [vmem:[%s2190_s0 + $0x2f8] sm:$0xff] }
  0xd5   :  { %v524_v39 = vadd.f32 %v1318_v34, %v523_v35  ;;  %v811_v40 = vmax.f32 %v601_v31, 0.0  ;;  %v78_v31 = vld [vmem:[%s2190_s0 + $0x1f8] sm:$0xff]  ;;  %v141_v35 = vld [vmem:[%s2190_s0 + $0x3f0] sm:$0xff] }
  0xd6   :  { %v843_v41 = vmax.f32 %v681_v32, 0.0  ;;  %v748_v42 = vmax.f32 %v444_v38, 0.0  ;;  %1012 = vmatmul.msk.bf16.gmra.mxu0 %vm212_vm1, %v156_v29  ;;  %1028 = vmatmul.msk.bf16.gmra.mxu1 %vm212_vm1, %v172_v30  ;;  %v46_v29 = vld [vmem:[%s2190_s0 + $0xf8] sm:$0xff]  ;;  %v77_v30 = vld [vmem:[%s2190_s0 + $0x1f0] sm:$0xff] }
  0xd7   :  { %v780_v43 = vmax.f32 %v524_v39, 0.0  ;;  %940 = vst.msk [vmem:[%s2192_s3 + $0x248] sm:$0xff] %vm866_vm2, %v811_v40  ;;  %1044 = vmatmul.msk.bf16.gmra.mxu2 %vm212_vm1, %v188_v36  ;;  %v109_v32 = vld [vmem:[%s2190_s0 + $0x2f0] sm:$0xff]  ;;  %v142_v36 = vld [vmem:[%s2190_s0 + $0x3f8] sm:$0xff]  ;;  %v158_v39 = vpack.c.bf16 %v46_v29, %v45_v28  ;;  %v174_v40 = vpack.c.bf16 %v78_v31, %v77_v30 }
  0xd8   :  { %1060 = vmatmul.msk.bf16.gmra.mxu3 %vm212_vm1, %v204_v37  ;;  %972 = vst.msk [vmem:[%s2192_s3 + $0x348] sm:$0xff] %vm866_vm2, %v843_v41 }
  0xd9   :  { %877 = vst.msk [vmem:[%s2192_s3 + $0x50] sm:$0xff] %vm866_vm2, %v748_v42 }
  0xda   :  { %909 = vst.msk [vmem:[%s2192_s3 + $0x150] sm:$0xff] %vm866_vm2, %v780_v43  ;;  %v603_v44 = vpop.f32.mrf.mxu2 }
  0xdb   :  { %v683_v45 = vpop.f32.mrf.mxu3  ;;  %v604_v46 = vadd.f32 %v1318_v34, %v603_v44  ;;  %v445_v48 = vpop.f32.mrf.mxu0 }
  0xdc   :  { %v684_v47 = vadd.f32 %v1318_v34, %v683_v45  ;;  %v525_v49 = vpop.f32.mrf.mxu1  ;;  %v446_v50 = vadd.f32 %v1318_v34, %v445_v48  ;;  %v190_v45 = vpack.c.bf16 %v110_v33, %v109_v32 }
  0xdd   :  { %v526_v51 = vadd.f32 %v1318_v34, %v525_v49  ;;  %v812_v52 = vmax.f32 %v604_v46, 0.0  ;;  %v206_v46 = vpack.c.bf16 %v142_v36, %v141_v35 }
  0xde   :  { %v844_v53 = vmax.f32 %v684_v47, 0.0  ;;  %v749_v54 = vmax.f32 %v446_v50, 0.0 }
  0xdf   :  { %v781_v55 = vmax.f32 %v526_v51, 0.0  ;;  %941 = vst.msk [vmem:[%s2192_s3 + $0x250] sm:$0xff] %vm866_vm2, %v812_v52 }
  0xe0   :  { %973 = vst.msk [vmem:[%s2192_s3 + $0x350] sm:$0xff] %vm866_vm2, %v844_v53 }
  0xe1   :  { %878 = vst.msk [vmem:[%s2192_s3 + $0x58] sm:$0xff] %vm866_vm2, %v749_v54 }
  0xe2   :  { %910 = vst.msk [vmem:[%s2192_s3 + $0x158] sm:$0xff] %vm866_vm2, %v781_v55  ;;  %v605_v0 = vpop.f32.mrf.mxu2 }
  0xe3   :  { %v685_v1 = vpop.f32.mrf.mxu3  ;;  %v606_v4 = vadd.f32 %v1318_v34, %v605_v0  ;;  %v448_v6 = vpop.f32.mrf.mxu0 }
  0xe4   :  { %v686_v5 = vadd.f32 %v1318_v34, %v685_v1  ;;  %v528_v7 = vpop.f32.mrf.mxu1  ;;  %v449_v10 = vadd.f32 %v1318_v34, %v448_v6 }
  0xe5   :  { %v529_v11 = vadd.f32 %v1318_v34, %v528_v7  ;;  %v813_v12 = vmax.f32 %v606_v4, 0.0 }
  0xe6   :  { %v845_v13 = vmax.f32 %v686_v5, 0.0  ;;  %v750_v14 = vmax.f32 %v449_v10, 0.0  ;;  %1013 = vmatmul.msk.bf16.gmra.mxu0 %vm212_vm1, %v157_v2  ;;  %1029 = vmatmul.msk.bf16.gmra.mxu1 %vm212_vm1, %v173_v3 }
  0xe7   :  { %v782_v15 = vmax.f32 %v529_v11, 0.0  ;;  %942 = vst.msk [vmem:[%s2192_s3 + $0x258] sm:$0xff] %vm866_vm2, %v813_v12  ;;  %1045 = vmatmul.msk.bf16.gmra.mxu2 %vm212_vm1, %v189_v8 }
  0xe8   :  { %1061 = vmatmul.msk.bf16.gmra.mxu3 %vm212_vm1, %v205_v9  ;;  %974 = vst.msk [vmem:[%s2192_s3 + $0x358] sm:$0xff] %vm866_vm2, %v845_v13 }
  0xe9   :  { %879 = vst.msk [vmem:[%s2192_s3 + $0x60] sm:$0xff] %vm866_vm2, %v750_v14 }
  0xea   :  { %911 = vst.msk [vmem:[%s2192_s3 + $0x160] sm:$0xff] %vm866_vm2, %v782_v15  ;;  %v608_v16 = vpop.f32.mrf.mxu2 }
  0xeb   :  { %v688_v17 = vpop.f32.mrf.mxu3  ;;  %v609_v18 = vadd.f32 %v1318_v34, %v608_v16  ;;  %v450_v20 = vpop.f32.mrf.mxu0 }
  0xec   :  { %v689_v19 = vadd.f32 %v1318_v34, %v688_v17  ;;  %v530_v21 = vpop.f32.mrf.mxu1  ;;  %v451_v22 = vadd.f32 %v1318_v34, %v450_v20 }
  0xed   :  { %v531_v23 = vadd.f32 %v1318_v34, %v530_v21  ;;  %v814_v24 = vmax.f32 %v609_v18, 0.0 }
  0xee   :  { %v846_v25 = vmax.f32 %v689_v19, 0.0  ;;  %v751_v26 = vmax.f32 %v451_v22, 0.0 }
  0xef   :  { %v783_v27 = vmax.f32 %v531_v23, 0.0  ;;  %943 = vst.msk [vmem:[%s2192_s3 + $0x260] sm:$0xff] %vm866_vm2, %v814_v24 }
  0xf0   :  { %975 = vst.msk [vmem:[%s2192_s3 + $0x360] sm:$0xff] %vm866_vm2, %v846_v25 }
  0xf1   :  { %880 = vst.msk [vmem:[%s2192_s3 + $0x68] sm:$0xff] %vm866_vm2, %v751_v26 }
  0xf2   :  { %912 = vst.msk [vmem:[%s2192_s3 + $0x168] sm:$0xff] %vm866_vm2, %v783_v27  ;;  %v610_v37 = vpop.f32.mrf.mxu2 }
  0xf3   :  { %v690_v38 = vpop.f32.mrf.mxu3  ;;  %v611_v41 = vadd.f32 %v1318_v34, %v610_v37  ;;  %v453_v43 = vpop.f32.mrf.mxu0 }
  0xf4   :  { %v691_v42 = vadd.f32 %v1318_v34, %v690_v38  ;;  %v533_v44 = vpop.f32.mrf.mxu1  ;;  %v454_v47 = vadd.f32 %v1318_v34, %v453_v43 }
  0xf5   :  { %v534_v48 = vadd.f32 %v1318_v34, %v533_v44  ;;  %v815_v49 = vmax.f32 %v611_v41, 0.0 }
  0xf6   :  { %v847_v50 = vmax.f32 %v691_v42, 0.0  ;;  %v752_v51 = vmax.f32 %v454_v47, 0.0  ;;  %1014 = vmatmul.msk.bf16.gmra.mxu0 %vm212_vm1, %v158_v39  ;;  %1030 = vmatmul.msk.bf16.gmra.mxu1 %vm212_vm1, %v174_v40 }
  0xf7   :  { %v784_v52 = vmax.f32 %v534_v48, 0.0  ;;  %944 = vst.msk [vmem:[%s2192_s3 + $0x268] sm:$0xff] %vm866_vm2, %v815_v49  ;;  %1046 = vmatmul.msk.bf16.gmra.mxu2 %vm212_vm1, %v190_v45 }
  0xf8   :  { %1062 = vmatmul.msk.bf16.gmra.mxu3 %vm212_vm1, %v206_v46  ;;  %976 = vst.msk [vmem:[%s2192_s3 + $0x368] sm:$0xff] %vm866_vm2, %v847_v50 }
  0xf9   :  { %881 = vst.msk [vmem:[%s2192_s3 + $0x70] sm:$0xff] %vm866_vm2, %v752_v51 }
  0xfa   :  { %913 = vst.msk [vmem:[%s2192_s3 + $0x170] sm:$0xff] %vm866_vm2, %v784_v52  ;;  %v613_v53 = vpop.f32.mrf.mxu2 }
  0xfb   :  { %v693_v54 = vpop.f32.mrf.mxu3  ;;  %v614_v55 = vadd.f32 %v1318_v34, %v613_v53  ;;  %v455_v57 = vpop.f32.mrf.mxu0 }
  0xfc   :  { %v694_v56 = vadd.f32 %v1318_v34, %v693_v54  ;;  %v535_v58 = vpop.f32.mrf.mxu1  ;;  %v456_v59 = vadd.f32 %v1318_v34, %v455_v57 }
  0xfd   :  { %v536_v60 = vadd.f32 %v1318_v34, %v535_v58  ;;  %v816_v61 = vmax.f32 %v614_v55, 0.0 }
  0xfe   :  { %v848_v62 = vmax.f32 %v694_v56, 0.0  ;;  %v753_v63 = vmax.f32 %v456_v59, 0.0 }
  0xff   :  { %v785_v0 = vmax.f32 %v536_v60, 0.0  ;;  %945 = vst.msk [vmem:[%s2192_s3 + $0x270] sm:$0xff] %vm866_vm2, %v816_v61 }
 0x100   :  { %977 = vst.msk [vmem:[%s2192_s3 + $0x370] sm:$0xff] %vm866_vm2, %v848_v62 }
 0x101   :  { %882 = vst.msk [vmem:[%s2192_s3 + $0x78] sm:$0xff] %vm866_vm2, %v753_v63 }
 0x102   :  { %914 = vst.msk [vmem:[%s2192_s3 + $0x178] sm:$0xff] %vm866_vm2, %v785_v0  ;;  %v615_v1 = vpop.f32.mrf.mxu2 }
 0x103   :  { %v695_v2 = vpop.f32.mrf.mxu3  ;;  %v616_v3 = vadd.f32 %v1318_v34, %v615_v1  ;;  %v458_v5 = vpop.f32.mrf.mxu0 }
 0x104   :  { %v696_v4 = vadd.f32 %v1318_v34, %v695_v2  ;;  %v538_v6 = vpop.f32.mrf.mxu1  ;;  %v459_v7 = vadd.f32 %v1318_v34, %v458_v5 }
 0x105   :  { %v539_v8 = vadd.f32 %v1318_v34, %v538_v6  ;;  %v817_v9 = vmax.f32 %v616_v3, 0.0 }
 0x106   :  { %v849_v10 = vmax.f32 %v696_v4, 0.0  ;;  %v754_v11 = vmax.f32 %v459_v7, 0.0 }
 0x107   :  { %v786_v12 = vmax.f32 %v539_v8, 0.0  ;;  %946 = vst.msk [vmem:[%s2192_s3 + $0x278] sm:$0xff] %vm866_vm2, %v817_v9 }
 0x108   :  { %978 = vst.msk [vmem:[%s2192_s3 + $0x378] sm:$0xff] %vm866_vm2, %v849_v10 }
 0x109   :  { %883 = vst.msk [vmem:[%s2192_s3 + $0x80] sm:$0xff] %vm866_vm2, %v754_v11 }
 0x10a   :  { %915 = vst.msk [vmem:[%s2192_s3 + $0x180] sm:$0xff] %vm866_vm2, %v786_v12  ;;  %v618_v13 = vpop.f32.mrf.mxu2 }
 0x10b   :  { %v698_v14 = vpop.f32.mrf.mxu3  ;;  %v619_v15 = vadd.f32 %v1318_v34, %v618_v13  ;;  %v460_v17 = vpop.f32.mrf.mxu0 }
 0x10c   :  { %v699_v16 = vadd.f32 %v1318_v34, %v698_v14  ;;  %v540_v18 = vpop.f32.mrf.mxu1  ;;  %v461_v19 = vadd.f32 %v1318_v34, %v460_v17 }
 0x10d   :  { %v541_v20 = vadd.f32 %v1318_v34, %v540_v18  ;;  %v818_v21 = vmax.f32 %v619_v15, 0.0 }
 0x10e   :  { %v850_v22 = vmax.f32 %v699_v16, 0.0  ;;  %v755_v23 = vmax.f32 %v461_v19, 0.0 }
 0x10f   :  { %v787_v24 = vmax.f32 %v541_v20, 0.0  ;;  %947 = vst.msk [vmem:[%s2192_s3 + $0x280] sm:$0xff] %vm866_vm2, %v818_v21 }
 0x110   :  { %979 = vst.msk [vmem:[%s2192_s3 + $0x380] sm:$0xff] %vm866_vm2, %v850_v22 }
 0x111   :  { %884 = vst.msk [vmem:[%s2192_s3 + $0x88] sm:$0xff] %vm866_vm2, %v755_v23 }
 0x112   :  { %916 = vst.msk [vmem:[%s2192_s3 + $0x188] sm:$0xff] %vm866_vm2, %v787_v24  ;;  %v620_v25 = vpop.f32.mrf.mxu2 }
 0x113   :  { %v700_v26 = vpop.f32.mrf.mxu3  ;;  %v621_v27 = vadd.f32 %v1318_v34, %v620_v25  ;;  %v463_v29 = vpop.f32.mrf.mxu0 }
 0x114   :  { %v701_v28 = vadd.f32 %v1318_v34, %v700_v26  ;;  %v543_v30 = vpop.f32.mrf.mxu1  ;;  %v464_v31 = vadd.f32 %v1318_v34, %v463_v29 }
 0x115   :  { %v544_v32 = vadd.f32 %v1318_v34, %v543_v30  ;;  %v819_v33 = vmax.f32 %v621_v27, 0.0 }
 0x116   :  { %v851_v35 = vmax.f32 %v701_v28, 0.0  ;;  %v756_v36 = vmax.f32 %v464_v31, 0.0 }
 0x117   :  { %v788_v37 = vmax.f32 %v544_v32, 0.0  ;;  %948 = vst.msk [vmem:[%s2192_s3 + $0x288] sm:$0xff] %vm866_vm2, %v819_v33 }
 0x118   :  { %980 = vst.msk [vmem:[%s2192_s3 + $0x388] sm:$0xff] %vm866_vm2, %v851_v35 }
 0x119   :  { %885 = vst.msk [vmem:[%s2192_s3 + $0x90] sm:$0xff] %vm866_vm2, %v756_v36 }
 0x11a   :  { %917 = vst.msk [vmem:[%s2192_s3 + $0x190] sm:$0xff] %vm866_vm2, %v788_v37  ;;  %v623_v38 = vpop.f32.mrf.mxu2 }
 0x11b   :  { %v703_v39 = vpop.f32.mrf.mxu3  ;;  %v624_v40 = vadd.f32 %v1318_v34, %v623_v38  ;;  %v465_v42 = vpop.f32.mrf.mxu0 }
 0x11c   :  { %v704_v41 = vadd.f32 %v1318_v34, %v703_v39  ;;  %v545_v43 = vpop.f32.mrf.mxu1  ;;  %v466_v44 = vadd.f32 %v1318_v34, %v465_v42 }
 0x11d   :  { %v546_v45 = vadd.f32 %v1318_v34, %v545_v43  ;;  %v820_v46 = vmax.f32 %v624_v40, 0.0 }
 0x11e   :  { %v852_v47 = vmax.f32 %v704_v41, 0.0  ;;  %v757_v48 = vmax.f32 %v466_v44, 0.0  ;;  %v2019_v41 = vld [vmem:[%s2191_s2] ss:$0 sm:$0xff] }
 0x11f   :  { %v789_v49 = vmax.f32 %v546_v45, 0.0  ;;  %949 = vst.msk [vmem:[%s2192_s3 + $0x290] sm:$0xff] %vm866_vm2, %v820_v46 }
 0x120   :  { %981 = vst.msk [vmem:[%s2192_s3 + $0x390] sm:$0xff] %vm866_vm2, %v852_v47 }
 0x121   :  { %886 = vst.msk [vmem:[%s2192_s3 + $0x98] sm:$0xff] %vm866_vm2, %v757_v48 }
 0x122   :  { %918 = vst.msk [vmem:[%s2192_s3 + $0x198] sm:$0xff] %vm866_vm2, %v789_v49  ;;  %v625_v50 = vpop.f32.mrf.mxu2 }
 0x123   :  { %v705_v51 = vpop.f32.mrf.mxu3  ;;  %v626_v52 = vadd.f32 %v1318_v34, %v625_v50  ;;  %v468_v54 = vpop.f32.mrf.mxu0 }
 0x124   :  { %v706_v53 = vadd.f32 %v1318_v34, %v705_v51  ;;  %v548_v55 = vpop.f32.mrf.mxu1  ;;  %v469_v56 = vadd.f32 %v1318_v34, %v468_v54 }
 0x125   :  { %v549_v57 = vadd.f32 %v1318_v34, %v548_v55  ;;  %v821_v58 = vmax.f32 %v626_v52, 0.0 }
 0x126   :  { %v853_v59 = vmax.f32 %v706_v53, 0.0  ;;  %v758_v60 = vmax.f32 %v469_v56, 0.0 }
 0x127   :  { %v790_v61 = vmax.f32 %v549_v57, 0.0  ;;  %950 = vst.msk [vmem:[%s2192_s3 + $0x298] sm:$0xff] %vm866_vm2, %v821_v58 }
 0x128   :  { %982 = vst.msk [vmem:[%s2192_s3 + $0x398] sm:$0xff] %vm866_vm2, %v853_v59 }
 0x129   :  { %887 = vst.msk [vmem:[%s2192_s3 + $0xa0] sm:$0xff] %vm866_vm2, %v758_v60 }
 0x12a   :  { %919 = vst.msk [vmem:[%s2192_s3 + $0x1a0] sm:$0xff] %vm866_vm2, %v790_v61  ;;  %v628_v62 = vpop.f32.mrf.mxu2 }
 0x12b   :  { %v708_v63 = vpop.f32.mrf.mxu3  ;;  %v629_v0 = vadd.f32 %v1318_v34, %v628_v62  ;;  %v470_v2 = vpop.f32.mrf.mxu0 }
 0x12c   :  { %v709_v1 = vadd.f32 %v1318_v34, %v708_v63  ;;  %v550_v3 = vpop.f32.mrf.mxu1  ;;  %v471_v4 = vadd.f32 %v1318_v34, %v470_v2 }
 0x12d   :  { %v551_v5 = vadd.f32 %v1318_v34, %v550_v3  ;;  %v822_v6 = vmax.f32 %v629_v0, 0.0 }
 0x12e   :  { %v854_v7 = vmax.f32 %v709_v1, 0.0  ;;  %v759_v8 = vmax.f32 %v471_v4, 0.0 }
 0x12f   :  { %v791_v9 = vmax.f32 %v551_v5, 0.0  ;;  %951 = vst.msk [vmem:[%s2192_s3 + $0x2a0] sm:$0xff] %vm866_vm2, %v822_v6 }
 0x130   :  { %983 = vst.msk [vmem:[%s2192_s3 + $0x3a0] sm:$0xff] %vm866_vm2, %v854_v7 }
 0x131   :  { %888 = vst.msk [vmem:[%s2192_s3 + $0xa8] sm:$0xff] %vm866_vm2, %v759_v8 }
 0x132   :  { %920 = vst.msk [vmem:[%s2192_s3 + $0x1a8] sm:$0xff] %vm866_vm2, %v791_v9  ;;  %v630_v10 = vpop.f32.mrf.mxu2 }
 0x133   :  { %v710_v11 = vpop.f32.mrf.mxu3  ;;  %v631_v12 = vadd.f32 %v1318_v34, %v630_v10  ;;  %v473_v14 = vpop.f32.mrf.mxu0 }
 0x134   :  { %v711_v13 = vadd.f32 %v1318_v34, %v710_v11  ;;  %v553_v15 = vpop.f32.mrf.mxu1  ;;  %v474_v16 = vadd.f32 %v1318_v34, %v473_v14 }
 0x135   :  { %v554_v17 = vadd.f32 %v1318_v34, %v553_v15  ;;  %v823_v18 = vmax.f32 %v631_v12, 0.0 }
 0x136   :  { %v855_v19 = vmax.f32 %v711_v13, 0.0  ;;  %v760_v20 = vmax.f32 %v474_v16, 0.0 }
 0x137   :  { %v792_v21 = vmax.f32 %v554_v17, 0.0  ;;  %952 = vst.msk [vmem:[%s2192_s3 + $0x2a8] sm:$0xff] %vm866_vm2, %v823_v18 }
 0x138   :  { %984 = vst.msk [vmem:[%s2192_s3 + $0x3a8] sm:$0xff] %vm866_vm2, %v855_v19 }
 0x139   :  { %889 = vst.msk [vmem:[%s2192_s3 + $0xb0] sm:$0xff] %vm866_vm2, %v760_v20 }
 0x13a   :  { %921 = vst.msk [vmem:[%s2192_s3 + $0x1b0] sm:$0xff] %vm866_vm2, %v792_v21  ;;  %v633_v22 = vpop.f32.mrf.mxu2 }
 0x13b   :  { %v713_v23 = vpop.f32.mrf.mxu3  ;;  %v634_v24 = vadd.f32 %v1318_v34, %v633_v22  ;;  %v475_v26 = vpop.f32.mrf.mxu0 }
 0x13c   :  { %v714_v25 = vadd.f32 %v1318_v34, %v713_v23  ;;  %v555_v27 = vpop.f32.mrf.mxu1  ;;  %v476_v28 = vadd.f32 %v1318_v34, %v475_v26 }
 0x13d   :  { %v556_v29 = vadd.f32 %v1318_v34, %v555_v27  ;;  %v824_v30 = vmax.f32 %v634_v24, 0.0 }
 0x13e   :  { %v856_v31 = vmax.f32 %v714_v25, 0.0  ;;  %v761_v32 = vmax.f32 %v476_v28, 0.0 }
 0x13f   :  { %v793_v33 = vmax.f32 %v556_v29, 0.0  ;;  %953 = vst.msk [vmem:[%s2192_s3 + $0x2b0] sm:$0xff] %vm866_vm2, %v824_v30 }
 0x140   :  { %985 = vst.msk [vmem:[%s2192_s3 + $0x3b0] sm:$0xff] %vm866_vm2, %v856_v31 }
 0x141   :  { %890 = vst.msk [vmem:[%s2192_s3 + $0xb8] sm:$0xff] %vm866_vm2, %v761_v32 }
 0x142   :  { %922 = vst.msk [vmem:[%s2192_s3 + $0x1b8] sm:$0xff] %vm866_vm2, %v793_v33  ;;  %v635_v35 = vpop.f32.mrf.mxu2 }
 0x143   :  { %v715_v36 = vpop.f32.mrf.mxu3  ;;  %v636_v37 = vadd.f32 %v1318_v34, %v635_v35  ;;  %v478_v39 = vpop.f32.mrf.mxu0 }
 0x144   :  { %v716_v38 = vadd.f32 %v1318_v34, %v715_v36  ;;  %v558_v40 = vpop.f32.mrf.mxu1  ;;  %v479_v42 = vadd.f32 %v2019_v41, %v478_v39 }
 0x145   :  { %v559_v43 = vadd.f32 %v2019_v41, %v558_v40  ;;  %v825_v44 = vmax.f32 %v636_v37, 0.0 }
 0x146   :  { %v857_v45 = vmax.f32 %v716_v38, 0.0  ;;  %v762_v46 = vmax.f32 %v479_v42, 0.0 }
 0x147   :  { %v794_v47 = vmax.f32 %v559_v43, 0.0  ;;  %954 = vst.msk [vmem:[%s2192_s3 + $0x2b8] sm:$0xff] %vm866_vm2, %v825_v44 }
 0x148   :  { %986 = vst.msk [vmem:[%s2192_s3 + $0x3b8] sm:$0xff] %vm866_vm2, %v857_v45 }
 0x149   :  { %891 = vst.msk [vmem:[%s2192_s3 + $0xc0] sm:$0xff] %vm866_vm2, %v762_v46 }
 0x14a   :  { %923 = vst.msk [vmem:[%s2192_s3 + $0x1c0] sm:$0xff] %vm866_vm2, %v794_v47  ;;  %v638_v34 = vpop.f32.mrf.mxu2 }
 0x14b   :  { %v718_v48 = vpop.f32.mrf.mxu3  ;;  %v639_v49 = vadd.f32 %v2019_v41, %v638_v34  ;;  %v480_v51 = vpop.f32.mrf.mxu0 }
 0x14c   :  { %v719_v50 = vadd.f32 %v2019_v41, %v718_v48  ;;  %v560_v52 = vpop.f32.mrf.mxu1  ;;  %v481_v53 = vadd.f32 %v2019_v41, %v480_v51 }
 0x14d   :  { %v561_v54 = vadd.f32 %v2019_v41, %v560_v52  ;;  %v826_v55 = vmax.f32 %v639_v49, 0.0 }
 0x14e   :  { %v858_v56 = vmax.f32 %v719_v50, 0.0  ;;  %v763_v57 = vmax.f32 %v481_v53, 0.0 }
 0x14f   :  { %v795_v58 = vmax.f32 %v561_v54, 0.0  ;;  %955 = vst.msk [vmem:[%s2192_s3 + $0x2c0] sm:$0xff] %vm866_vm2, %v826_v55 }
 0x150   :  { %987 = vst.msk [vmem:[%s2192_s3 + $0x3c0] sm:$0xff] %vm866_vm2, %v858_v56 }
 0x151   :  { %892 = vst.msk [vmem:[%s2192_s3 + $0xc8] sm:$0xff] %vm866_vm2, %v763_v57 }
 0x152   :  { %924 = vst.msk [vmem:[%s2192_s3 + $0x1c8] sm:$0xff] %vm866_vm2, %v795_v58  ;;  %v640_v59 = vpop.f32.mrf.mxu2 }
 0x153   :  { %v720_v60 = vpop.f32.mrf.mxu3  ;;  %v641_v61 = vadd.f32 %v2019_v41, %v640_v59  ;;  %v483_v63 = vpop.f32.mrf.mxu0 }
 0x154   :  { %v721_v62 = vadd.f32 %v2019_v41, %v720_v60  ;;  %v563_v0 = vpop.f32.mrf.mxu1  ;;  %v484_v1 = vadd.f32 %v2019_v41, %v483_v63 }
 0x155   :  { %v564_v2 = vadd.f32 %v2019_v41, %v563_v0  ;;  %v827_v3 = vmax.f32 %v641_v61, 0.0 }
 0x156   :  { %v859_v4 = vmax.f32 %v721_v62, 0.0  ;;  %v764_v5 = vmax.f32 %v484_v1, 0.0 }
 0x157   :  { %v796_v6 = vmax.f32 %v564_v2, 0.0  ;;  %956 = vst.msk [vmem:[%s2192_s3 + $0x2c8] sm:$0xff] %vm866_vm2, %v827_v3 }
 0x158   :  { %988 = vst.msk [vmem:[%s2192_s3 + $0x3c8] sm:$0xff] %vm866_vm2, %v859_v4 }
 0x159   :  { %893 = vst.msk [vmem:[%s2192_s3 + $0xd0] sm:$0xff] %vm866_vm2, %v764_v5 }
 0x15a   :  { %925 = vst.msk [vmem:[%s2192_s3 + $0x1d0] sm:$0xff] %vm866_vm2, %v796_v6  ;;  %v643_v7 = vpop.f32.mrf.mxu2 }
 0x15b   :  { %v723_v8 = vpop.f32.mrf.mxu3  ;;  %v644_v9 = vadd.f32 %v2019_v41, %v643_v7  ;;  %v485_v11 = vpop.f32.mrf.mxu0 }
 0x15c   :  { %v724_v10 = vadd.f32 %v2019_v41, %v723_v8  ;;  %v565_v12 = vpop.f32.mrf.mxu1  ;;  %v486_v13 = vadd.f32 %v2019_v41, %v485_v11 }
 0x15d   :  { %v566_v14 = vadd.f32 %v2019_v41, %v565_v12  ;;  %v828_v15 = vmax.f32 %v644_v9, 0.0 }
 0x15e   :  { %v860_v16 = vmax.f32 %v724_v10, 0.0  ;;  %v765_v17 = vmax.f32 %v486_v13, 0.0 }
 0x15f   :  { %v797_v18 = vmax.f32 %v566_v14, 0.0  ;;  %957 = vst.msk [vmem:[%s2192_s3 + $0x2d0] sm:$0xff] %vm866_vm2, %v828_v15 }
 0x160   :  { %989 = vst.msk [vmem:[%s2192_s3 + $0x3d0] sm:$0xff] %vm866_vm2, %v860_v16 }
 0x161   :  { %894 = vst.msk [vmem:[%s2192_s3 + $0xd8] sm:$0xff] %vm866_vm2, %v765_v17 }
 0x162   :  { %926 = vst.msk [vmem:[%s2192_s3 + $0x1d8] sm:$0xff] %vm866_vm2, %v797_v18  ;;  %v645_v19 = vpop.f32.mrf.mxu2 }
 0x163   :  { %v725_v20 = vpop.f32.mrf.mxu3  ;;  %v646_v21 = vadd.f32 %v2019_v41, %v645_v19  ;;  %v488_v23 = vpop.f32.mrf.mxu0 }
 0x164   :  { %v726_v22 = vadd.f32 %v2019_v41, %v725_v20  ;;  %v568_v24 = vpop.f32.mrf.mxu1  ;;  %v489_v25 = vadd.f32 %v2019_v41, %v488_v23 }
 0x165   :  { %v569_v26 = vadd.f32 %v2019_v41, %v568_v24  ;;  %v829_v27 = vmax.f32 %v646_v21, 0.0 }
 0x166   :  { %v861_v28 = vmax.f32 %v726_v22, 0.0  ;;  %v766_v29 = vmax.f32 %v489_v25, 0.0 }
 0x167   :  { %v798_v30 = vmax.f32 %v569_v26, 0.0  ;;  %958 = vst.msk [vmem:[%s2192_s3 + $0x2d8] sm:$0xff] %vm866_vm2, %v829_v27 }
 0x168   :  { %990 = vst.msk [vmem:[%s2192_s3 + $0x3d8] sm:$0xff] %vm866_vm2, %v861_v28 }
 0x169   :  { %895 = vst.msk [vmem:[%s2192_s3 + $0xe0] sm:$0xff] %vm866_vm2, %v766_v29 }
 0x16a   :  { %927 = vst.msk [vmem:[%s2192_s3 + $0x1e0] sm:$0xff] %vm866_vm2, %v798_v30  ;;  %v648_v31 = vpop.f32.mrf.mxu2 }
 0x16b   :  { %v728_v32 = vpop.f32.mrf.mxu3  ;;  %v649_v33 = vadd.f32 %v2019_v41, %v648_v31  ;;  %v490_v36 = vpop.f32.mrf.mxu0 }
 0x16c   :  { %v729_v35 = vadd.f32 %v2019_v41, %v728_v32  ;;  %v570_v37 = vpop.f32.mrf.mxu1  ;;  %v491_v38 = vadd.f32 %v2019_v41, %v490_v36 }
 0x16d   :  { %v571_v39 = vadd.f32 %v2019_v41, %v570_v37  ;;  %v830_v40 = vmax.f32 %v649_v33, 0.0 }
 0x16e   :  { %v862_v42 = vmax.f32 %v729_v35, 0.0  ;;  %v767_v43 = vmax.f32 %v491_v38, 0.0 }
 0x16f   :  { %v799_v44 = vmax.f32 %v571_v39, 0.0  ;;  %959 = vst.msk [vmem:[%s2192_s3 + $0x2e0] sm:$0xff] %vm866_vm2, %v830_v40 }
 0x170   :  { %991 = vst.msk [vmem:[%s2192_s3 + $0x3e0] sm:$0xff] %vm866_vm2, %v862_v42 }
 0x171   :  { %896 = vst.msk [vmem:[%s2192_s3 + $0xe8] sm:$0xff] %vm866_vm2, %v767_v43 }
 0x172   :  { %928 = vst.msk [vmem:[%s2192_s3 + $0x1e8] sm:$0xff] %vm866_vm2, %v799_v44  ;;  %v650_v45 = vpop.f32.mrf.mxu2 }
 0x173   :  { %v730_v46 = vpop.f32.mrf.mxu3  ;;  %v651_v47 = vadd.f32 %v2019_v41, %v650_v45  ;;  %v493_v48 = vpop.f32.mrf.mxu0 }
 0x174   :  { %v731_v34 = vadd.f32 %v2019_v41, %v730_v46  ;;  %v573_v49 = vpop.f32.mrf.mxu1  ;;  %v494_v50 = vadd.f32 %v2019_v41, %v493_v48 }
 0x175   :  { %v574_v51 = vadd.f32 %v2019_v41, %v573_v49  ;;  %v831_v52 = vmax.f32 %v651_v47, 0.0 }
 0x176   :  { %v863_v53 = vmax.f32 %v731_v34, 0.0  ;;  %v768_v54 = vmax.f32 %v494_v50, 0.0 }
 0x177   :  { %v800_v55 = vmax.f32 %v574_v51, 0.0  ;;  %960 = vst.msk [vmem:[%s2192_s3 + $0x2e8] sm:$0xff] %vm866_vm2, %v831_v52 }
 0x178   :  { %992 = vst.msk [vmem:[%s2192_s3 + $0x3e8] sm:$0xff] %vm866_vm2, %v863_v53 }
 0x179   :  { %897 = vst.msk [vmem:[%s2192_s3 + $0xf0] sm:$0xff] %vm866_vm2, %v768_v54 }
 0x17a   :  { %929 = vst.msk [vmem:[%s2192_s3 + $0x1f0] sm:$0xff] %vm866_vm2, %v800_v55  ;;  %v653_v56 = vpop.f32.mrf.mxu2 }
 0x17b   :  { %v733_v57 = vpop.f32.mrf.mxu3  ;;  %v654_v58 = vadd.f32 %v2019_v41, %v653_v56  ;;  %v495_v60 = vpop.f32.mrf.mxu0 }
 0x17c   :  { %v734_v59 = vadd.f32 %v2019_v41, %v733_v57  ;;  %v575_v61 = vpop.f32.mrf.mxu1  ;;  %v496_v62 = vadd.f32 %v2019_v41, %v495_v60 }
 0x17d   :  { %v576_v63 = vadd.f32 %v2019_v41, %v575_v61  ;;  %v832_v0 = vmax.f32 %v654_v58, 0.0 }
 0x17e   :  { %v864_v1 = vmax.f32 %v734_v59, 0.0  ;;  %v769_v2 = vmax.f32 %v496_v62, 0.0 }
 0x17f   :  { %v801_v3 = vmax.f32 %v576_v63, 0.0  ;;  %961 = vst.msk [vmem:[%s2192_s3 + $0x2f0] sm:$0xff] %vm866_vm2, %v832_v0 }
 0x180   :  { %993 = vst.msk [vmem:[%s2192_s3 + $0x3f0] sm:$0xff] %vm866_vm2, %v864_v1 }
 0x181   :  { %898 = vst.msk [vmem:[%s2192_s3 + $0xf8] sm:$0xff] %vm866_vm2, %v769_v2 }
 0x182   :  { %930 = vst.msk [vmem:[%s2192_s3 + $0x1f8] sm:$0xff] %vm866_vm2, %v801_v3  ;;  %v655_v4 = vpop.f32.mrf.mxu2 }
 0x183   :  { %v735_v5 = vpop.f32.mrf.mxu3  ;;  %v656_v6 = vadd.f32 %v2019_v41, %v655_v4 }
 0x184   :  { %v736_v7 = vadd.f32 %v2019_v41, %v735_v5 }
 0x185   :  { %v833_v8 = vmax.f32 %v656_v6, 0.0 }
 0x186   :  { %v865_v9 = vmax.f32 %v736_v7, 0.0 }
 0x187   :  { %962 = vst.msk [vmem:[%s2192_s3 + $0x2f8] sm:$0xff] %vm866_vm2, %v833_v8 }
 0x188   :  { %994 = vst.msk [vmem:[%s2192_s3 + $0x3f8] sm:$0xff] %vm866_vm2, %v865_v9 }

// kernel: hierarchy_cascade_forward.3
= control target key start
LH: loop header
LB: loop body
LE: loop exit
PB: predicated region body
PF: predicated region fallthrough
CT: control target
= control target key end

     0   :  { %s3399_s18 = smov 0   ;;  %s3401_s19 = smov 0   ;;  %s6332_s0 = inlined_call_operand.vmem [shape: f32[256,512], index: 0, kind: input, shape index: {}]   ;;  %s6333_s1 = inlined_call_operand.vmem [shape: bf16[512,128], index: 1, kind: input, shape index: {}]   ;;  %s6334_s2 = inlined_call_operand.vmem [shape: f32[1,128], index: 2, kind: input, shape index: {}]   ;;  %s6335_s3 = inlined_call_operand.vmem [shape: bf16[128,128], index: 3, kind: input, shape index: {}]   ;;  %s6336_s4 = inlined_call_operand.vmem [shape: f32[1,128], index: 4, kind: input, shape index: {}]   ;;  %s6337_s5 = inlined_call_operand.vmem [shape: f32[256,128], index: 5, kind: output, shape index: {}]  }
   0x1   :  { %s3403_s20 = smov 0   ;;  %s3405_s21 = smov 0  }
   0x2   :  { %s3407_s22 = smov 0  }
   0x3 LB: > { %s24_s23 = sadd.s32 1, %s3362_s21  ;;  %p43_p1 = scmp.ne.s32.totalorder %s3354_s19, %s3350_s18  ;;  %s3366_s22 = sphi %s3407_s22, %s15_s22   ;;  %s3362_s21 = sphi %s3405_s21, %s6617_s21   ;;  %s3358_s20 = sphi %s3403_s20, %s6616_s20   ;;  %s3354_s19 = sphi %s3401_s19, %s6615_s19   ;;  %s3350_s18 = sphi %s3399_s18, %s6614_s18  }
   0x4   : > { %p25_p0 = scmp.ge.s32.totalorder %s24_s23, 2  ;;  %p44_p2 = scmp.eq.s32.totalorder %s3366_s22, 0 }
   0x5   : > { %s36_s25 = sadd.s32 1, %s3354_s19  ;;  %p2918_p5 = scmp.ge.s32.totalorder %s3366_s22, 2 }
   0x6   : > { %s6619_s23 = smov (%p25_p0, %s24_s23), 0  ;;  %p45_p3 = por %p44_p2, %p43_p1 }
   0x7   : > { %s32_s24 = ssub.s32 %s3362_s21, %s6619_s23  ;;  %193 = sbr.rel (%p2918_p5) target bundleno = 80 (0x50), region = 28 }
   0x8   : > { %p34_p4 = scmp.eq.s32.totalorder %s32_s24, 0 }
   0xa   : > { %s3434_s26 = scalar_select %p34_p4, %s3354_s19, %s36_s25  }
   0xc   : > { %196 = sbr.rel (!%p45_p3) target bundleno = 80 (0x50), region = 32  ;;  %s198_s27 = sand.u32 (%p45_p3), 1, %s3354_s19  }
   0xd   : > { %s3028_s28 = sshll.u32 (%p45_p3), %s3362_s21, 4  ;;  %s2919_s29 = sshll.u32 (%p45_p3), %s198_s27, 9 }
   0xe   : > { %s3442_s7 = scalar_lea.vmem (%p45_p3), %s6332_s0, %s3028_s28  ;;  %s3447_s8 = scalar_lea.vmem (%p45_p3), [#allocation3], %s2919_s29 }
   0xf   : > { %v219_v0 = vld [vmem:[%s3442_s7] sm:$0xff] (%p45_p3)  ;;  %v221_v1 = vld [vmem:[%s3442_s7 + $0x8] sm:$0xff] (%p45_p3) }
  0x10   : > { %v223_v2 = vld [vmem:[%s3442_s7 + $0x20] sm:$0xff] (%p45_p3)  ;;  %220 = vst [vmem:[%s3447_s8] sm:$0xff] (%p45_p3), %v219_v0  ;;  %v225_v3 = vld [vmem:[%s3442_s7 + $0x28] sm:$0xff] (%p45_p3) }
  0x11   : > { %222 = vst [vmem:[%s3447_s8 + $0x8] sm:$0xff] %v221_v1  ;;  %v227_v4 = vld [vmem:[%s3442_s7 + $0x40] sm:$0xff]  ;;  %v229_v5 = vld [vmem:[%s3442_s7 + $0x48] sm:$0xff] }
  0x12   : > { %224 = vst [vmem:[%s3447_s8 + $0x10] sm:$0xff] %v223_v2  ;;  %v231_v6 = vld [vmem:[%s3442_s7 + $0x60] sm:$0xff]  ;;  %v233_v7 = vld [vmem:[%s3442_s7 + $0x68] sm:$0xff] }
  0x13   : > { %226 = vst [vmem:[%s3447_s8 + $0x18] sm:$0xff] %v225_v3  ;;  %v235_v8 = vld [vmem:[%s3442_s7 + $0x80] sm:$0xff]  ;;  %v237_v9 = vld [vmem:[%s3442_s7 + $0x88] sm:$0xff] }
  0x14   : > { %228 = vst [vmem:[%s3447_s8 + $0x20] sm:$0xff] %v227_v4  ;;  %v239_v10 = vld [vmem:[%s3442_s7 + $0xa0] sm:$0xff]  ;;  %v241_v11 = vld [vmem:[%s3442_s7 + $0xa8] sm:$0xff] }
  0x15   : > { %230 = vst [vmem:[%s3447_s8 + $0x28] sm:$0xff] %v229_v5  ;;  %v243_v12 = vld [vmem:[%s3442_s7 + $0xc0] sm:$0xff]  ;;  %v245_v13 = vld [vmem:[%s3442_s7 + $0xc8] sm:$0xff] }
  0x16   : > { %232 = vst [vmem:[%s3447_s8 + $0x30] sm:$0xff] %v231_v6  ;;  %v247_v14 = vld [vmem:[%s3442_s7 + $0xe0] sm:$0xff]  ;;  %v249_v15 = vld [vmem:[%s3442_s7 + $0xe8] sm:$0xff] }
  0x17   : > { %234 = vst [vmem:[%s3447_s8 + $0x38] sm:$0xff] %v233_v7  ;;  %v251_v16 = vld [vmem:[%s3442_s7 + $0x100] sm:$0xff]  ;;  %v253_v17 = vld [vmem:[%s3442_s7 + $0x108] sm:$0xff] }
  0x18   : > { %236 = vst [vmem:[%s3447_s8 + $0x40] sm:$0xff] %v235_v8  ;;  %v255_v18 = vld [vmem:[%s3442_s7 + $0x120] sm:$0xff]  ;;  %v257_v19 = vld [vmem:[%s3442_s7 + $0x128] sm:$0xff] }
  0x19   : > { %238 = vst [vmem:[%s3447_s8 + $0x48] sm:$0xff] %v237_v9  ;;  %v259_v20 = vld [vmem:[%s3442_s7 + $0x140] sm:$0xff]  ;;  %v261_v21 = vld [vmem:[%s3442_s7 + $0x148] sm:$0xff] }
  0x1a   : > { %240 = vst [vmem:[%s3447_s8 + $0x50] sm:$0xff] %v239_v10  ;;  %v263_v22 = vld [vmem:[%s3442_s7 + $0x160] sm:$0xff]  ;;  %v265_v23 = vld [vmem:[%s3442_s7 + $0x168] sm:$0xff] }
  0x1b   : > { %242 = vst [vmem:[%s3447_s8 + $0x58] sm:$0xff] %v241_v11  ;;  %v267_v24 = vld [vmem:[%s3442_s7 + $0x180] sm:$0xff]  ;;  %v269_v25 = vld [vmem:[%s3442_s7 + $0x188] sm:$0xff] }
  0x1c   : > { %244 = vst [vmem:[%s3447_s8 + $0x60] sm:$0xff] %v243_v12  ;;  %v271_v26 = vld [vmem:[%s3442_s7 + $0x1a0] sm:$0xff]  ;;  %v273_v27 = vld [vmem:[%s3442_s7 + $0x1a8] sm:$0xff] }
  0x1d   : > { %246 = vst [vmem:[%s3447_s8 + $0x68] sm:$0xff] %v245_v13  ;;  %v275_v28 = vld [vmem:[%s3442_s7 + $0x1c0] sm:$0xff]  ;;  %v277_v29 = vld [vmem:[%s3442_s7 + $0x1c8] sm:$0xff] }
  0x1e   : > { %248 = vst [vmem:[%s3447_s8 + $0x70] sm:$0xff] %v247_v14  ;;  %v279_v30 = vld [vmem:[%s3442_s7 + $0x1e0] sm:$0xff]  ;;  %v281_v31 = vld [vmem:[%s3442_s7 + $0x1e8] sm:$0xff] }
  0x1f   : > { %250 = vst [vmem:[%s3447_s8 + $0x78] sm:$0xff] %v249_v15  ;;  %v283_v32 = vld [vmem:[%s3442_s7 + $0x200] sm:$0xff]  ;;  %v285_v33 = vld [vmem:[%s3442_s7 + $0x208] sm:$0xff] }
  0x20   : > { %252 = vst [vmem:[%s3447_s8 + $0x80] sm:$0xff] %v251_v16  ;;  %v287_v34 = vld [vmem:[%s3442_s7 + $0x220] sm:$0xff]  ;;  %v289_v35 = vld [vmem:[%s3442_s7 + $0x228] sm:$0xff] }
  0x21   : > { %254 = vst [vmem:[%s3447_s8 + $0x88] sm:$0xff] %v253_v17  ;;  %v291_v36 = vld [vmem:[%s3442_s7 + $0x240] sm:$0xff]  ;;  %v293_v37 = vld [vmem:[%s3442_s7 + $0x248] sm:$0xff] }
  0x22   : > { %256 = vst [vmem:[%s3447_s8 + $0x90] sm:$0xff] %v255_v18  ;;  %v295_v38 = vld [vmem:[%s3442_s7 + $0x260] sm:$0xff]  ;;  %v297_v39 = vld [vmem:[%s3442_s7 + $0x268] sm:$0xff] }
  0x23   : > { %258 = vst [vmem:[%s3447_s8 + $0x98] sm:$0xff] %v257_v19  ;;  %v299_v40 = vld [vmem:[%s3442_s7 + $0x280] sm:$0xff]  ;;  %v301_v41 = vld [vmem:[%s3442_s7 + $0x288] sm:$0xff] }
  0x24   : > { %260 = vst [vmem:[%s3447_s8 + $0xa0] sm:$0xff] %v259_v20  ;;  %v303_v42 = vld [vmem:[%s3442_s7 + $0x2a0] sm:$0xff]  ;;  %v305_v43 = vld [vmem:[%s3442_s7 + $0x2a8] sm:$0xff] }
  0x25   : > { %262 = vst [vmem:[%s3447_s8 + $0xa8] sm:$0xff] %v261_v21  ;;  %v307_v44 = vld [vmem:[%s3442_s7 + $0x2c0] sm:$0xff]  ;;  %v309_v45 = vld [vmem:[%s3442_s7 + $0x2c8] sm:$0xff] }
  0x26   : > { %264 = vst [vmem:[%s3447_s8 + $0xb0] sm:$0xff] %v263_v22  ;;  %v311_v46 = vld [vmem:[%s3442_s7 + $0x2e0] sm:$0xff]  ;;  %v313_v47 = vld [vmem:[%s3442_s7 + $0x2e8] sm:$0xff] }
  0x27   : > { %266 = vst [vmem:[%s3447_s8 + $0xb8] sm:$0xff] %v265_v23  ;;  %v315_v48 = vld [vmem:[%s3442_s7 + $0x300] sm:$0xff]  ;;  %v317_v49 = vld [vmem:[%s3442_s7 + $0x308] sm:$0xff] }
  0x28   : > { %268 = vst [vmem:[%s3447_s8 + $0xc0] sm:$0xff] %v267_v24  ;;  %v319_v50 = vld [vmem:[%s3442_s7 + $0x320] sm:$0xff]  ;;  %v321_v51 = vld [vmem:[%s3442_s7 + $0x328] sm:$0xff] }
  0x29   : > { %270 = vst [vmem:[%s3447_s8 + $0xc8] sm:$0xff] %v269_v25  ;;  %v323_v52 = vld [vmem:[%s3442_s7 + $0x340] sm:$0xff]  ;;  %v325_v53 = vld [vmem:[%s3442_s7 + $0x348] sm:$0xff] }
  0x2a   : > { %272 = vst [vmem:[%s3447_s8 + $0xd0] sm:$0xff] %v271_v26  ;;  %v327_v54 = vld [vmem:[%s3442_s7 + $0x360] sm:$0xff]  ;;  %v329_v55 = vld [vmem:[%s3442_s7 + $0x368] sm:$0xff] }
  0x2b   : > { %274 = vst [vmem:[%s3447_s8 + $0xd8] sm:$0xff] %v273_v27  ;;  %v331_v56 = vld [vmem:[%s3442_s7 + $0x380] sm:$0xff]  ;;  %v333_v57 = vld [vmem:[%s3442_s7 + $0x388] sm:$0xff] }
  0x2c   : > { %276 = vst [vmem:[%s3447_s8 + $0xe0] sm:$0xff] %v275_v28  ;;  %v335_v58 = vld [vmem:[%s3442_s7 + $0x3a0] sm:$0xff]  ;;  %v337_v59 = vld [vmem:[%s3442_s7 + $0x3a8] sm:$0xff] }
  0x2d   : > { %278 = vst [vmem:[%s3447_s8 + $0xe8] sm:$0xff] %v277_v29  ;;  %v339_v60 = vld [vmem:[%s3442_s7 + $0x3c0] sm:$0xff]  ;;  %v341_v61 = vld [vmem:[%s3442_s7 + $0x3c8] sm:$0xff] }
  0x2e   : > { %280 = vst [vmem:[%s3447_s8 + $0xf0] sm:$0xff] %v279_v30  ;;  %v343_v62 = vld [vmem:[%s3442_s7 + $0x3e0] sm:$0xff]  ;;  %v345_v63 = vld [vmem:[%s3442_s7 + $0x3e8] sm:$0xff] }
  0x2f   : > { %282 = vst [vmem:[%s3447_s8 + $0xf8] sm:$0xff] %v281_v31 }
  0x30   : > { %284 = vst [vmem:[%s3447_s8 + $0x100] sm:$0xff] %v283_v32 }
  0x31   : > { %286 = vst [vmem:[%s3447_s8 + $0x108] sm:$0xff] %v285_v33 }
  0x32   : > { %288 = vst [vmem:[%s3447_s8 + $0x110] sm:$0xff] %v287_v34 }
  0x33   : > { %290 = vst [vmem:[%s3447_s8 + $0x118] sm:$0xff] %v289_v35 }
  0x34   : > { %292 = vst [vmem:[%s3447_s8 + $0x120] sm:$0xff] %v291_v36 }
  0x35   : > { %294 = vst [vmem:[%s3447_s8 + $0x128] sm:$0xff] %v293_v37 }
  0x36   : > { %296 = vst [vmem:[%s3447_s8 + $0x130] sm:$0xff] %v295_v38 }
  0x37   : > { %298 = vst [vmem:[%s3447_s8 + $0x138] sm:$0xff] %v297_v39 }
  0x38   : > { %300 = vst [vmem:[%s3447_s8 + $0x140] sm:$0xff] %v299_v40 }
  0x39   : > { %302 = vst [vmem:[%s3447_s8 + $0x148] sm:$0xff] %v301_v41 }
  0x3a   : > { %304 = vst [vmem:[%s3447_s8 + $0x150] sm:$0xff] %v303_v42 }
  0x3b   : > { %306 = vst [vmem:[%s3447_s8 + $0x158] sm:$0xff] %v305_v43 }
  0x3c   : > { %308 = vst [vmem:[%s3447_s8 + $0x160] sm:$0xff] %v307_v44 }
  0x3d   : > { %310 = vst [vmem:[%s3447_s8 + $0x168] sm:$0xff] %v309_v45 }
  0x3e   : > { %312 = vst [vmem:[%s3447_s8 + $0x170] sm:$0xff] %v311_v46 }
  0x3f   : > { %314 = vst [vmem:[%s3447_s8 + $0x178] sm:$0xff] %v313_v47 }
  0x40   : > { %316 = vst [vmem:[%s3447_s8 + $0x180] sm:$0xff] %v315_v48 }
  0x41   : > { %318 = vst [vmem:[%s3447_s8 + $0x188] sm:$0xff] %v317_v49 }
  0x42   : > { %320 = vst [vmem:[%s3447_s8 + $0x190] sm:$0xff] %v319_v50 }
  0x43   : > { %322 = vst [vmem:[%s3447_s8 + $0x198] sm:$0xff] %v321_v51 }
  0x44   : > { %324 = vst [vmem:[%s3447_s8 + $0x1a0] sm:$0xff] %v323_v52 }
  0x45   : > { %326 = vst [vmem:[%s3447_s8 + $0x1a8] sm:$0xff] %v325_v53 }
  0x46   : > { %328 = vst [vmem:[%s3447_s8 + $0x1b0] sm:$0xff] %v327_v54 }
  0x47   : > { %330 = vst [vmem:[%s3447_s8 + $0x1b8] sm:$0xff] %v329_v55 }
  0x48   : > { %332 = vst [vmem:[%s3447_s8 + $0x1c0] sm:$0xff] %v331_v56 }
  0x49   : > { %334 = vst [vmem:[%s3447_s8 + $0x1c8] sm:$0xff] %v333_v57 }
  0x4a   : > { %336 = vst [vmem:[%s3447_s8 + $0x1d0] sm:$0xff] %v335_v58 }
  0x4b   : > { %338 = vst [vmem:[%s3447_s8 + $0x1d8] sm:$0xff] %v337_v59 }
  0x4c   : > { %340 = vst [vmem:[%s3447_s8 + $0x1e0] sm:$0xff] %v339_v60 }
  0x4d   : > { %342 = vst [vmem:[%s3447_s8 + $0x1e8] sm:$0xff] %v341_v61 }
  0x4e   : > { %344 = vst [vmem:[%s3447_s8 + $0x1f0] sm:$0xff] %v343_v62 }
  0x4f   : > { %346 = vst [vmem:[%s3447_s8 + $0x1f8] sm:$0xff] %v345_v63 }
  0x50 PF: > { %p2922_p6 = scmp.ge.s32.totalorder %s3366_s22, 1  ;;  %p360_p7 = scmp.lt.s32.totalorder %s3366_s22, 3 }
  0x52   : > { %p361_p8 = pnand %p2922_p6, %p360_p7 }
  0x53   : > { %s367_s9 = sand.u32 (!%p361_p8), 1, %s3350_s18   ;;  %s2924_s10 = sshll.u32 (!%p361_p8), %s3358_s20, 5 }
  0x54   : > { %364 = sbr.rel (%p361_p8) target bundleno = 1116 (0x45c), region = 59  ;;  %s2923_s11 = sshll.u32 (!%p361_p8), %s367_s9, 9 }
  0x55   : > { %p402_p9 = scmp.lt.s32.totalorder (!%p361_p8), %s2924_s10, 63  ;;  %s3583_s16 = scalar_lea.vmem (!%p361_p8), [#allocation3], %s2923_s11 }
  0x56   : > { %p2926_p10 = scmp.ne.s32.totalorder (!%p361_p8), %s3358_s20, 0 }
  0x59   : > { %s6621_s10 = smov (!%p402_p9, %s2924_s10), 63  ;;  %416 = sbr.rel (%p2926_p10) target bundleno = 127 (0x7f), region = 67 }
  0x5a   : > { %s2925_s12 = sshll.u32 %s6621_s10, 2 }
  0x5b   : > { %s3581_s15 = scalar_lea.vmem %s6333_s1, %s2925_s12 }
  0x5e   : > { %v3368_v0 = vmov 0.0  }
  0x5f   : > { %417 = vst [vmem:[#allocation2 + $0xb0] sm:$0xff] %v3368_v0 }
  0x60   : > { %418 = vst [vmem:[#allocation2] sm:$0xff] %v3368_v0 }
  0x61   : > { %419 = vst [vmem:[#allocation2 + $0xd8] sm:$0xff] %v3368_v0 }
  0x62   : > { %420 = vst [vmem:[#allocation2 + $0x18] sm:$0xff] %v3368_v0 }
  0x63   : > { %421 = vst [vmem:[#allocation2 + $0x50] sm:$0xff] %v3368_v0 }
  0x64   : > { %422 = vst [vmem:[#allocation2 + $0x68] sm:$0xff] %v3368_v0 }
  0x65   : > { %423 = vst [vmem:[#allocation2 + $0x30] sm:$0xff] %v3368_v0 }
  0x66   : > { %424 = vst [vmem:[#allocation2 + $0x48] sm:$0xff] %v3368_v0 }
  0x67   : > { %425 = vst [vmem:[#allocation2 + $0x80] sm:$0xff] %v3368_v0 }
  0x68   : > { %426 = vst [vmem:[#allocation2 + $0x88] sm:$0xff] %v3368_v0 }
  0x69   : > { %427 = vst [vmem:[#allocation2 + $0xe8] sm:$0xff] %v3368_v0 }
  0x6a   : > { %428 = vst [vmem:[#allocation2 + $0xb8] sm:$0xff] %v3368_v0 }
  0x6b   : > { %429 = vst [vmem:[#allocation2 + $0x60] sm:$0xff] %v3368_v0 }
  0x6c   : > { %430 = vst [vmem:[#allocation2 + $0xf0] sm:$0xff] %v3368_v0 }
  0x6d   : > { %431 = vst [vmem:[#allocation2 + $0x8] sm:$0xff] %v3368_v0 }
  0x6e   : > { %432 = vst [vmem:[#allocation2 + $0x78] sm:$0xff] %v3368_v0 }
  0x6f   : > { %433 = vst [vmem:[#allocation2 + $0x38] sm:$0xff] %v3368_v0 }
  0x70   : > { %434 = vst [vmem:[#allocation2 + $0x58] sm:$0xff] %v3368_v0 }
  0x71   : > { %435 = vst [vmem:[#allocation2 + $0x40] sm:$0xff] %v3368_v0 }
  0x72   : > { %436 = vst [vmem:[#allocation2 + $0xc8] sm:$0xff] %v3368_v0 }
  0x73   : > { %437 = vst [vmem:[#allocation2 + $0xe0] sm:$0xff] %v3368_v0 }
  0x74   : > { %438 = vst [vmem:[#allocation2 + $0x90] sm:$0xff] %v3368_v0 }
  0x75   : > { %439 = vst [vmem:[#allocation2 + $0x70] sm:$0xff] %v3368_v0 }
  0x76   : > { %440 = vst [vmem:[#allocation2 + $0xc0] sm:$0xff] %v3368_v0 }
  0x77   : > { %441 = vst [vmem:[#allocation2 + $0xa8] sm:$0xff] %v3368_v0 }
  0x78   : > { %442 = vst [vmem:[#allocation2 + $0xd0] sm:$0xff] %v3368_v0 }
  0x79   : > { %443 = vst [vmem:[#allocation2 + $0x10] sm:$0xff] %v3368_v0 }
  0x7a   : > { %444 = vst [vmem:[#allocation2 + $0x28] sm:$0xff] %v3368_v0 }
  0x7b   : > { %445 = vst [vmem:[#allocation2 + $0xa0] sm:$0xff] %v3368_v0 }
  0x7c   : > { %446 = vst [vmem:[#allocation2 + $0xf8] sm:$0xff] %v3368_v0 }
  0x7d   : > { %447 = vst [vmem:[#allocation2 + $0x20] sm:$0xff] %v3368_v0 }
  0x7e   : > { %448 = vst [vmem:[#allocation2 + $0x98] sm:$0xff] %v3368_v0 }
  0x7f PF: > { %v3036_v1 = vld [vmem:[%s3581_s15 + $0x38] sm:$0xff]  ;;  %v3035_v3 = vld [vmem:[%s3581_s15 + $0x30] sm:$0xff]  ;;  %v3034_v5 = vld [vmem:[%s3581_s15 + $0x28] sm:$0xff]  ;;  %p2991_p11 = scmp.ne.s32.totalorder %s3358_s20, 1 }
  0x80   : > { %v3044_v2 = vld [vmem:[%s3581_s15 + $0x78] sm:$0xff]  ;;  %705 = vmatpush.bf16.msra.mxu0 %v3036_v1  ;;  %3053 = vmatpush.bf16.msra.mxu2 %v3036_v1  ;;  %v3043_v4 = vld [vmem:[%s3581_s15 + $0x70] sm:$0xff]  ;;  %v3042_v6 = vld [vmem:[%s3581_s15 + $0x68] sm:$0xff] }
  0x81   : > { %794 = vmatpush.bf16.msra.mxu1 %v3044_v2  ;;  %3061 = vmatpush.bf16.msra.mxu3 %v3044_v2  ;;  %v3033_v7 = vld [vmem:[%s3581_s15 + $0x20] sm:$0xff]  ;;  %v3032_v9 = vld [vmem:[%s3581_s15 + $0x18] sm:$0xff]  ;;  %v3031_v11 = vld [vmem:[%s3581_s15 + $0x10] sm:$0xff] }
  0x82   : > { %v3041_v8 = vld [vmem:[%s3581_s15 + $0x60] sm:$0xff]  ;;  %v3040_v10 = vld [vmem:[%s3581_s15 + $0x58] sm:$0xff]  ;;  %v3039_v12 = vld [vmem:[%s3581_s15 + $0x50] sm:$0xff] }
  0x83   : > { %v3030_v13 = vld [vmem:[%s3581_s15 + $0x8] sm:$0xff]  ;;  %v3029_v15 = vld [vmem:[%s3581_s15] sm:$0xff]  ;;  %v483_v18 = vld [vmem:[%s3583_s16 + $0x10] sm:$0xff] }
  0x84   : > { %706 = vmatpush.bf16.msra.mxu0 %v3035_v3  ;;  %3054 = vmatpush.bf16.msra.mxu2 %v3035_v3  ;;  %v3038_v14 = vld [vmem:[%s3581_s15 + $0x48] sm:$0xff]  ;;  %v3037_v16 = vld [vmem:[%s3581_s15 + $0x40] sm:$0xff]  ;;  %v515_v20 = vld [vmem:[%s3583_s16 + $0x110] sm:$0xff] }
  0x85   : > { %795 = vmatpush.bf16.msra.mxu1 %v3043_v4  ;;  %3062 = vmatpush.bf16.msra.mxu3 %v3043_v4  ;;  %v481_v17 = vld [vmem:[%s3583_s16] sm:$0xff]  ;;  %v482_v21 = vld [vmem:[%s3583_s16 + $0x8] sm:$0xff]  ;;  %v484_v22 = vld [vmem:[%s3583_s16 + $0x18] sm:$0xff] }
  0x86   : > { %v513_v19 = vld [vmem:[%s3583_s16 + $0x100] sm:$0xff]  ;;  %v514_v23 = vld [vmem:[%s3583_s16 + $0x108] sm:$0xff]  ;;  %v516_v24 = vld [vmem:[%s3583_s16 + $0x118] sm:$0xff]  ;;  %v545_v25 = vpack.c.bf16 %v483_v18, %v481_v17  ;;  %v546_v27 = vpack.c.bf16 %v484_v22, %v482_v21 }
  0x87   : > { %v561_v26 = vpack.c.bf16 %v515_v20, %v513_v19  ;;  %v562_v28 = vpack.c.bf16 %v516_v24, %v514_v23  ;;  %v485_v29 = vld [vmem:[%s3583_s16 + $0x20] sm:$0xff]  ;;  %v487_v30 = vld [vmem:[%s3583_s16 + $0x30] sm:$0xff]  ;;  %v486_v33 = vld [vmem:[%s3583_s16 + $0x28] sm:$0xff] }
  0x88   : > { %707 = vmatpush.bf16.msra.mxu0 %v3034_v5  ;;  %3055 = vmatpush.bf16.msra.mxu2 %v3034_v5  ;;  %v517_v31 = vld [vmem:[%s3583_s16 + $0x120] sm:$0xff]  ;;  %v519_v32 = vld [vmem:[%s3583_s16 + $0x130] sm:$0xff]  ;;  %v488_v34 = vld [vmem:[%s3583_s16 + $0x38] sm:$0xff]  ;;  %v547_v37 = vpack.c.bf16 %v487_v30, %v485_v29 }
  0x89   : > { %796 = vmatpush.bf16.msra.mxu1 %v3042_v6  ;;  %3063 = vmatpush.bf16.msra.mxu3 %v3042_v6  ;;  %v518_v35 = vld [vmem:[%s3583_s16 + $0x128] sm:$0xff]  ;;  %v520_v36 = vld [vmem:[%s3583_s16 + $0x138] sm:$0xff]  ;;  %v563_v38 = vpack.c.bf16 %v519_v32, %v517_v31  ;;  %v548_v39 = vpack.c.bf16 %v488_v34, %v486_v33  ;;  %v489_v41 = vld [vmem:[%s3583_s16 + $0x40] sm:$0xff] }
  0x8a   : > { %v564_v40 = vpack.c.bf16 %v520_v36, %v518_v35  ;;  %v491_v42 = vld [vmem:[%s3583_s16 + $0x50] sm:$0xff]  ;;  %v521_v43 = vld [vmem:[%s3583_s16 + $0x140] sm:$0xff]  ;;  %v490_v45 = vld [vmem:[%s3583_s16 + $0x48] sm:$0xff] }
  0x8b   : > { %v523_v44 = vld [vmem:[%s3583_s16 + $0x150] sm:$0xff]  ;;  %v492_v46 = vld [vmem:[%s3583_s16 + $0x58] sm:$0xff]  ;;  %v522_v47 = vld [vmem:[%s3583_s16 + $0x148] sm:$0xff]  ;;  %v549_v49 = vpack.c.bf16 %v491_v42, %v489_v41 }
  0x8c   : > { %708 = vmatpush.bf16.msra.mxu0 %v3033_v7  ;;  %3056 = vmatpush.bf16.msra.mxu2 %v3033_v7  ;;  %v524_v48 = vld [vmem:[%s3583_s16 + $0x158] sm:$0xff]  ;;  %v565_v50 = vpack.c.bf16 %v523_v44, %v521_v43  ;;  %v550_v51 = vpack.c.bf16 %v492_v46, %v490_v45  ;;  %v493_v53 = vld [vmem:[%s3583_s16 + $0x60] sm:$0xff]  ;;  %v495_v54 = vld [vmem:[%s3583_s16 + $0x70] sm:$0xff] }
  0x8d   : > { %797 = vmatpush.bf16.msra.mxu1 %v3041_v8  ;;  %3064 = vmatpush.bf16.msra.mxu3 %v3041_v8  ;;  %v566_v52 = vpack.c.bf16 %v524_v48, %v522_v47  ;;  %v525_v55 = vld [vmem:[%s3583_s16 + $0x160] sm:$0xff]  ;;  %v527_v56 = vld [vmem:[%s3583_s16 + $0x170] sm:$0xff]  ;;  %v494_v57 = vld [vmem:[%s3583_s16 + $0x68] sm:$0xff]  ;;  %v551_v61 = vpack.c.bf16 %v495_v54, %v493_v53 }
  0x8e   : > { %v496_v58 = vld [vmem:[%s3583_s16 + $0x78] sm:$0xff]  ;;  %v526_v59 = vld [vmem:[%s3583_s16 + $0x168] sm:$0xff]  ;;  %v567_v62 = vpack.c.bf16 %v527_v56, %v525_v55  ;;  %v497_v1 = vld [vmem:[%s3583_s16 + $0x80] sm:$0xff] }
  0x8f   : > { %v528_v60 = vld [vmem:[%s3583_s16 + $0x178] sm:$0xff]  ;;  %v552_v63 = vpack.c.bf16 %v496_v58, %v494_v57  ;;  %v499_v2 = vld [vmem:[%s3583_s16 + $0x90] sm:$0xff]  ;;  %v529_v3 = vld [vmem:[%s3583_s16 + $0x180] sm:$0xff] }
  0x90   : > { %709 = vmatpush.bf16.msra.mxu0 %v3032_v9  ;;  %3057 = vmatpush.bf16.msra.mxu2 %v3032_v9  ;;  %v568_v0 = vpack.c.bf16 %v528_v60, %v526_v59  ;;  %v531_v4 = vld [vmem:[%s3583_s16 + $0x190] sm:$0xff]  ;;  %v498_v5 = vld [vmem:[%s3583_s16 + $0x88] sm:$0xff]  ;;  %v500_v6 = vld [vmem:[%s3583_s16 + $0x98] sm:$0xff]  ;;  %v553_v9 = vpack.c.bf16 %v499_v2, %v497_v1 }
  0x91   : > { %798 = vmatpush.bf16.msra.mxu1 %v3040_v10  ;;  %3065 = vmatpush.bf16.msra.mxu3 %v3040_v10  ;;  %v530_v7 = vld [vmem:[%s3583_s16 + $0x188] sm:$0xff]  ;;  %v532_v8 = vld [vmem:[%s3583_s16 + $0x198] sm:$0xff]  ;;  %v569_v10 = vpack.c.bf16 %v531_v4, %v529_v3  ;;  %v450_v59 = vld [vmem:[#allocation2] sm:$0xff] }
  0x92   : > { %v502_v17 = vld [vmem:[%s3583_s16 + $0xa8] sm:$0xff]  ;;  %v504_v18 = vld [vmem:[%s3583_s16 + $0xb8] sm:$0xff] }
  0x93   : > { %v534_v19 = vld [vmem:[%s3583_s16 + $0x1a8] sm:$0xff]  ;;  %v536_v20 = vld [vmem:[%s3583_s16 + $0x1b8] sm:$0xff]  ;;  %v556_v23 = vpack.c.bf16 %v504_v18, %v502_v17 }
  0x94   : > { %710 = vmatpush.bf16.msra.mxu0 %v3031_v11  ;;  %3058 = vmatpush.bf16.msra.mxu2 %v3031_v11  ;;  %v554_v11 = vpack.c.bf16 %v500_v6, %v498_v5  ;;  %v572_v24 = vpack.c.bf16 %v536_v20, %v534_v19  ;;  %v506_v29 = vld [vmem:[%s3583_s16 + $0xc8] sm:$0xff]  ;;  %v508_v30 = vld [vmem:[%s3583_s16 + $0xd8] sm:$0xff] }
  0x95   : > { %799 = vmatpush.bf16.msra.mxu1 %v3039_v12  ;;  %3066 = vmatpush.bf16.msra.mxu3 %v3039_v12  ;;  %v570_v12 = vpack.c.bf16 %v532_v8, %v530_v7  ;;  %v538_v31 = vld [vmem:[%s3583_s16 + $0x1c8] sm:$0xff]  ;;  %v540_v32 = vld [vmem:[%s3583_s16 + $0x1d8] sm:$0xff]  ;;  %v558_v35 = vpack.c.bf16 %v508_v30, %v506_v29 }
  0x96   : > { %v574_v36 = vpack.c.bf16 %v540_v32, %v538_v31  ;;  %v510_v41 = vld [vmem:[%s3583_s16 + $0xe8] sm:$0xff]  ;;  %v512_v42 = vld [vmem:[%s3583_s16 + $0xf8] sm:$0xff]  ;;  %v469_v31 = vld [vmem:[#allocation2 + $0xe0] sm:$0xff] }
  0x97   : > { %v542_v43 = vld [vmem:[%s3583_s16 + $0x1e8] sm:$0xff]  ;;  %v544_v44 = vld [vmem:[%s3583_s16 + $0x1f8] sm:$0xff]  ;;  %v560_v47 = vpack.c.bf16 %v512_v42, %v510_v41  ;;  %v470_v41 = vld [vmem:[#allocation2 + $0x90] sm:$0xff] }
  0x98   : > { %711 = vmatpush.bf16.msra.mxu0 %v3030_v13  ;;  %3059 = vmatpush.bf16.msra.mxu2 %v3030_v13  ;;  %v501_v13 = vld [vmem:[%s3583_s16 + $0xa0] sm:$0xff]  ;;  %v576_v48 = vpack.c.bf16 %v544_v44, %v542_v43  ;;  %v465_v55 = vld [vmem:[#allocation2 + $0x38] sm:$0xff] }
  0x99   : > { %800 = vmatpush.bf16.msra.mxu1 %v3038_v14  ;;  %3067 = vmatpush.bf16.msra.mxu3 %v3038_v14  ;;  %v503_v14 = vld [vmem:[%s3583_s16 + $0xb0] sm:$0xff]  ;;  %v466_v1 = vld [vmem:[#allocation2 + $0x58] sm:$0xff] }
  0x9a   : > { %v555_v21 = vpack.c.bf16 %v503_v14, %v501_v13  ;;  %v451_v5 = vld [vmem:[#allocation2 + $0xd8] sm:$0xff] }
  0x9c   : > { %712 = vmatpush.bf16.msra.mxu0 %v3029_v15  ;;  %3060 = vmatpush.bf16.msra.mxu2 %v3029_v15  ;;  %v533_v15 = vld [vmem:[%s3583_s16 + $0x1a0] sm:$0xff] }
  0x9d   : > { %801 = vmatpush.bf16.msra.mxu1 %v3037_v16  ;;  %3068 = vmatpush.bf16.msra.mxu3 %v3037_v16  ;;  %v535_v16 = vld [vmem:[%s3583_s16 + $0x1b0] sm:$0xff] }
  0x9e   : > { %v571_v22 = vpack.c.bf16 %v535_v16, %v533_v15  ;;  %v452_v15 = vld [vmem:[#allocation2 + $0x18] sm:$0xff] }
  0x9f   : > { %713 = vmatmul.bf16.vlgmr.msra.gmra.mxu0 %v545_v25  ;;  %753 = vmatmul.bf16.vlgmr.msra.gmra.mxu2 %v561_v26  ;;  %v505_v25 = vld [vmem:[%s3583_s16 + $0xc0] sm:$0xff]  ;;  %v507_v26 = vld [vmem:[%s3583_s16 + $0xd0] sm:$0xff] }
  0xa0   : > { %802 = vmatmul.bf16.vlgmr.msra.gmra.mxu1 %v546_v27  ;;  %842 = vmatmul.bf16.vlgmr.msra.gmra.mxu3 %v562_v28  ;;  %v537_v27 = vld [vmem:[%s3583_s16 + $0x1c0] sm:$0xff]  ;;  %v539_v28 = vld [vmem:[%s3583_s16 + $0x1d0] sm:$0xff]  ;;  %v557_v33 = vpack.c.bf16 %v507_v26, %v505_v25 }
  0xa1   : > { %v573_v34 = vpack.c.bf16 %v539_v28, %v537_v27  ;;  %v453_v25 = vld [vmem:[#allocation2 + $0x50] sm:$0xff] }
  0xaf   : > { %718 = vmatmul.bf16.gmra.mxu0 %v547_v37  ;;  %758 = vmatmul.bf16.gmra.mxu2 %v563_v38  ;;  %v509_v37 = vld [vmem:[%s3583_s16 + $0xe0] sm:$0xff]  ;;  %v511_v38 = vld [vmem:[%s3583_s16 + $0xf0] sm:$0xff] }
  0xb0   : > { %807 = vmatmul.bf16.gmra.mxu1 %v548_v39  ;;  %847 = vmatmul.bf16.gmra.mxu3 %v564_v40  ;;  %v541_v39 = vld [vmem:[%s3583_s16 + $0x1e0] sm:$0xff]  ;;  %v543_v40 = vld [vmem:[%s3583_s16 + $0x1f0] sm:$0xff]  ;;  %v559_v45 = vpack.c.bf16 %v511_v38, %v509_v37 }
  0xb1   : > { %v575_v46 = vpack.c.bf16 %v543_v40, %v541_v39 }
  0xbf   : > { %723 = vmatmul.bf16.gmra.mxu0 %v549_v49  ;;  %763 = vmatmul.bf16.gmra.mxu2 %v565_v50  ;;  %v449_v50 = vld [vmem:[#allocation2 + $0xb0] sm:$0xff] }
  0xc0   : > { %812 = vmatmul.bf16.gmra.mxu1 %v550_v51  ;;  %852 = vmatmul.bf16.gmra.mxu3 %v566_v52 }
  0xcf   : > { %728 = vmatmul.bf16.gmra.mxu0 %v551_v61  ;;  %768 = vmatmul.bf16.gmra.mxu2 %v567_v62 }
  0xd0   : > { %817 = vmatmul.bf16.gmra.mxu1 %v552_v63  ;;  %857 = vmatmul.bf16.gmra.mxu3 %v568_v0 }
  0xdf   : > { %733 = vmatmul.bf16.gmra.mxu0 %v553_v9  ;;  %773 = vmatmul.bf16.gmra.mxu2 %v569_v10 }
  0xe0   : > { %822 = vmatmul.bf16.gmra.mxu1 %v554_v11  ;;  %862 = vmatmul.bf16.gmra.mxu3 %v570_v12  ;;  %v467_v11 = vld [vmem:[#allocation2 + $0x40] sm:$0xff] }
  0xef   : > { %738 = vmatmul.bf16.gmra.mxu0 %v555_v21  ;;  %778 = vmatmul.bf16.gmra.mxu2 %v571_v22  ;;  %v468_v21 = vld [vmem:[#allocation2 + $0xc8] sm:$0xff] }
  0xf0   : > { %827 = vmatmul.bf16.gmra.mxu1 %v556_v23  ;;  %867 = vmatmul.bf16.gmra.mxu3 %v572_v24 }
  0xff   : > { %743 = vmatmul.bf16.gmra.mxu0 %v557_v33  ;;  %783 = vmatmul.bf16.gmra.mxu2 %v573_v34 }
 0x100   : > { %832 = vmatmul.bf16.gmra.mxu1 %v558_v35  ;;  %872 = vmatmul.bf16.gmra.mxu3 %v574_v36  ;;  %v454_v35 = vld [vmem:[#allocation2 + $0x68] sm:$0xff] }
 0x10f   : > { %748 = vmatmul.bf16.gmra.mxu0 %v559_v45  ;;  %788 = vmatmul.bf16.gmra.mxu2 %v575_v46  ;;  %v455_v45 = vld [vmem:[#allocation2 + $0x30] sm:$0xff] }
 0x110   : > { %837 = vmatmul.bf16.gmra.mxu1 %v560_v47  ;;  %877 = vmatmul.bf16.gmra.mxu3 %v576_v48 }
 0x11c   : > { %v714_v49 = vpop.f32.mrf.mxu0 }
 0x11d   : > { %v803_v51 = vpop.f32.mrf.mxu1 }
 0x11e   : > { %v804_v52 = vadd.f32 %v803_v51, %v714_v49  ;;  %v471_v51 = vld [vmem:[#allocation2 + $0x70] sm:$0xff] }
 0x120   : > { %v883_v53 = vadd.f32 %v804_v52, %v449_v50 }
 0x122   : > { %915 = vst [vmem:[#allocation2 + $0xb0] sm:$0xff] %v883_v53  ;;  %v754_v54 = vpop.f32.mrf.mxu2 }
 0x123   : > { %v843_v56 = vpop.f32.mrf.mxu3 }
 0x124   : > { %v844_v57 = vadd.f32 %v843_v56, %v754_v54  ;;  %v716_v58 = vpop.f32.mrf.mxu0 }
 0x125   : > { %v805_v60 = vpop.f32.mrf.mxu1 }
 0x126   : > { %v899_v61 = vadd.f32 %v844_v57, %v465_v55  ;;  %v806_v62 = vadd.f32 %v805_v60, %v716_v58  ;;  %v456_v55 = vld [vmem:[#allocation2 + $0x48] sm:$0xff] }
 0x128   : > { %931 = vst [vmem:[#allocation2 + $0x38] sm:$0xff] %v899_v61  ;;  %v884_v63 = vadd.f32 %v806_v62, %v450_v59  ;;  %v472_v61 = vld [vmem:[#allocation2 + $0xc0] sm:$0xff] }
 0x12a   : > { %916 = vst [vmem:[#allocation2] sm:$0xff] %v884_v63  ;;  %v756_v0 = vpop.f32.mrf.mxu2 }
 0x12b   : > { %v845_v2 = vpop.f32.mrf.mxu3 }
 0x12c   : > { %v846_v3 = vadd.f32 %v845_v2, %v756_v0  ;;  %v719_v4 = vpop.f32.mrf.mxu0 }
 0x12d   : > { %v808_v6 = vpop.f32.mrf.mxu1 }
 0x12e   : > { %v900_v7 = vadd.f32 %v846_v3, %v466_v1  ;;  %v809_v8 = vadd.f32 %v808_v6, %v719_v4  ;;  %v457_v1 = vld [vmem:[#allocation2 + $0x80] sm:$0xff] }
 0x130   : > { %932 = vst [vmem:[#allocation2 + $0x58] sm:$0xff] %v900_v7  ;;  %v885_v9 = vadd.f32 %v809_v8, %v451_v5  ;;  %v473_v7 = vld [vmem:[#allocation2 + $0xa8] sm:$0xff] }
 0x132   : > { %917 = vst [vmem:[#allocation2 + $0xd8] sm:$0xff] %v885_v9  ;;  %v759_v10 = vpop.f32.mrf.mxu2 }
 0x133   : > { %v848_v12 = vpop.f32.mrf.mxu3 }
 0x134   : > { %v849_v13 = vadd.f32 %v848_v12, %v759_v10  ;;  %v721_v14 = vpop.f32.mrf.mxu0 }
 0x135   : > { %v810_v16 = vpop.f32.mrf.mxu1 }
 0x136   : > { %v901_v17 = vadd.f32 %v849_v13, %v467_v11  ;;  %v811_v18 = vadd.f32 %v810_v16, %v721_v14  ;;  %v458_v11 = vld [vmem:[#allocation2 + $0x88] sm:$0xff] }
 0x138   : > { %933 = vst [vmem:[#allocation2 + $0x40] sm:$0xff] %v901_v17  ;;  %v886_v19 = vadd.f32 %v811_v18, %v452_v15  ;;  %v474_v17 = vld [vmem:[#allocation2 + $0xd0] sm:$0xff] }
 0x13a   : > { %918 = vst [vmem:[#allocation2 + $0x18] sm:$0xff] %v886_v19  ;;  %v761_v20 = vpop.f32.mrf.mxu2 }
 0x13b   : > { %v850_v22 = vpop.f32.mrf.mxu3 }
 0x13c   : > { %v851_v23 = vadd.f32 %v850_v22, %v761_v20  ;;  %v724_v24 = vpop.f32.mrf.mxu0 }
 0x13d   : > { %v813_v26 = vpop.f32.mrf.mxu1 }
 0x13e   : > { %v902_v27 = vadd.f32 %v851_v23, %v468_v21  ;;  %v814_v28 = vadd.f32 %v813_v26, %v724_v24  ;;  %v459_v21 = vld [vmem:[#allocation2 + $0xe8] sm:$0xff] }
 0x140   : > { %934 = vst [vmem:[#allocation2 + $0xc8] sm:$0xff] %v902_v27  ;;  %v887_v29 = vadd.f32 %v814_v28, %v453_v25  ;;  %v475_v27 = vld [vmem:[#allocation2 + $0x10] sm:$0xff] }
 0x142   : > { %919 = vst [vmem:[#allocation2 + $0x50] sm:$0xff] %v887_v29  ;;  %v764_v30 = vpop.f32.mrf.mxu2 }
 0x143   : > { %v853_v32 = vpop.f32.mrf.mxu3 }
 0x144   : > { %v854_v33 = vadd.f32 %v853_v32, %v764_v30  ;;  %v726_v34 = vpop.f32.mrf.mxu0 }
 0x145   : > { %v815_v36 = vpop.f32.mrf.mxu1 }
 0x146   : > { %v903_v37 = vadd.f32 %v854_v33, %v469_v31  ;;  %v816_v38 = vadd.f32 %v815_v36, %v726_v34  ;;  %v460_v31 = vld [vmem:[#allocation2 + $0xb8] sm:$0xff] }
 0x148   : > { %935 = vst [vmem:[#allocation2 + $0xe0] sm:$0xff] %v903_v37  ;;  %v888_v39 = vadd.f32 %v816_v38, %v454_v35  ;;  %v476_v37 = vld [vmem:[#allocation2 + $0x28] sm:$0xff] }
 0x14a   : > { %920 = vst [vmem:[#allocation2 + $0x68] sm:$0xff] %v888_v39  ;;  %v766_v40 = vpop.f32.mrf.mxu2 }
 0x14b   : > { %v855_v42 = vpop.f32.mrf.mxu3 }
 0x14c   : > { %v856_v43 = vadd.f32 %v855_v42, %v766_v40  ;;  %v729_v44 = vpop.f32.mrf.mxu0 }
 0x14d   : > { %v818_v46 = vpop.f32.mrf.mxu1 }
 0x14e   : > { %v904_v47 = vadd.f32 %v856_v43, %v470_v41  ;;  %v819_v48 = vadd.f32 %v818_v46, %v729_v44  ;;  %v461_v41 = vld [vmem:[#allocation2 + $0x60] sm:$0xff] }
 0x150   : > { %936 = vst [vmem:[#allocation2 + $0x90] sm:$0xff] %v904_v47  ;;  %v889_v49 = vadd.f32 %v819_v48, %v455_v45  ;;  %v477_v47 = vld [vmem:[#allocation2 + $0xa0] sm:$0xff] }
 0x152   : > { %921 = vst [vmem:[#allocation2 + $0x30] sm:$0xff] %v889_v49  ;;  %v769_v50 = vpop.f32.mrf.mxu2 }
 0x153   : > { %v858_v52 = vpop.f32.mrf.mxu3 }
 0x154   : > { %v859_v53 = vadd.f32 %v858_v52, %v769_v50  ;;  %v731_v54 = vpop.f32.mrf.mxu0 }
 0x155   : > { %v820_v56 = vpop.f32.mrf.mxu1 }
 0x156   : > { %v905_v57 = vadd.f32 %v859_v53, %v471_v51  ;;  %v821_v58 = vadd.f32 %v820_v56, %v731_v54  ;;  %v462_v51 = vld [vmem:[#allocation2 + $0xf0] sm:$0xff] }
 0x158   : > { %937 = vst [vmem:[#allocation2 + $0x70] sm:$0xff] %v905_v57  ;;  %v890_v59 = vadd.f32 %v821_v58, %v456_v55  ;;  %v478_v57 = vld [vmem:[#allocation2 + $0xf8] sm:$0xff] }
 0x15a   : > { %922 = vst [vmem:[#allocation2 + $0x48] sm:$0xff] %v890_v59  ;;  %v771_v60 = vpop.f32.mrf.mxu2 }
 0x15b   : > { %v860_v62 = vpop.f32.mrf.mxu3 }
 0x15c   : > { %v861_v63 = vadd.f32 %v860_v62, %v771_v60  ;;  %v734_v0 = vpop.f32.mrf.mxu0 }
 0x15d   : > { %v823_v2 = vpop.f32.mrf.mxu1 }
 0x15e   : > { %v906_v3 = vadd.f32 %v861_v63, %v472_v61  ;;  %v824_v4 = vadd.f32 %v823_v2, %v734_v0  ;;  %v463_v61 = vld [vmem:[#allocation2 + $0x8] sm:$0xff] }
 0x160   : > { %938 = vst [vmem:[#allocation2 + $0xc0] sm:$0xff] %v906_v3  ;;  %v891_v5 = vadd.f32 %v824_v4, %v457_v1  ;;  %v479_v3 = vld [vmem:[#allocation2 + $0x20] sm:$0xff] }
 0x162   : > { %923 = vst [vmem:[#allocation2 + $0x80] sm:$0xff] %v891_v5  ;;  %v774_v6 = vpop.f32.mrf.mxu2 }
 0x163   : > { %v863_v8 = vpop.f32.mrf.mxu3 }
 0x164   : > { %v864_v9 = vadd.f32 %v863_v8, %v774_v6  ;;  %v736_v10 = vpop.f32.mrf.mxu0 }
 0x165   : > { %v825_v12 = vpop.f32.mrf.mxu1 }
 0x166   : > { %v907_v13 = vadd.f32 %v864_v9, %v473_v7  ;;  %v826_v14 = vadd.f32 %v825_v12, %v736_v10  ;;  %v464_v7 = vld [vmem:[#allocation2 + $0x78] sm:$0xff] }
 0x168   : > { %939 = vst [vmem:[#allocation2 + $0xa8] sm:$0xff] %v907_v13  ;;  %v892_v15 = vadd.f32 %v826_v14, %v458_v11  ;;  %v480_v13 = vld [vmem:[#allocation2 + $0x98] sm:$0xff] }
 0x16a   : > { %924 = vst [vmem:[#allocation2 + $0x88] sm:$0xff] %v892_v15  ;;  %v776_v16 = vpop.f32.mrf.mxu2 }
 0x16b   : > { %v865_v18 = vpop.f32.mrf.mxu3 }
 0x16c   : > { %v866_v19 = vadd.f32 %v865_v18, %v776_v16  ;;  %v739_v20 = vpop.f32.mrf.mxu0 }
 0x16d   : > { %v828_v22 = vpop.f32.mrf.mxu1 }
 0x16e   : > { %v908_v23 = vadd.f32 %v866_v19, %v474_v17  ;;  %v829_v24 = vadd.f32 %v828_v22, %v739_v20 }
 0x170   : > { %940 = vst [vmem:[#allocation2 + $0xd0] sm:$0xff] %v908_v23  ;;  %v893_v25 = vadd.f32 %v829_v24, %v459_v21 }
 0x172   : > { %925 = vst [vmem:[#allocation2 + $0xe8] sm:$0xff] %v893_v25  ;;  %v779_v26 = vpop.f32.mrf.mxu2 }
 0x173   : > { %v868_v28 = vpop.f32.mrf.mxu3 }
 0x174   : > { %v869_v29 = vadd.f32 %v868_v28, %v779_v26  ;;  %v741_v30 = vpop.f32.mrf.mxu0 }
 0x175   : > { %v830_v32 = vpop.f32.mrf.mxu1 }
 0x176   : > { %v909_v33 = vadd.f32 %v869_v29, %v475_v27  ;;  %v831_v34 = vadd.f32 %v830_v32, %v741_v30 }
 0x178   : > { %941 = vst [vmem:[#allocation2 + $0x10] sm:$0xff] %v909_v33  ;;  %v894_v35 = vadd.f32 %v831_v34, %v460_v31 }
 0x17a   : > { %926 = vst [vmem:[#allocation2 + $0xb8] sm:$0xff] %v894_v35  ;;  %v781_v36 = vpop.f32.mrf.mxu2 }
 0x17b   : > { %v870_v38 = vpop.f32.mrf.mxu3 }
 0x17c   : > { %v871_v39 = vadd.f32 %v870_v38, %v781_v36  ;;  %v744_v40 = vpop.f32.mrf.mxu0 }
 0x17d   : > { %v833_v42 = vpop.f32.mrf.mxu1 }
 0x17e   : > { %v910_v43 = vadd.f32 %v871_v39, %v476_v37  ;;  %v834_v44 = vadd.f32 %v833_v42, %v744_v40 }
 0x180   : > { %942 = vst [vmem:[#allocation2 + $0x28] sm:$0xff] %v910_v43  ;;  %v895_v45 = vadd.f32 %v834_v44, %v461_v41 }
 0x182   : > { %927 = vst [vmem:[#allocation2 + $0x60] sm:$0xff] %v895_v45  ;;  %v784_v46 = vpop.f32.mrf.mxu2 }
 0x183   : > { %v873_v48 = vpop.f32.mrf.mxu3 }
 0x184   : > { %v874_v49 = vadd.f32 %v873_v48, %v784_v46  ;;  %v746_v50 = vpop.f32.mrf.mxu0 }
 0x185   : > { %v835_v52 = vpop.f32.mrf.mxu1 }
 0x186   : > { %v911_v53 = vadd.f32 %v874_v49, %v477_v47  ;;  %v836_v54 = vadd.f32 %v835_v52, %v746_v50 }
 0x188   : > { %943 = vst [vmem:[#allocation2 + $0xa0] sm:$0xff] %v911_v53  ;;  %v896_v55 = vadd.f32 %v836_v54, %v462_v51 }
 0x18a   : > { %928 = vst [vmem:[#allocation2 + $0xf0] sm:$0xff] %v896_v55  ;;  %v786_v56 = vpop.f32.mrf.mxu2 }
 0x18b   : > { %v875_v58 = vpop.f32.mrf.mxu3 }
 0x18c   : > { %v876_v59 = vadd.f32 %v875_v58, %v786_v56  ;;  %v749_v60 = vpop.f32.mrf.mxu0 }
 0x18d   : > { %v838_v62 = vpop.f32.mrf.mxu1 }
 0x18e   : > { %v912_v63 = vadd.f32 %v876_v59, %v478_v57  ;;  %v839_v0 = vadd.f32 %v838_v62, %v749_v60 }
 0x190   : > { %944 = vst [vmem:[#allocation2 + $0xf8] sm:$0xff] %v912_v63  ;;  %v897_v1 = vadd.f32 %v839_v0, %v463_v61 }
 0x192   : > { %929 = vst [vmem:[#allocation2 + $0x8] sm:$0xff] %v897_v1  ;;  %v789_v2 = vpop.f32.mrf.mxu2 }
 0x193   : > { %v878_v4 = vpop.f32.mrf.mxu3 }
 0x194   : > { %v879_v5 = vadd.f32 %v878_v4, %v789_v2  ;;  %v751_v6 = vpop.f32.mrf.mxu0 }
 0x195   : > { %v840_v8 = vpop.f32.mrf.mxu1 }
 0x196   : > { %v913_v9 = vadd.f32 %v879_v5, %v479_v3  ;;  %v841_v10 = vadd.f32 %v840_v8, %v751_v6 }
 0x198   : > { %945 = vst [vmem:[#allocation2 + $0x20] sm:$0xff] %v913_v9  ;;  %v898_v11 = vadd.f32 %v841_v10, %v464_v7 }
 0x19a   : > { %930 = vst [vmem:[#allocation2 + $0x78] sm:$0xff] %v898_v11  ;;  %v791_v12 = vpop.f32.mrf.mxu2 }
 0x19b   : > { %v880_v14 = vpop.f32.mrf.mxu3 }
 0x19c   : > { %v881_v15 = vadd.f32 %v880_v14, %v791_v12  ;;  %950 = sbr.rel (%p2991_p11) target bundleno = 1116 (0x45c), region = 71 }
 0x19e   : > { %v914_v16 = vadd.f32 %v881_v15, %v480_v13 }
 0x1a0   : > { %946 = vst [vmem:[#allocation2 + $0x98] sm:$0xff] %v914_v16 }
 0x1a1   : > { %v3052_v17 = vld [vmem:[%s6335_s3 + $0x38] sm:$0xff]  ;;  %v3051_v18 = vld [vmem:[%s6335_s3 + $0x30] sm:$0xff]  ;;  %v3050_v19 = vld [vmem:[%s6335_s3 + $0x28] sm:$0xff] }
 0x1a2   : > { %1135 = vmatpush.bf16.msra.mxu0 %v3052_v17  ;;  %3069 = vmatpush.bf16.msra.mxu1 %v3052_v17  ;;  %v3049_v20 = vld [vmem:[%s6335_s3 + $0x20] sm:$0xff]  ;;  %v3048_v21 = vld [vmem:[%s6335_s3 + $0x18] sm:$0xff]  ;;  %v3047_v23 = vld [vmem:[%s6335_s3 + $0x10] sm:$0xff] }
 0x1a3   : > { %3070 = vmatpush.bf16.msra.mxu2 %v3052_v17  ;;  %3071 = vmatpush.bf16.msra.mxu3 %v3052_v17  ;;  %v3685_v22 = vld [vmem:[%s6334_s2] ss:$0 sm:$0xff]  ;;  %v951_v24 = vld [vmem:[#allocation2 + $0xb0] sm:$0xff]  ;;  %v960_v27 = vld [vmem:[#allocation2 + $0x88] sm:$0xff] }
 0x1a4   : > { %v952_v25 = vld [vmem:[#allocation2] sm:$0xff]  ;;  %v967_v28 = vld [vmem:[#allocation2 + $0x38] sm:$0xff]  ;;  %v975_v30 = vld [vmem:[#allocation2 + $0xa8] sm:$0xff]  ;;  %v987_v32 = vadd.f32 %v3685_v22, %v951_v24  ;;  %v996_v35 = vadd.f32 %v3685_v22, %v960_v27 }
 0x1a5   : > { %v959_v26 = vld [vmem:[#allocation2 + $0x80] sm:$0xff]  ;;  %v968_v29 = vld [vmem:[#allocation2 + $0x58] sm:$0xff]  ;;  %v976_v31 = vld [vmem:[#allocation2 + $0xd0] sm:$0xff]  ;;  %v988_v33 = vadd.f32 %v3685_v22, %v952_v25  ;;  %v1003_v36 = vadd.f32 %v3685_v22, %v967_v28  ;;  %v1011_v39 = vadd.f32 %v3685_v22, %v975_v30 }
 0x1a6   : > { %1136 = vmatpush.bf16.msra.mxu0 %v3051_v18  ;;  %3072 = vmatpush.bf16.msra.mxu1 %v3051_v18  ;;  %v995_v34 = vadd.f32 %v3685_v22, %v959_v26  ;;  %v3046_v37 = vld [vmem:[%s6335_s3 + $0x8] sm:$0xff]  ;;  %v1004_v38 = vadd.f32 %v3685_v22, %v968_v29  ;;  %v1012_v40 = vadd.f32 %v3685_v22, %v976_v31  ;;  %v1019_v41 = vmax.f32 %v987_v32, 0.0  ;;  %v3045_v45 = vld [vmem:[%s6335_s3] sm:$0xff]  ;;  %v953_v54 = vld [vmem:[#allocation2 + $0xd8] sm:$0xff] }
 0x1a7   : > { %3073 = vmatpush.bf16.msra.mxu2 %v3051_v18  ;;  %3074 = vmatpush.bf16.msra.mxu3 %v3051_v18  ;;  %v1020_v42 = vmax.f32 %v988_v33, 0.0  ;;  %v1028_v44 = vmax.f32 %v996_v35, 0.0  ;;  %v1035_v46 = vmax.f32 %v1003_v36, 0.0  ;;  %v1043_v48 = vmax.f32 %v1011_v39, 0.0  ;;  %v954_v55 = vld [vmem:[#allocation2 + $0x18] sm:$0xff]  ;;  %v961_v56 = vld [vmem:[#allocation2 + $0xe8] sm:$0xff] }
 0x1a8   : > { %v1027_v43 = vmax.f32 %v995_v34, 0.0  ;;  %v1036_v47 = vmax.f32 %v1004_v38, 0.0  ;;  %v1044_v49 = vmax.f32 %v1012_v40, 0.0  ;;  %v962_v57 = vld [vmem:[#allocation2 + $0xb8] sm:$0xff]  ;;  %v977_v58 = vld [vmem:[#allocation2 + $0x10] sm:$0xff]  ;;  %v978_v59 = vld [vmem:[#allocation2 + $0x28] sm:$0xff]  ;;  %v989_v62 = vadd.f32 %v3685_v22, %v953_v54 }
 0x1a9   : > { %v1051_v50 = vpack.c.bf16 %v1020_v42, %v1019_v41  ;;  %v969_v60 = vld [vmem:[#allocation2 + $0x40] sm:$0xff]  ;;  %v970_v61 = vld [vmem:[#allocation2 + $0xc8] sm:$0xff]  ;;  %v990_v63 = vadd.f32 %v3685_v22, %v954_v55  ;;  %v997_v0 = vadd.f32 %v3685_v22, %v961_v56  ;;  %v998_v1 = vadd.f32 %v3685_v22, %v962_v57  ;;  %v980_v24 = vld [vmem:[#allocation2 + $0xf8] sm:$0xff] }
 0x1aa   : > { %1137 = vmatpush.bf16.msra.mxu0 %v3050_v19  ;;  %3075 = vmatpush.bf16.msra.mxu1 %v3050_v19  ;;  %v1055_v51 = vpack.c.bf16 %v1028_v44, %v1027_v43  ;;  %v1059_v52 = vpack.c.bf16 %v1036_v47, %v1035_v46  ;;  %v1063_v53 = vpack.c.bf16 %v1044_v49, %v1043_v48  ;;  %v1021_v6 = vmax.f32 %v989_v62, 0.0  ;;  %v979_v18 = vld [vmem:[#allocation2 + $0xa0] sm:$0xff]  ;;  %v972_v26 = vld [vmem:[#allocation2 + $0x90] sm:$0xff]  ;;  %v958_v48 = vld [vmem:[#allocation2 + $0x48] sm:$0xff] }
 0x1ab   : > { %3076 = vmatpush.bf16.msra.mxu2 %v3050_v19  ;;  %3077 = vmatpush.bf16.msra.mxu3 %v3050_v19  ;;  %v1013_v2 = vadd.f32 %v3685_v22, %v977_v58  ;;  %v1014_v3 = vadd.f32 %v3685_v22, %v978_v59  ;;  %v1005_v4 = vadd.f32 %v3685_v22, %v969_v60  ;;  %v1022_v7 = vmax.f32 %v990_v63, 0.0  ;;  %v955_v19 = vld [vmem:[#allocation2 + $0x50] sm:$0xff]  ;;  %v971_v25 = vld [vmem:[#allocation2 + $0xe0] sm:$0xff]  ;;  %v965_v49 = vld [vmem:[#allocation2 + $0x8] sm:$0xff] }
 0x1ac   : > { %v1006_v5 = vadd.f32 %v3685_v22, %v970_v61  ;;  %v1029_v8 = vmax.f32 %v997_v0, 0.0  ;;  %v1030_v9 = vmax.f32 %v998_v1, 0.0  ;;  %v991_v27 = vadd.f32 %v3685_v22, %v955_v19  ;;  %v957_v47 = vld [vmem:[#allocation2 + $0x30] sm:$0xff]  ;;  %v982_v54 = vld [vmem:[#allocation2 + $0x98] sm:$0xff] }
 0x1ad   : > { %v1045_v10 = vmax.f32 %v1013_v2, 0.0  ;;  %v1046_v11 = vmax.f32 %v1014_v3, 0.0  ;;  %v1037_v12 = vmax.f32 %v1005_v4, 0.0  ;;  %v1052_v14 = vpack.c.bf16 %v1022_v7, %v1021_v6 }
 0x1ae   : > { %1138 = vmatpush.bf16.msra.mxu0 %v3049_v20  ;;  %3078 = vmatpush.bf16.msra.mxu1 %v3049_v20  ;;  %v1038_v13 = vmax.f32 %v1006_v5, 0.0  ;;  %v1056_v15 = vpack.c.bf16 %v1030_v9, %v1029_v8  ;;  %v1015_v31 = vadd.f32 %v3685_v22, %v979_v18  ;;  %v1016_v32 = vadd.f32 %v3685_v22, %v980_v24 }
 0x1af   : > { %3079 = vmatpush.bf16.msra.mxu2 %v3049_v20  ;;  %3080 = vmatpush.bf16.msra.mxu3 %v3049_v20  ;;  %v1064_v16 = vpack.c.bf16 %v1046_v11, %v1045_v10  ;;  %v956_v20 = vld [vmem:[#allocation2 + $0x68] sm:$0xff]  ;;  %v1007_v33 = vadd.f32 %v3685_v22, %v971_v25  ;;  %v1008_v34 = vadd.f32 %v3685_v22, %v972_v26  ;;  %v1023_v35 = vmax.f32 %v991_v27, 0.0 }
 0x1b0   : > { %v1060_v17 = vpack.c.bf16 %v1038_v13, %v1037_v12  ;;  %v992_v28 = vadd.f32 %v3685_v22, %v956_v20  ;;  %v1047_v39 = vmax.f32 %v1015_v31, 0.0  ;;  %v1048_v40 = vmax.f32 %v1016_v32, 0.0 }
 0x1b1   : > { %v1039_v41 = vmax.f32 %v1007_v33, 0.0  ;;  %v1040_v42 = vmax.f32 %v1008_v34, 0.0  ;;  %v993_v55 = vadd.f32 %v3685_v22, %v957_v47  ;;  %v994_v56 = vadd.f32 %v3685_v22, %v958_v48 }
 0x1b2   : > { %1139 = vmatpush.bf16.msra.mxu0 %v3048_v21  ;;  %3081 = vmatpush.bf16.msra.mxu1 %v3048_v21  ;;  %v1024_v36 = vmax.f32 %v992_v28, 0.0  ;;  %v1001_v57 = vadd.f32 %v3685_v22, %v965_v49  ;;  %v1018_v62 = vadd.f32 %v3685_v22, %v982_v54  ;;  %v1224_v11 = vlaneseq }
 0x1b3   : > { %3082 = vmatpush.bf16.msra.mxu2 %v3048_v21  ;;  %3083 = vmatpush.bf16.msra.mxu3 %v3048_v21  ;;  %v963_v21 = vld [vmem:[#allocation2 + $0x60] sm:$0xff]  ;;  %v1061_v46 = vpack.c.bf16 %v1040_v42, %v1039_v41  ;;  %v1025_v63 = vmax.f32 %v993_v55, 0.0  ;;  %v1026_v0 = vmax.f32 %v994_v56, 0.0 }
 0x1b4   : > { %v999_v29 = vadd.f32 %v3685_v22, %v963_v21  ;;  %v1053_v43 = vpack.c.bf16 %v1024_v36, %v1023_v35  ;;  %v1033_v1 = vmax.f32 %v1001_v57, 0.0  ;;  %v1050_v6 = vmax.f32 %v1018_v62, 0.0 }
 0x1b5   : > { %v1054_v7 = vpack.c.bf16 %v1026_v0, %v1025_v63  ;;  %v3728_v12 = vand.u32 127, %v1224_v11 }
 0x1b6   : > { %1140 = vmatpush.bf16.msra.mxu0 %v3047_v23  ;;  %3084 = vmatpush.bf16.msra.mxu1 %v3047_v23 }
 0x1b7   : > { %3085 = vmatpush.bf16.msra.mxu2 %v3047_v23  ;;  %3086 = vmatpush.bf16.msra.mxu3 %v3047_v23  ;;  %v964_v23 = vld [vmem:[#allocation2 + $0xf0] sm:$0xff]  ;;  %vm1229_vm0 = vcmp.ge.s32.totalorder %v3728_v12, 20  ;;  %vm1230_vm1 = vcmp.lt.s32.totalorder %v3728_v12, 28  ;;  %vm1227_vm3 = vcmp.lt.s32.totalorder %v3728_v12, 4 }
 0x1b8   : > { %v1000_v30 = vadd.f32 %v3685_v22, %v964_v23  ;;  %vm3737_vm2 = vmand %vm1229_vm0, %vm1230_vm1 }
 0x1ba   : > { %1141 = vmatpush.bf16.msra.mxu0 %v3046_v37  ;;  %3087 = vmatpush.bf16.msra.mxu1 %v3046_v37  ;;  %v1032_v38 = vmax.f32 %v1000_v30, 0.0 }
 0x1bb   : > { %3088 = vmatpush.bf16.msra.mxu2 %v3046_v37  ;;  %3089 = vmatpush.bf16.msra.mxu3 %v3046_v37  ;;  %v1031_v37 = vmax.f32 %v999_v29, 0.0 }
 0x1bd   : > { %v1057_v44 = vpack.c.bf16 %v1032_v38, %v1031_v37 }
 0x1be   : > { %1142 = vmatpush.bf16.msra.mxu0 %v3045_v45  ;;  %3090 = vmatpush.bf16.msra.mxu1 %v3045_v45 }
 0x1bf   : > { %3091 = vmatpush.bf16.msra.mxu2 %v3045_v45  ;;  %3092 = vmatpush.bf16.msra.mxu3 %v3045_v45  ;;  %v1065_v45 = vpack.c.bf16 %v1048_v40, %v1047_v39 }
 0x1c1   : > { %1143 = vmatmul.bf16.vlgmr.msra.gmra.mxu0 %v1051_v50  ;;  %1163 = vmatmul.bf16.vlgmr.msra.gmra.mxu1 %v1055_v51  ;;  %v966_v50 = vld [vmem:[#allocation2 + $0x78] sm:$0xff]  ;;  %v973_v51 = vld [vmem:[#allocation2 + $0x70] sm:$0xff] }
 0x1c2   : > { %1183 = vmatmul.bf16.vlgmr.msra.gmra.mxu2 %v1059_v52  ;;  %1203 = vmatmul.bf16.vlgmr.msra.gmra.mxu3 %v1063_v53  ;;  %v974_v52 = vld [vmem:[#allocation2 + $0xc0] sm:$0xff]  ;;  %v1002_v58 = vadd.f32 %v3685_v22, %v966_v50  ;;  %v1009_v59 = vadd.f32 %v3685_v22, %v973_v51 }
 0x1c3   : > { %v981_v53 = vld [vmem:[#allocation2 + $0x20] sm:$0xff]  ;;  %v1010_v60 = vadd.f32 %v3685_v22, %v974_v52 }
 0x1c4   : > { %v1017_v61 = vadd.f32 %v3685_v22, %v981_v53  ;;  %v1034_v2 = vmax.f32 %v1002_v58, 0.0  ;;  %v1041_v3 = vmax.f32 %v1009_v59, 0.0  ;;  %v3733_v22 = vld [vmem:[%s6336_s4] ss:$0 sm:$0xff] }
 0x1c5   : > { %v1042_v4 = vmax.f32 %v1010_v60, 0.0 }
 0x1c6   : > { %v1049_v5 = vmax.f32 %v1017_v61, 0.0  ;;  %v1058_v8 = vpack.c.bf16 %v1034_v2, %v1033_v1 }
 0x1c7   : > { %v1062_v9 = vpack.c.bf16 %v1042_v4, %v1041_v3 }
 0x1c8   : > { %v1066_v10 = vpack.c.bf16 %v1050_v6, %v1049_v5 }
 0x1d1   : > { %1148 = vmatmul.bf16.gmra.mxu0 %v1052_v14  ;;  %1168 = vmatmul.bf16.gmra.mxu1 %v1056_v15 }
 0x1d2   : > { %1208 = vmatmul.bf16.gmra.mxu3 %v1064_v16  ;;  %1188 = vmatmul.bf16.gmra.mxu2 %v1060_v17 }
 0x1e1   : > { %1153 = vmatmul.bf16.gmra.mxu0 %v1053_v43  ;;  %1173 = vmatmul.bf16.gmra.mxu1 %v1057_v44 }
 0x1e2   : > { %1213 = vmatmul.bf16.gmra.mxu3 %v1065_v45  ;;  %1193 = vmatmul.bf16.gmra.mxu2 %v1061_v46 }
 0x1f1   : > { %1158 = vmatmul.bf16.gmra.mxu0 %v1054_v7  ;;  %1178 = vmatmul.bf16.gmra.mxu1 %v1058_v8 }
 0x1f2   : > { %1198 = vmatmul.bf16.gmra.mxu2 %v1062_v9  ;;  %1218 = vmatmul.bf16.gmra.mxu3 %v1066_v10 }
 0x23e   : > { %v1144_v13 = vpop.f32.mrf.mxu0  ;;  %v1164_v14 = vpop.f32.mrf.mxu1 }
 0x23f   : > { %v3743_v16 = vadd.f32 %v3733_v22, %v1144_v13  ;;  %v3746_v17 = vadd.f32 %v3733_v22, %v1164_v14 }
 0x241   : > { %v1337_v18 = vsel %vm3737_vm2, %v3746_v17, -1e+30  ;;  %v1241_v19 = vsel %vm1227_vm3, %v3746_v17, -1e+30  ;;  %v1233_v20 = vsel %vm1227_vm3, %v3743_v16, -1e+30 }
 0x242   : > { %1377 = vmax.xlane.f32.xlu1 %v1337_v18  ;;  %1281 = vmax.xlane.f32.xlu2 %v1241_v19  ;;  %v1329_v28 = vsel %vm3737_vm2, %v3743_v16, -1e+30 }
 0x243   : > { %1265 = vmax.xlane.f32.xlu0 %v1233_v20 }
 0x245   : > { %v1184_v21 = vpop.f32.mrf.mxu2  ;;  %v1204_v23 = vpop.f32.mrf.mxu3 }
 0x246   : > { %v3758_v24 = vadd.f32 %v3733_v22, %v1184_v21  ;;  %v3761_v25 = vadd.f32 %v3733_v22, %v1204_v23  ;;  %v1146_v31 = vpop.f32.mrf.mxu0  ;;  %v1166_v34 = vpop.f32.mrf.mxu1 }
 0x247   : > { %v3785_v37 = vadd.f32 %v3733_v22, %v1166_v34  ;;  %v3791_v39 = vadd.f32 %v3733_v22, %v1146_v31 }
 0x248   : > { %v1249_v26 = vsel %vm1227_vm3, %v3758_v24, -1e+30  ;;  %v1257_v27 = vsel %vm1227_vm3, %v3761_v25, -1e+30  ;;  %v1353_v33 = vsel %vm3737_vm2, %v3761_v25, -1e+30 }
 0x249   : > { %v1345_v36 = vsel %vm3737_vm2, %v3758_v24, -1e+30  ;;  %v1338_v41 = vsel %vm3737_vm2, %v3785_v37, -1e+30  ;;  %v1234_v43 = vsel %vm1227_vm3, %v3791_v39, -1e+30 }
 0x24a   : > { %1297 = vmax.xlane.f32.xlu1 %v1249_v26  ;;  %1361 = vmax.xlane.f32.xlu2 %v1329_v28  ;;  %v1242_v49 = vsel %vm1227_vm3, %v3785_v37, -1e+30  ;;  %v1330_v55 = vsel %vm3737_vm2, %v3791_v39, -1e+30 }
 0x24b   : > { %1313 = vmax.xlane.f32.xlu0 %v1257_v27 }
 0x24d   : > { %v1206_v29 = vpop.f32.mrf.mxu3  ;;  %v1186_v35 = vpop.f32.mrf.mxu2 }
 0x24e   : > { %v3773_v30 = vadd.f32 %v3733_v22, %v1206_v29  ;;  %v3788_v38 = vadd.f32 %v3733_v22, %v1186_v35  ;;  %v1149_v42 = vpop.f32.mrf.mxu0  ;;  %v1169_v48 = vpop.f32.mrf.mxu1 }
 0x24f   : > { %v3803_v44 = vadd.f32 %v3733_v22, %v1149_v42  ;;  %v3815_v50 = vadd.f32 %v3733_v22, %v1169_v48 }
 0x250   : > { %v1258_v32 = vsel %vm1227_vm3, %v3773_v30, -1e+30  ;;  %v1346_v40 = vsel %vm3737_vm2, %v3788_v38, -1e+30  ;;  %v1250_v47 = vsel %vm1227_vm3, %v3788_v38, -1e+30 }
 0x251   : > { %6379 = vst [vmem:[#allocation4_spill] sm:$0xff] %v3803_v44  ;;  %v1235_v45 = vsel %vm1227_vm3, %v3803_v44, -1e+30  ;;  %v1243_v52 = vsel %vm1227_vm3, %v3815_v50, -1e+30 }
 0x252   : > { %1315 = vmax.xlane.f32.xlu1 %v1258_v32  ;;  %1409 = vmax.xlane.f32.xlu2 %v1353_v33  ;;  %6380 = vst [vmem:[#allocation5_spill] sm:$0xff] %v3815_v50  ;;  %v1331_v58 = vsel %vm3737_vm2, %v3803_v44, -1e+30  ;;  %v1354_v60 = vsel %vm3737_vm2, %v3773_v30, -1e+30 }
 0x253   : > { %1393 = vmax.xlane.f32.xlu0 %v1345_v36  ;;  %v1339_v1 = vsel %vm3737_vm2, %v3815_v50, -1e+30 }
 0x255   : > { %v1209_v46 = vpop.f32.mrf.mxu3  ;;  %v1189_v54 = vpop.f32.mrf.mxu2 }
 0x256   : > { %v3818_v51 = vadd.f32 %v3733_v22, %v1209_v46  ;;  %v3830_v56 = vadd.f32 %v3733_v22, %v1189_v54  ;;  %v1171_v59 = vpop.f32.mrf.mxu1  ;;  %v1151_v0 = vpop.f32.mrf.mxu0 }
 0x257   : > { %v3842_v61 = vadd.f32 %v3733_v22, %v1171_v59  ;;  %v3854_v2 = vadd.f32 %v3733_v22, %v1151_v0 }
 0x258   : > { %6381 = vst [vmem:[#allocation6_spill] sm:$0xff] %v3818_v51  ;;  %v1259_v53 = vsel %vm1227_vm3, %v3818_v51, -1e+30  ;;  %v1347_v57 = vsel %vm3737_vm2, %v3830_v56, -1e+30 }
 0x259   : > { %6382 = vst [vmem:[#allocation7_spill] sm:$0xff] %v3830_v56  ;;  %v1355_v62 = vsel %vm3737_vm2, %v3818_v51, -1e+30  ;;  %v1244_v63 = vsel %vm1227_vm3, %v3842_v61, -1e+30 }
 0x25a   : > { %1395 = vmax.xlane.f32.xlu1 %v1346_v40  ;;  %1379 = vmax.xlane.f32.xlu2 %v1338_v41  ;;  %6383 = vst [vmem:[#allocation8_spill] sm:$0xff] %v3842_v61  ;;  %v1236_v3 = vsel %vm1227_vm3, %v3854_v2, -1e+30  ;;  %v1332_v4 = vsel %vm3737_vm2, %v3854_v2, -1e+30 }
 0x25b   : > { %1267 = vmax.xlane.f32.xlu0 %v1234_v43  ;;  %6384 = vst [vmem:[#allocation9_spill] sm:$0xff] %v3854_v2  ;;  %v1251_v6 = vsel %vm1227_vm3, %v3830_v56, -1e+30  ;;  %v1340_v9 = vsel %vm3737_vm2, %v3842_v61, -1e+30 }
 0x25d   : > { %v1211_v5 = vpop.f32.mrf.mxu3  ;;  %v1191_v11 = vpop.f32.mrf.mxu2 }
 0x25e   : > { %v3866_v7 = vadd.f32 %v3733_v22, %v1211_v5  ;;  %v1154_v8 = vpop.f32.mrf.mxu0  ;;  %v3881_v18 = vadd.f32 %v3733_v22, %v1191_v11  ;;  %v1174_v21 = vpop.f32.mrf.mxu1 }
 0x25f   : > { %v3878_v14 = vadd.f32 %v3733_v22, %v1154_v8  ;;  %v3893_v27 = vadd.f32 %v3733_v22, %v1174_v21 }
 0x260   : > { %6385 = vst [vmem:[#allocation10_spill] sm:$0xff] %v3866_v7  ;;  %v1356_v10 = vsel %vm3737_vm2, %v3866_v7, -1e+30  ;;  %v1260_v13 = vsel %vm1227_vm3, %v3866_v7, -1e+30 }
 0x261   : > { %6386 = vst [vmem:[#allocation11_spill] sm:$0xff] %v3878_v14  ;;  %v1237_v19 = vsel %vm1227_vm3, %v3878_v14, -1e+30  ;;  %v1252_v20 = vsel %vm1227_vm3, %v3881_v18, -1e+30 }
 0x262   : > { %1269 = vmax.xlane.f32.xlu1 %v1235_v45  ;;  %1299 = vmax.xlane.f32.xlu2 %v1250_v47  ;;  %6387 = vst [vmem:[#allocation12_spill] sm:$0xff] %v3881_v18  ;;  %v1348_v26 = vsel %vm3737_vm2, %v3881_v18, -1e+30  ;;  %v1341_v31 = vsel %vm3737_vm2, %v3893_v27, -1e+30 }
 0x263   : > { %1283 = vmax.xlane.f32.xlu0 %v1242_v49  ;;  %6388 = vst [vmem:[#allocation13_spill] sm:$0xff] %v3893_v27  ;;  %v1245_v32 = vsel %vm1227_vm3, %v3893_v27, -1e+30  ;;  %v1333_v42 = vsel %vm3737_vm2, %v3878_v14, -1e+30 }
 0x265   : > { %v1214_v23 = vpop.f32.mrf.mxu3  ;;  %v1194_v33 = vpop.f32.mrf.mxu2 }
 0x266   : > { %v3896_v28 = vadd.f32 %v3733_v22, %v1214_v23  ;;  %v3908_v34 = vadd.f32 %v3733_v22, %v1194_v33  ;;  %v1156_v40 = vpop.f32.mrf.mxu0  ;;  %v1176_v41 = vpop.f32.mrf.mxu1 }
 0x267   : > { %v3920_v43 = vadd.f32 %v3733_v22, %v1156_v40  ;;  %v3923_v45 = vadd.f32 %v3733_v22, %v1176_v41 }
 0x268   : > { %6389 = vst [vmem:[#allocation14_spill] sm:$0xff] %v3896_v28  ;;  %v1261_v29 = vsel %vm1227_vm3, %v3896_v28, -1e+30  ;;  %v1349_v35 = vsel %vm3737_vm2, %v3908_v34, -1e+30 }
 0x269   : > { %6390 = vst [vmem:[#allocation15_spill] sm:$0xff] %v3908_v34  ;;  %v1253_v36 = vsel %vm1227_vm3, %v3908_v34, -1e+30  ;;  %v1246_v46 = vsel %vm1227_vm3, %v3923_v45, -1e+30 }
 0x26a   : > { %1285 = vmax.xlane.f32.xlu1 %v1243_v52  ;;  %1317 = vmax.xlane.f32.xlu2 %v1259_v53  ;;  %6391 = vst [vmem:[#allocation16_spill] sm:$0xff] %v3920_v43  ;;  %v1238_v47 = vsel %vm1227_vm3, %v3920_v43, -1e+30  ;;  %v1357_v49 = vsel %vm3737_vm2, %v3896_v28, -1e+30 }
 0x26b   : > { %1363 = vmax.xlane.f32.xlu0 %v1330_v55  ;;  %6392 = vst [vmem:[#allocation17_spill] sm:$0xff] %v3923_v45  ;;  %v1334_v53 = vsel %vm3737_vm2, %v3920_v43, -1e+30 }
 0x26d   : > { %v1216_v48 = vpop.f32.mrf.mxu3  ;;  %v1196_v55 = vpop.f32.mrf.mxu2 }
 0x26e   : > { %v3935_v52 = vadd.f32 %v3733_v22, %v1216_v48 }
 0x270   : > { %6393 = vst [vmem:[#allocation18_spill] sm:$0xff] %v3935_v52  ;;  %v1262_v54 = vsel %vm1227_vm3, %v3935_v52, -1e+30 }
 0x272   : > { %1365 = vmax.xlane.f32.xlu1 %v1331_v58  ;;  %1397 = vmax.xlane.f32.xlu2 %v1347_v57  ;;  %v1342_v57 = vsel %vm3737_vm2, %v3923_v45, -1e+30  ;;  %v3947_v58 = vadd.f32 %v3733_v22, %v1196_v55 }
 0x273   : > { %1411 = vmax.xlane.f32.xlu0 %v1354_v60 }
 0x274   : > { %6394 = vst [vmem:[#allocation19_spill] sm:$0xff] %v3947_v58  ;;  %v1350_v0 = vsel %vm3737_vm2, %v3947_v58, -1e+30 }
 0x275   : > { %v1219_v23 = vpop.f32.mrf.mxu3 }
 0x27a   : > { %1413 = vmax.xlane.f32.xlu1 %v1355_v62  ;;  %1287 = vmax.xlane.f32.xlu2 %v1244_v63  ;;  %v1358_v63 = vsel %vm3737_vm2, %v3935_v52, -1e+30 }
 0x27b   : > { %1381 = vmax.xlane.f32.xlu0 %v1339_v1  ;;  %v1179_v1 = vpop.f32.mrf.mxu1 }
 0x27c   : > { %v3959_v5 = vadd.f32 %v3733_v22, %v1179_v1 }
 0x27e   : > { %6395 = vst [vmem:[#allocation20_spill] sm:$0xff] %v3959_v5  ;;  %v1343_v11 = vsel %vm3737_vm2, %v3959_v5, -1e+30 }
 0x282   : > { %1271 = vmax.xlane.f32.xlu1 %v1236_v3  ;;  %1367 = vmax.xlane.f32.xlu2 %v1332_v4  ;;  %v1254_v3 = vsel %vm1227_vm3, %v3947_v58, -1e+30  ;;  %v1159_v4 = vpop.f32.mrf.mxu0 }
 0x283   : > { %1301 = vmax.xlane.f32.xlu0 %v1251_v6  ;;  %v3962_v6 = vadd.f32 %v3733_v22, %v1159_v4  ;;  %v1181_v55 = vpop.f32.mrf.mxu1 }
 0x284   : > { %v4017_v1 = vadd.f32 %v3733_v22, %v1181_v55 }
 0x285   : > { %6396 = vst [vmem:[#allocation21_spill] sm:$0xff] %v3962_v6 }
 0x286   : > { %6400 = vst [vmem:[#allocation25_spill] sm:$0xff] %v4017_v1 }
 0x28a   : > { %1383 = vmax.xlane.f32.xlu1 %v1340_v9  ;;  %1415 = vmax.xlane.f32.xlu2 %v1356_v10  ;;  %v1161_v40 = vpop.f32.mrf.mxu0 }
 0x28b   : > { %1319 = vmax.xlane.f32.xlu0 %v1260_v13  ;;  %v1247_v13 = vsel %vm1227_vm3, %v3959_v5, -1e+30  ;;  %v3991_v41 = vadd.f32 %v3733_v22, %v1161_v40 }
 0x28d   : > { %6399 = vst [vmem:[#allocation24_spill] sm:$0xff] %v3991_v41 }
 0x292   : > { %1303 = vmax.xlane.f32.xlu1 %v1252_v20  ;;  %1273 = vmax.xlane.f32.xlu2 %v1237_v19  ;;  %v1239_v19 = vsel %vm1227_vm3, %v3962_v6, -1e+30  ;;  %v1199_v20 = vpop.f32.mrf.mxu2 }
 0x293   : > { %1399 = vmax.xlane.f32.xlu0 %v1348_v26  ;;  %v3974_v21 = vadd.f32 %v3733_v22, %v1199_v20  ;;  %v3977_v26 = vadd.f32 %v3733_v22, %v1219_v23  ;;  %v1344_v20 = vsel %vm3737_vm2, %v4017_v1, -1e+30 }
 0x295   : > { %6397 = vst [vmem:[#allocation22_spill] sm:$0xff] %v3974_v21  ;;  %v1255_v33 = vsel %vm1227_vm3, %v3974_v21, -1e+30 }
 0x296   : > { %6398 = vst [vmem:[#allocation23_spill] sm:$0xff] %v3977_v26 }
 0x29a   : > { %1321 = vmax.xlane.f32.xlu1 %v1261_v29  ;;  %1385 = vmax.xlane.f32.xlu2 %v1341_v31 }
 0x29b   : > { %1289 = vmax.xlane.f32.xlu0 %v1245_v32 }
 0x2a2   : > { %1401 = vmax.xlane.f32.xlu1 %v1349_v35  ;;  %1305 = vmax.xlane.f32.xlu2 %v1253_v36  ;;  %v1263_v35 = vsel %vm1227_vm3, %v3977_v26, -1e+30  ;;  %v1335_v36 = vsel %vm3737_vm2, %v3962_v6, -1e+30 }
 0x2a3   : > { %1369 = vmax.xlane.f32.xlu0 %v1333_v42 }
 0x2aa   : > { %1291 = vmax.xlane.f32.xlu1 %v1246_v46  ;;  %1275 = vmax.xlane.f32.xlu2 %v1238_v47 }
 0x2ab   : > { %1417 = vmax.xlane.f32.xlu0 %v1357_v49  ;;  %v1240_v49 = vsel %vm1227_vm3, %v3991_v41, -1e+30 }
 0x2b2   : > { %1371 = vmax.xlane.f32.xlu1 %v1334_v53  ;;  %1323 = vmax.xlane.f32.xlu2 %v1262_v54  ;;  %v1359_v53 = vsel %vm3737_vm2, %v3977_v26, -1e+30 }
 0x2b3   : > { %1387 = vmax.xlane.f32.xlu0 %v1342_v57  ;;  %v1221_v57 = vpop.f32.mrf.mxu3 }
 0x2b5   : > { %v1378_v59 = vpop.xlane.xlu1 %1377  ;;  %v1282_v60 = vpop.xlane.xlu2 %1281 }
 0x2b6   : > { %v1266_v62 = vpop.xlane.xlu0 %1265  ;;  %v1433_v48 = vsel %vm3737_vm2, %v1378_v59, %v3746_v17  ;;  %v1351_v59 = vsel %vm3737_vm2, %v3974_v21, -1e+30 }
 0x2ba   : > { %1419 = vmax.xlane.f32.xlu1 %v1358_v63  ;;  %1403 = vmax.xlane.f32.xlu2 %v1350_v0  ;;  %v1465_v63 = vsel %vm1227_vm3, %v1282_v60, %v1433_v48 }
 0x2bb   : > { %1307 = vmax.xlane.f32.xlu0 %v1254_v3  ;;  %v4020_v3 = vadd.f32 %v3733_v22, %v1221_v57 }
 0x2bd   : > { %v1298_v8 = vpop.xlane.xlu1 %1297  ;;  %v1362_v9 = vpop.xlane.xlu2 %1361  ;;  %6401 = vst [vmem:[#allocation26_spill] sm:$0xff] %v4020_v3 }
 0x2be   : > { %v1314_v10 = vpop.xlane.xlu0 %1313  ;;  %v1425_v54 = vsel %vm3737_vm2, %v1362_v9, %v3743_v16 }
 0x2bf   : > { %v1457_v0 = vsel %vm1227_vm3, %v1266_v62, %v1425_v54  ;;  %v1264_v62 = vsel %vm1227_vm3, %v4020_v3, -1e+30 }
 0x2c2   : > { %1389 = vmax.xlane.f32.xlu1 %v1343_v11  ;;  %1293 = vmax.xlane.f32.xlu2 %v1247_v13  ;;  %v1497_v13 = vsub.f32 %v3746_v17, %v1465_v63 }
 0x2c3   : > { %1277 = vmax.xlane.f32.xlu0 %v1239_v19  ;;  %v1489_v19 = vsub.f32 %v3743_v16, %v1457_v0 }
 0x2c5   : > { %v3979_v29 = vpop.xlane.xlu1 %1315  ;;  %v1410_v31 = vpop.xlane.xlu2 %1409 }
 0x2c6   : > { %v1394_v32 = vpop.xlane.xlu0 %1393  ;;  %v1449_v60 = vsel %vm3737_vm2, %v1410_v31, %v3761_v25  ;;  %v1537_v31 = vmul.f32 1.442695, %v1497_v13 }
 0x2c7   : > { %v1441_v23 = vsel %vm3737_vm2, %v1394_v32, %v3758_v24  ;;  %v1481_v40 = vsel %vm1227_vm3, %v1314_v10, %v1449_v60 }
 0x2c8   : > { %v1473_v48 = vsel %vm1227_vm3, %v1298_v8, %v1441_v23  ;;  %3136 = vpow2.f32 %v1537_v31  ;;  %v1513_v55 = vsub.f32 %v3761_v25, %v1481_v40 }
 0x2c9   : > { %v1505_v57 = vsub.f32 %v3758_v24, %v1473_v48 }
 0x2ca   : > { %1309 = vmax.xlane.f32.xlu1 %v1255_v33  ;;  %1373 = vmax.xlane.f32.xlu2 %v1335_v36  ;;  %v1201_v33 = vpop.f32.mrf.mxu2  ;;  %v1521_v36 = vmul.f32 1.442695, %v1489_v19  ;;  %v1569_v63 = vmul.f32 1.442695, %v1513_v55 }
 0x2cb   : > { %1325 = vmax.xlane.f32.xlu0 %v1263_v35  ;;  %v1248_v35 = vsel %vm1227_vm3, %v4017_v1, -1e+30  ;;  %v1553_v0 = vmul.f32 1.442695, %v1505_v57 }
 0x2cc   : > { %3138 = vpow2.f32 %v1521_v36  ;;  %v1360_v36 = vsel %vm3737_vm2, %v4020_v3, -1e+30 }
 0x2cd   : > { %v3993_v42 = vpop.xlane.xlu1 %1395  ;;  %v3995_v46 = vpop.xlane.xlu2 %1379  ;;  %3140 = vpow2.f32 %v1569_v63 }
 0x2ce   : > { %v1268_v47 = vpop.xlane.xlu0 %1267  ;;  %v4068_v13 = vpop.eup %3136  ;;  %3142 = vpow2.f32 %v1553_v0  ;;  %v1434_v40 = vsel %vm3737_vm2, %v3995_v46, %v3785_v37 }
 0x2cf   : > { %v1593_v0 = vsel %vm1227_vm3, %v4068_v13, 0.0 }
 0x2d2   : > { %1279 = vmax.xlane.f32.xlu1 %v1240_v49  ;;  %1421 = vmax.xlane.f32.xlu2 %v1359_v53  ;;  %v4048_v49 = vadd.f32 %v3733_v22, %v1201_v33 }
 0x2d3   : > { %1405 = vmax.xlane.f32.xlu0 %v1351_v59  ;;  %v1336_v59 = vsel %vm3737_vm2, %v3991_v41, -1e+30 }
 0x2d4   : > { %6402 = vst [vmem:[#allocation27_spill] sm:$0xff] %v4048_v49  ;;  %v1352_v10 = vsel %vm3737_vm2, %v4048_v49, -1e+30  ;;  %v1256_v22 = vsel %vm1227_vm3, %v4048_v49, -1e+30 }
 0x2d5   : > { %v4022_v4 = vpop.xlane.xlu1 %1269  ;;  %v4024_v9 = vpop.xlane.xlu2 %1299 }
 0x2d6   : > { %v1284_v11 = vpop.xlane.xlu0 %1283 }
 0x2d7   : > { %v1466_v48 = vsel %vm1227_vm3, %v1284_v11, %v1434_v40 }
 0x2d8   : > { %v1498_v46 = vsub.f32 %v3785_v37, %v1466_v48 }
 0x2da   : > { %1327 = vmax.xlane.f32.xlu1 %v1264_v62  ;;  %1391 = vmax.xlane.f32.xlu2 %v1344_v20  ;;  %v4076_v20 = vpop.eup %3138 }
 0x2db   : > { %1295 = vmax.xlane.f32.xlu0 %v1248_v35  ;;  %v1689_v35 = vsel %vm3737_vm2, %v4068_v13, 0.0  ;;  %v1585_v31 = vsel %vm1227_vm3, %v4076_v20, 0.0  ;;  %v4097_v55 = vpop.eup %3140 }
 0x2dc   : > { %v1609_v11 = vsel %vm1227_vm3, %v4097_v55, 0.0 }
 0x2dd   : > { %v4050_v32 = vpop.xlane.xlu1 %1285  ;;  %v4052_v53 = vpop.xlane.xlu2 %1317 }
 0x2de   : > { %v1364_v54 = vpop.xlane.xlu0 %1363 }
 0x2df   : > { %v1426_v8 = vsel %vm3737_vm2, %v1364_v54, %v3791_v39 }
 0x2e0   : > { %v1458_v19 = vsel %vm1227_vm3, %v1268_v47, %v1426_v8  ;;  %v4106_v8 = vpop.eup %3142 }
 0x2e1   : > { %v1490_v33 = vsub.f32 %v3791_v39, %v1458_v19  ;;  %v1539_v19 = vmul.f32 1.442695, %v1498_v46 }
 0x2e2   : > { %1407 = vmax.xlane.f32.xlu1 %v1352_v10  ;;  %1311 = vmax.xlane.f32.xlu2 %v1256_v22 }
 0x2e3   : > { %1375 = vmax.xlane.f32.xlu0 %v1336_v59  ;;  %v1523_v54 = vmul.f32 1.442695, %v1490_v33 }
 0x2e5   : > { %v4072_v60 = vpop.xlane.xlu1 %1365  ;;  %v4074_v62 = vpop.xlane.xlu2 %1397  ;;  %3144 = vpow2.f32 %v1523_v54 }
 0x2e6   : > { %v1412_v23 = vpop.xlane.xlu0 %1411  ;;  %3146 = vpow2.f32 %v1539_v19 }
 0x2e7   : > { %v1450_v47 = vsel %vm3737_vm2, %v1412_v23, %v3773_v30  ;;  %v1442_v23 = vsel %vm3737_vm2, %v3993_v42, %v3788_v38  ;;  %v1697_v42 = vsel %vm3737_vm2, %v4106_v8, 0.0 }
 0x2e8   : > { %v1482_v57 = vsel %vm1227_vm3, %v3979_v29, %v1450_v47  ;;  %v1601_v29 = vsel %vm1227_vm3, %v4106_v8, 0.0 }
 0x2e9   : > { %v1514_v63 = vsub.f32 %v3773_v30, %v1482_v57  ;;  %v1681_v57 = vsel %vm3737_vm2, %v4076_v20, 0.0 }
 0x2ea   : > { %1729 = vadd.xlane.f32.xlu2 %v1689_v35  ;;  %1617 = vadd.xlane.f32.xlu1 %v1585_v31  ;;  %v1474_v35 = vsel %vm1227_vm3, %v4024_v9, %v1442_v23 }
 0x2eb   : > { %1423 = vmax.xlane.f32.xlu0 %v1360_v36  ;;  %v1571_v33 = vmul.f32 1.442695, %v1514_v63  ;;  %v4130_v36 = vpop.eup %3144  ;;  %v1506_v48 = vsub.f32 %v3788_v38, %v1474_v35 }
 0x2ec   : > { %v1586_v54 = vsel %vm1227_vm3, %v4130_v36, 0.0  ;;  %v4145_v63 = vpop.eup %3146 }
 0x2ed   : > { %v4102_v10 = vpop.xlane.xlu1 %1413  ;;  %v4104_v22 = vpop.xlane.xlu2 %1287  ;;  %3148 = vpow2.f32 %v1571_v33  ;;  %v1555_v46 = vmul.f32 1.442695, %v1506_v48  ;;  %v1594_v33 = vsel %vm1227_vm3, %v4145_v63, 0.0  ;;  %v1705_v48 = vsel %vm3737_vm2, %v4097_v55, 0.0 }
 0x2ee   : > { %v1382_v59 = vpop.xlane.xlu0 %1381 }
 0x2ef   : > { %v1435_v9 = vsel %vm3737_vm2, %v1382_v59, %v3815_v50  ;;  %3150 = vpow2.f32 %v1555_v46 }
 0x2f2   : > { %1665 = vadd.xlane.f32.xlu1 %v1609_v11  ;;  %1649 = vadd.xlane.f32.xlu2 %v1601_v29  ;;  %v1467_v11 = vsel %vm1227_vm3, %v4050_v32, %v1435_v9  ;;  %v1427_v32 = vsel %vm3737_vm2, %v4072_v60, %v3803_v44 }
 0x2f3   : > { %1633 = vadd.xlane.f32.xlu0 %v1593_v0  ;;  %v4152_v19 = vpop.eup %3148  ;;  %v1499_v23 = vsub.f32 %v3815_v50, %v1467_v11 }
 0x2f4   : > { %v1610_v35 = vsel %vm1227_vm3, %v4152_v19, 0.0 }
 0x2f5   : > { %v4126_v31 = vpop.xlane.xlu1 %1271  ;;  %v4128_v47 = vpop.xlane.xlu2 %1367 }
 0x2f6   : > { %v1302_v40 = vpop.xlane.xlu0 %1301  ;;  %v4175_v46 = vpop.eup %3150 }
 0x2fa   : > { %1745 = vadd.xlane.f32.xlu1 %v1697_v42  ;;  %1619 = vadd.xlane.f32.xlu2 %v1586_v54  ;;  %v1541_v42 = vmul.f32 1.442695, %v1499_v23  ;;  %v1459_v54 = vsel %vm1227_vm3, %v4022_v4, %v1427_v32  ;;  %v1682_v23 = vsel %vm3737_vm2, %v4130_v36, 0.0  ;;  %v1698_v4 = vsel %vm3737_vm2, %v4175_v46, 0.0 }
 0x2fb   : > { %1713 = vadd.xlane.f32.xlu0 %v1681_v57  ;;  %v1491_v60 = vsub.f32 %v3803_v44, %v1459_v54 }
 0x2fc   : > { %3152 = vpow2.f32 %v1541_v42 }
 0x2fd   : > { %v1384_v29 = vpop.xlane.xlu1 %1383  ;;  %v4150_v0 = vpop.xlane.xlu2 %1415  ;;  %v1525_v32 = vmul.f32 1.442695, %v1491_v60 }
 0x2fe   : > { %v4154_v59 = vpop.xlane.xlu0 %1319 }
 0x2ff   : > { %3154 = vpow2.f32 %v1525_v32  ;;  %v1602_v32 = vsel %vm1227_vm3, %v4175_v46, 0.0 }
 0x302   : > { %1635 = vadd.xlane.f32.xlu1 %v1594_v33  ;;  %1667 = vadd.xlane.f32.xlu2 %v1610_v35  ;;  %v1451_v33 = vsel %vm3737_vm2, %v4102_v10, %v3818_v51  ;;  %v1690_v35 = vsel %vm3737_vm2, %v4145_v63, 0.0  ;;  %v1443_v10 = vsel %vm3737_vm2, %v4074_v62, %v3830_v56 }
 0x303   : > { %1761 = vadd.xlane.f32.xlu0 %v1705_v48  ;;  %v1483_v48 = vsel %vm1227_vm3, %v4052_v53, %v1451_v33  ;;  %v1475_v42 = vsel %vm1227_vm3, %v1302_v40, %v1443_v10  ;;  %v1428_v53 = vsel %vm3737_vm2, %v4128_v47, %v3854_v2  ;;  %v1706_v40 = vsel %vm3737_vm2, %v4152_v19, 0.0 }
 0x304   : > { %v1515_v60 = vsub.f32 %v3818_v51, %v1483_v48  ;;  %v1507_v62 = vsub.f32 %v3830_v56, %v1475_v42  ;;  %v1460_v47 = vsel %vm1227_vm3, %v4126_v31, %v1428_v53  ;;  %v1452_v31 = vsel %vm3737_vm2, %v4150_v0, %v3866_v7 }
 0x305   : > { %v1304_v9 = vpop.xlane.xlu1 %1303  ;;  %v4173_v57 = vpop.xlane.xlu2 %1273 }
 0x306   : > { %v1400_v11 = vpop.xlane.xlu0 %1399  ;;  %v1573_v10 = vmul.f32 1.442695, %v1515_v60  ;;  %v1557_v48 = vmul.f32 1.442695, %v1507_v62  ;;  %v1492_v60 = vsub.f32 %v3854_v2, %v1460_v47 }
 0x307   : > { %v1444_v53 = vsel %vm3737_vm2, %v1400_v11, %v3881_v18 }
 0x308   : > { %3156 = vpow2.f32 %v1573_v10  ;;  %v1476_v47 = vsel %vm1227_vm3, %v1304_v9, %v1444_v53 }
 0x309   : > { %3158 = vpow2.f32 %v1557_v48 }
 0x30a   : > { %1715 = vadd.xlane.f32.xlu1 %v1682_v23  ;;  %1747 = vadd.xlane.f32.xlu2 %v1698_v4  ;;  %v4204_v23 = vpop.eup %3152 }
 0x30b   : > { %1731 = vadd.xlane.f32.xlu0 %v1690_v35  ;;  %v1595_v33 = vsel %vm1227_vm3, %v4204_v23, 0.0  ;;  %v1436_v35 = vsel %vm3737_vm2, %v1384_v29, %v3842_v61  ;;  %v4236_v51 = vpop.eup %3154 }
 0x30c   : > { %v1468_v42 = vsel %vm1227_vm3, %v4104_v22, %v1436_v35  ;;  %6403 = vst [vmem:[#allocation28_spill] sm:$0xff] %v4236_v51  ;;  %v1691_v22 = vsel %vm3737_vm2, %v4204_v23, 0.0  ;;  %v1683_v62 = vsel %vm3737_vm2, %v4236_v51, 0.0  ;;  %v1527_v35 = vmul.f32 1.442695, %v1492_v60 }
 0x30d   : > { %v4200_v54 = vpop.xlane.xlu1 %1321  ;;  %v4202_v44 = vpop.xlane.xlu2 %1385 }
 0x30e   : > { %v4206_v4 = vpop.xlane.xlu0 %1289  ;;  %v4259_v10 = vpop.eup %3156  ;;  %3160 = vpow2.f32 %v1527_v35 }
 0x30f   : > { %6404 = vst [vmem:[#allocation29_spill] sm:$0xff] %v4259_v10 }
 0x312   : > { %1763 = vadd.xlane.f32.xlu1 %v1706_v40  ;;  %1637 = vadd.xlane.f32.xlu2 %v1595_v33  ;;  %v1500_v40 = vsub.f32 %v3842_v61, %v1468_v42  ;;  %v1587_v33 = vsel %vm1227_vm3, %v4236_v51, 0.0  ;;  %v4267_v42 = vpop.eup %3158 }
 0x313   : > { %1651 = vadd.xlane.f32.xlu0 %v1602_v32  ;;  %v1484_v32 = vsel %vm1227_vm3, %v4154_v59, %v1452_v31  ;;  %6405 = vst [vmem:[#allocation30_spill] sm:$0xff] %v4267_v42  ;;  %v1707_v59 = vsel %vm3737_vm2, %v4259_v10, 0.0  ;;  %v1603_v9 = vsel %vm1227_vm3, %v4267_v42, 0.0 }
 0x314   : > { %v1543_v0 = vmul.f32 1.442695, %v1500_v40  ;;  %v1516_v60 = vsub.f32 %v3866_v7, %v1484_v32  ;;  %v1508_v40 = vsub.f32 %v3881_v18, %v1476_v47  ;;  %v4283_v35 = vpop.eup %3160 }
 0x315   : > { %v4232_v56 = vpop.xlane.xlu1 %1401  ;;  %v4234_v29 = vpop.xlane.xlu2 %1305  ;;  %6406 = vst [vmem:[#allocation31_spill] sm:$0xff] %v4283_v35 }
 0x316   : > { %v1370_v50 = vpop.xlane.xlu0 %1369  ;;  %3162 = vpow2.f32 %v1543_v0  ;;  %v1575_v53 = vmul.f32 1.442695, %v1516_v60  ;;  %v1437_v60 = vsel %vm3737_vm2, %v4202_v44, %v3893_v27 }
 0x317   : > { %v1429_v31 = vsel %vm3737_vm2, %v1370_v50, %v3878_v14  ;;  %v1469_v44 = vsel %vm1227_vm3, %v4206_v4, %v1437_v60  ;;  %v1445_v60 = vsel %vm3737_vm2, %v4232_v56, %v3908_v34 }
 0x318   : > { %v1461_v0 = vsel %vm1227_vm3, %v4173_v57, %v1429_v31  ;;  %3164 = vpow2.f32 %v1575_v53  ;;  %v1699_v31 = vsel %vm3737_vm2, %v4267_v42, 0.0 }
 0x31a   : > { %1733 = vadd.xlane.f32.xlu1 %v1691_v22  ;;  %1717 = vadd.xlane.f32.xlu2 %v1683_v62  ;;  %v1611_v62 = vsel %vm1227_vm3, %v4259_v10, 0.0 }
 0x31b   : > { %1621 = vadd.xlane.f32.xlu0 %v1587_v33  ;;  %v1559_v33 = vmul.f32 1.442695, %v1508_v40  ;;  %v1588_v40 = vsel %vm1227_vm3, %v4283_v35, 0.0 }
 0x31c   : > { %v4292_v50 = vpop.eup %3162 }
 0x31d   : > { %v4263_v48 = vpop.xlane.xlu1 %1291  ;;  %v4265_v11 = vpop.xlane.xlu2 %1275  ;;  %6407 = vst [vmem:[#allocation32_spill] sm:$0xff] %v4292_v50  ;;  %3166 = vpow2.f32 %v1559_v33  ;;  %v1692_v57 = vsel %vm3737_vm2, %v4292_v50, 0.0 }
 0x31e   : > { %v1418_v22 = vpop.xlane.xlu0 %1417  ;;  %v4314_v53 = vpop.eup %3164 }
 0x31f   : > { %6408 = vst [vmem:[#allocation33_spill] sm:$0xff] %v4314_v53 }
 0x322   : > { %1765 = vadd.xlane.f32.xlu2 %v1707_v59  ;;  %1653 = vadd.xlane.f32.xlu1 %v1603_v9  ;;  %v1493_v59 = vsub.f32 %v3878_v14, %v1461_v0  ;;  %v1453_v9 = vsel %vm3737_vm2, %v1418_v22, %v3896_v28 }
 0x323   : > { %1669 = vadd.xlane.f32.xlu0 %v1611_v62  ;;  %v1485_v33 = vsel %vm1227_vm3, %v4200_v54, %v1453_v9  ;;  %v1596_v9 = vsel %vm1227_vm3, %v4292_v50, 0.0 }
 0x324   : > { %v1529_v62 = vmul.f32 1.442695, %v1493_v59  ;;  %v1517_v4 = vsub.f32 %v3896_v28, %v1485_v33  ;;  %v1612_v59 = vsel %vm1227_vm3, %v4314_v53, 0.0 }
 0x325   : > { %v4288_v32 = vpop.xlane.xlu1 %1371  ;;  %v4290_v47 = vpop.xlane.xlu2 %1323 }
 0x326   : > { %v1388_v7 = vpop.xlane.xlu0 %1387  ;;  %3168 = vpow2.f32 %v1529_v62  ;;  %v1477_v62 = vsel %vm1227_vm3, %v4234_v29, %v1445_v60 }
 0x327   : > { %v1509_v56 = vsub.f32 %v3908_v34, %v1477_v62  ;;  %v1438_v29 = vsel %vm3737_vm2, %v1388_v7, %v3923_v45 }
 0x32a   : > { %1735 = vadd.xlane.f32.xlu2 %v1692_v57  ;;  %1623 = vadd.xlane.f32.xlu1 %v1588_v40  ;;  %v4323_v57 = vpop.eup %3166  ;;  %v1501_v40 = vsub.f32 %v3893_v27, %v1469_v44  ;;  %v1577_v44 = vmul.f32 1.442695, %v1517_v4  ;;  %v1684_v4 = vsel %vm3737_vm2, %v4283_v35, 0.0 }
 0x32b   : > { %1749 = vadd.xlane.f32.xlu0 %v1699_v31  ;;  %6409 = vst [vmem:[#allocation34_spill] sm:$0xff] %v4323_v57  ;;  %v1604_v54 = vsel %vm1227_vm3, %v4323_v57, 0.0 }
 0x32c   : > { %v1545_v31 = vmul.f32 1.442695, %v1501_v40  ;;  %v4345_v27 = vpop.eup %3168 }
 0x32d   : > { %v4319_v0 = vpop.xlane.xlu1 %1419  ;;  %v4321_v22 = vpop.xlane.xlu2 %1403  ;;  %6410 = vst [vmem:[#allocation35_spill] sm:$0xff] %v4345_v27  ;;  %v1589_v40 = vsel %vm1227_vm3, %v4345_v27, 0.0 }
 0x32e   : > { %v4325_v14 = vpop.xlane.xlu0 %1307  ;;  %3170 = vpow2.f32 %v1545_v31 }
 0x32f   : > { %3172 = vpow2.f32 %v1577_v44 }
 0x332   : > { %1671 = vadd.xlane.f32.xlu1 %v1612_v59  ;;  %1655 = vadd.xlane.f32.xlu2 %v1604_v54  ;;  %v1700_v59 = vsel %vm3737_vm2, %v4323_v57, 0.0  ;;  %v1561_v54 = vmul.f32 1.442695, %v1509_v56 }
 0x333   : > { %1639 = vadd.xlane.f32.xlu0 %v1596_v9  ;;  %v1470_v9 = vsel %vm1227_vm3, %v4263_v48, %v1438_v29 }
 0x334   : > { %v4360_v60 = vpop.eup %3170  ;;  %3174 = vpow2.f32 %v1561_v54  ;;  %v1502_v7 = vsub.f32 %v3923_v45, %v1470_v9 }
 0x335   : > { %v1390_v33 = vpop.xlane.xlu1 %1389  ;;  %v1294_v28 = vpop.xlane.xlu2 %1293  ;;  %6411 = vst [vmem:[#allocation36_spill] sm:$0xff] %v4360_v60  ;;  %v1597_v56 = vsel %vm1227_vm3, %v4360_v60, 0.0 }
 0x336   : > { %v1278_v2 = vpop.xlane.xlu0 %1277  ;;  %v4365_v62 = vpop.eup %3172 }
 0x337   : > { %6412 = vst [vmem:[#allocation37_spill] sm:$0xff] %v4365_v62  ;;  %v1613_v48 = vsel %vm1227_vm3, %v4365_v62, 0.0 }
 0x33a   : > { %1751 = vadd.xlane.f32.xlu1 %v1700_v59  ;;  %1625 = vadd.xlane.f32.xlu2 %v1589_v40  ;;  %v1430_v59 = vsel %vm3737_vm2, %v4288_v32, %v3920_v43  ;;  %v1708_v40 = vsel %vm3737_vm2, %v4314_v53, 0.0  ;;  %v1547_v32 = vmul.f32 1.442695, %v1502_v7  ;;  %v4384_v9 = vpop.eup %3174 }
 0x33b   : > { %1719 = vadd.xlane.f32.xlu0 %v1684_v4  ;;  %v1462_v29 = vsel %vm1227_vm3, %v4265_v11, %v1430_v59  ;;  %6413 = vst [vmem:[#allocation38_spill] sm:$0xff] %v4384_v9  ;;  %v1685_v11 = vsel %vm3737_vm2, %v4345_v27, 0.0  ;;  %v1701_v7 = vsel %vm3737_vm2, %v4384_v9, 0.0  ;;  %v1439_v59 = vsel %vm3737_vm2, %v1390_v33, %v3959_v5 }
 0x33c   : > { %v1494_v35 = vsub.f32 %v3920_v43, %v1462_v29  ;;  %3176 = vpow2.f32 %v1547_v32  ;;  %v1471_v32 = vsel %vm1227_vm3, %v1294_v28, %v1439_v59  ;;  %v1709_v28 = vsel %vm3737_vm2, %v4365_v62, 0.0 }
 0x33d   : > { %v1310_v31 = vpop.xlane.xlu1 %1309  ;;  %v1374_v44 = vpop.xlane.xlu2 %1373 }
 0x33e   : > { %v1326_v34 = vpop.xlane.xlu0 %1325 }
 0x342   : > { %1641 = vadd.xlane.f32.xlu1 %v1597_v56  ;;  %1673 = vadd.xlane.f32.xlu2 %v1613_v48  ;;  %v1454_v56 = vsel %vm3737_vm2, %v4319_v0, %v3935_v52  ;;  %v1446_v48 = vsel %vm3737_vm2, %v4321_v22, %v3947_v58  ;;  %v1693_v0 = vsel %vm3737_vm2, %v4360_v60, 0.0  ;;  %v4417_v27 = vpop.eup %3176 }
 0x343   : > { %1767 = vadd.xlane.f32.xlu0 %v1708_v40  ;;  %v1531_v40 = vmul.f32 1.442695, %v1494_v35  ;;  %v1486_v22 = vsel %vm1227_vm3, %v4290_v47, %v1454_v56  ;;  %v1478_v29 = vsel %vm1227_vm3, %v4325_v14, %v1446_v48  ;;  %6414 = vst [vmem:[#allocation39_spill] sm:$0xff] %v4417_v27  ;;  %v1431_v47 = vsel %vm3737_vm2, %v1374_v44, %v3962_v6 }
 0x344   : > { %v1503_v14 = vsub.f32 %v3959_v5, %v1471_v32  ;;  %v1598_v56 = vsel %vm1227_vm3, %v4417_v27, 0.0  ;;  %v1463_v59 = vsel %vm1227_vm3, %v1278_v2, %v1431_v47  ;;  %v1605_v44 = vsel %vm1227_vm3, %v4384_v9, 0.0 }
 0x345   : > { %v1280_v4 = vpop.xlane.xlu1 %1279  ;;  %v1422_v54 = vpop.xlane.xlu2 %1421  ;;  %3178 = vpow2.f32 %v1531_v40 }
 0x346   : > { %v1406_v45 = vpop.xlane.xlu0 %1405 }
 0x34a   : > { %1721 = vadd.xlane.f32.xlu1 %v1685_v11  ;;  %1753 = vadd.xlane.f32.xlu2 %v1701_v7  ;;  %v1518_v11 = vsub.f32 %v3935_v52, %v1486_v22  ;;  %v1510_v7 = vsub.f32 %v3947_v58, %v1478_v29  ;;  %v1455_v22 = vsel %vm3737_vm2, %v1422_v54, %v3977_v26  ;;  %v1549_v29 = vmul.f32 1.442695, %v1503_v14 }
 0x34b   : > { %1737 = vadd.xlane.f32.xlu0 %v1693_v0  ;;  %v1447_v0 = vsel %vm3737_vm2, %v1406_v45, %v3974_v21  ;;  %v4445_v32 = vpop.eup %3178  ;;  %v1495_v45 = vsub.f32 %v3962_v6, %v1463_v59 }
 0x34c   : > { %v1579_v48 = vmul.f32 1.442695, %v1518_v11  ;;  %v1563_v40 = vmul.f32 1.442695, %v1510_v7  ;;  %6415 = vst [vmem:[#allocation40_spill] sm:$0xff] %v4445_v32  ;;  %v1479_v11 = vsel %vm1227_vm3, %v1310_v31, %v1447_v0  ;;  %v1487_v7 = vsel %vm1227_vm3, %v1326_v34, %v1455_v22 }
 0x34d   : > { %v4415_v33 = vpop.xlane.xlu1 %1327  ;;  %v1392_v43 = vpop.xlane.xlu2 %1391  ;;  %v1511_v31 = vsub.f32 %v3974_v21, %v1479_v11  ;;  %v1686_v34 = vsel %vm3737_vm2, %v4445_v32, 0.0  ;;  %v1519_v59 = vsub.f32 %v3977_v26, %v1487_v7  ;;  %v1590_v22 = vsel %vm1227_vm3, %v4445_v32, 0.0 }
 0x34e   : > { %v1296_v35 = vpop.xlane.xlu0 %1295  ;;  %v1440_v2 = vsel %vm3737_vm2, %v1392_v43, %v4017_v1  ;;  %3180 = vpow2.f32 %v1579_v48  ;;  %v1533_v48 = vmul.f32 1.442695, %v1495_v45 }
 0x34f   : > { %3182 = vpow2.f32 %v1563_v40  ;;  %v1472_v43 = vsel %vm1227_vm3, %v1296_v35, %v1440_v2  ;;  %v1694_v35 = vsel %vm3737_vm2, %v4417_v27, 0.0  ;;  %v1565_v2 = vmul.f32 1.442695, %v1511_v31 }
 0x350   : > { %3184 = vpow2.f32 %v1549_v29 }
 0x351   : > { %3186 = vpow2.f32 %v1533_v48 }
 0x352   : > { %1769 = vadd.xlane.f32.xlu1 %v1709_v28  ;;  %1643 = vadd.xlane.f32.xlu2 %v1598_v56 }
 0x353   : > { %1657 = vadd.xlane.f32.xlu0 %v1605_v44  ;;  %v1504_v44 = vsub.f32 %v4017_v1, %v1472_v43 }
 0x354   : > { %v4476_v29 = vpop.eup %3180 }
 0x355   : > { %v1408_v47 = vpop.xlane.xlu1 %1407  ;;  %v1312_v28 = vpop.xlane.xlu2 %1311 }
 0x356   : > { %v1448_v54 = vsel %vm3737_vm2, %v1408_v47, %v4048_v49  ;;  %v1376_v14 = vpop.xlane.xlu0 %1375  ;;  %v4479_v11 = vpop.eup %3182  ;;  %v1581_v47 = vmul.f32 1.442695, %v1519_v59 }
 0x357   : > { %v1432_v56 = vsel %vm3737_vm2, %v1376_v14, %v3991_v41  ;;  %v1480_v0 = vsel %vm1227_vm3, %v1312_v28, %v1448_v54  ;;  %6416 = vst [vmem:[#allocation41_spill] sm:$0xff] %v4479_v11  ;;  %v4486_v54 = vpop.eup %3184  ;;  %v1551_v14 = vmul.f32 1.442695, %v1504_v44  ;;  %v1606_v59 = vsel %vm1227_vm3, %v4479_v11, 0.0 }
 0x358   : > { %v1464_v40 = vsel %vm1227_vm3, %v1280_v4, %v1432_v56  ;;  %v1512_v45 = vsub.f32 %v4048_v49, %v1480_v0  ;;  %6417 = vst [vmem:[#allocation42_spill] sm:$0xff] %v4486_v54  ;;  %v1695_v48 = vsel %vm3737_vm2, %v4486_v54, 0.0  ;;  %v4505_v44 = vpop.eup %3186 }
 0x359   : > { %v1496_v28 = vsub.f32 %v3991_v41, %v1464_v40 }
 0x35a   : > { %1739 = vadd.xlane.f32.xlu1 %v1694_v35  ;;  %1723 = vadd.xlane.f32.xlu2 %v1686_v34  ;;  %v1567_v56 = vmul.f32 1.442695, %v1512_v45  ;;  %v1614_v35 = vsel %vm1227_vm3, %v4476_v29, 0.0 }
 0x35b   : > { %1627 = vadd.xlane.f32.xlu0 %v1590_v22  ;;  %v1535_v34 = vmul.f32 1.442695, %v1496_v28 }
 0x35d   : > { %v4482_v7 = vpop.xlane.xlu2 %1729  ;;  %v4484_v4 = vpop.xlane.xlu1 %1617 }
 0x35e   : > { %3188 = vrcp.f32 %v4482_v7  ;;  %v1424_v43 = vpop.xlane.xlu0 %1423  ;;  %vm2342_vm4 = vweird.f32 %v4482_v7  ;;  %v1786_v21 = vand.u32 2147483647, %v4484_v4  ;;  %vm1782_vm6 = vweird.f32 %v4484_v4 }
 0x35f   : > { %3190 = vrcp.f32 %v4484_v4  ;;  %v1456_v31 = vsel %vm3737_vm2, %v1424_v43, %v4020_v3  ;;  %v1702_v43 = vsel %vm3737_vm2, %v4479_v11, 0.0 }
 0x360   : > { %3192 = vpow2.f32 %v1565_v2  ;;  %v1488_v0 = vsel %vm1227_vm3, %v4415_v33, %v1456_v31  ;;  %v2348_v31 = vand.u32 2147483648, %v4482_v7  ;;  %vm4606_vm8 = vcmp.eq.f32.partialorder %v1786_v21, 8.507059e+37 }
 0x361   : > { %3194 = vpow2.f32 %v1581_v47  ;;  %v1520_v33 = vsub.f32 %v4020_v3, %v1488_v0  ;;  %v1591_v0 = vsel %vm1227_vm3, %v4505_v44, 0.0  ;;  %v2346_v3 = vand.u32 2147483647, %v4482_v7 }
 0x362   : > { %3196 = vpow2.f32 %v1551_v14  ;;  %1741 = vadd.xlane.f32.xlu2 %v1695_v48  ;;  %1659 = vadd.xlane.f32.xlu1 %v1606_v59 }
 0x363   : > { %1675 = vadd.xlane.f32.xlu0 %v1614_v35  ;;  %3198 = vpow2.f32 %v1567_v56  ;;  %v4528_v56 = vsel %vm1227_vm3, %v4486_v54, 0.0  ;;  %v1583_v41 = vmul.f32 1.442695, %v1520_v33  ;;  %vm4578_vm5 = vcmp.eq.f32.partialorder %v2346_v3, 8.507059e+37 }
 0x364   : > { %v4507_v40 = vpop.eup %3188  ;;  %3200 = vpow2.f32 %v1535_v34  ;;  %v2349_v33 = vor.u32 1.1754944e-38, %v2348_v31 }
 0x365   : > { %v4509_v22 = vpop.eup %3190  ;;  %v2338_v2 = vmul.f32 %v4507_v40, %v4482_v7  ;;  %v4514_v45 = vpop.xlane.xlu1 %1665  ;;  %vm2343_vm7 = vweird.f32 %v4507_v40 }
 0x366   : > { %v4516_v47 = vpop.xlane.xlu2 %1649  ;;  %v4518_v28 = vpop.eup %3192  ;;  %v1778_v14 = vmul.f32 %v4509_v22, %v4484_v4  ;;  %3202 = vrcp.f32 %v4514_v45  ;;  %v2124_v11 = vand.u32 2147483648, %v4514_v45  ;;  %vm4623_vm9 = vmor %vm2342_vm4, %vm2343_vm7  ;;  %vm1783_vm10 = vweird.f32 %v4509_v22 }
 0x367   : > { %v4533_v34 = vpop.eup %3194  ;;  %v2339_v48 = vsub.f32 1.0, %v2338_v2  ;;  %v4536_v59 = vpop.xlane.xlu0 %1633  ;;  %v1788_v2 = vand.u32 2147483648, %v4484_v4  ;;  %3204 = vrcp.f32 %v4516_v47  ;;  %v1607_v1 = vsel %vm1227_vm3, %v4518_v28, 0.0  ;;  %vm4660_vm13 = vmor %vm1782_vm6, %vm1783_vm10 }
 0x368   : > { %v4544_v26 = vpop.eup %3196  ;;  %v1779_v52 = vsub.f32 1.0, %v1778_v14  ;;  %3206 = vrcp.f32 %v4536_v59  ;;  %v1615_v35 = vsel %vm1227_vm3, %v4533_v34, 0.0  ;;  %v2012_v32 = vand.u32 2147483648, %v4516_v47  ;;  %vm4719_vm10 = vmor %vm1227_vm3, %vm3737_vm2 }
 0x369   : > { %v2340_v49 = vmul.f32 %v4507_v40, %v2339_v48  ;;  %v4554_v6 = vpop.eup %3198  ;;  %v4583_v5 = vor.u32 1.1754944e-38, %v1788_v2  ;;  %3208 = vpow2.f32 %v1583_v41  ;;  %v1898_v27 = vand.u32 2147483647, %v4536_v59 }
 0x36a   : > { %1629 = vadd.xlane.f32.xlu1 %v1591_v0  ;;  %1661 = vadd.xlane.f32.xlu2 %v1607_v1  ;;  %v4566_v14 = vpop.eup %3200  ;;  %v4576_v0 = vsel %vm1227_vm3, %v4544_v26, 0.0  ;;  %v1780_v1 = vmul.f32 %v4509_v22, %v1779_v52  ;;  %v1900_v53 = vand.u32 2147483648, %v4536_v59  ;;  %v2122_v7 = vand.u32 2147483647, %v4514_v45 }
 0x36b   : > { %1755 = vadd.xlane.f32.xlu0 %v1702_v43  ;;  %v2341_v43 = vadd.f32 %v4507_v40, %v2340_v49  ;;  %v1592_v31 = vsel %vm1227_vm3, %v4566_v14, 0.0  ;;  %v4604_v49 = vsel %vm1227_vm3, %v4554_v6, 0.0  ;;  %v4640_v50 = vor.u32 1.1754944e-38, %v2124_v11 }
 0x36c   : > { %v4585_v54 = vpop.eup %3202  ;;  %v1781_v18 = vadd.f32 %v4509_v22, %v1780_v1  ;;  %v2010_v10 = vand.u32 2147483647, %v4516_v47  ;;  %vm1894_vm11 = vweird.f32 %v4536_v59  ;;  %vm4649_vm12 = vcmp.eq.f32.partialorder %v1898_v27, 8.507059e+37 }
 0x36d   : > { %v4590_v58 = vpop.xlane.xlu1 %1745  ;;  %v4592_v3 = vpop.eup %3204  ;;  %v2114_v60 = vmul.f32 %v4585_v54, %v4514_v45  ;;  %v2345_v2 = vsel %vm4623_vm9, %v4507_v40, %v2341_v43  ;;  %v4646_v40 = vor.u32 1.1754944e-38, %v2012_v32  ;;  %vm2006_vm14 = vweird.f32 %v4516_v47 }
 0x36e   : > { %v2002_v41 = vmul.f32 %v4592_v3, %v4516_v47  ;;  %v4614_v9 = vpop.xlane.xlu2 %1619  ;;  %v3207_v62 = vpop.eup %3206  ;;  %3210 = vrcp.f32 %v4590_v58  ;;  %v2350_v11 = vsel %vm4578_vm5, %v2349_v33, %v2345_v2  ;;  %v1901_v27 = vor.u32 1.1754944e-38, %v1900_v53 }
 0x36f   : > { %v1890_v57 = vmul.f32 %v3207_v62, %v4536_v59  ;;  %v4638_v61 = vpop.xlane.xlu0 %1713  ;;  %3212 = vrcp.f32 %v4614_v9  ;;  %v4644_v51 = vpop.eup %3208  ;;  %v1785_v32 = vsel %vm4660_vm13, %v4509_v22, %v1781_v18  ;;  %vm1895_vm15 = vweird.f32 %v3207_v62 }
 0x370   : > { %v2003_v42 = vsub.f32 1.0, %v2002_v41  ;;  %3214 = vrcp.f32 %v4638_v61  ;;  %v2458_v48 = vand.u32 2147483647, %v4590_v58  ;;  %v1616_v53 = vsel %vm1227_vm3, %v4644_v51, 0.0  ;;  %vm1896_vm6 = vmor %vm1894_vm11, %vm1895_vm15 }
 0x371   : > { %v1891_v1 = vsub.f32 1.0, %v1890_v57  ;;  %v2115_v57 = vsub.f32 1.0, %v2114_v60  ;;  %v2460_v60 = vand.u32 2147483648, %v4590_v58  ;;  %v2681_v18 = vsel %vm3737_vm2, %v2350_v11, 1.0 }
 0x372   : > { %1677 = vadd.xlane.f32.xlu1 %v1615_v35  ;;  %1631 = vadd.xlane.f32.xlu2 %v1592_v31  ;;  %v2004_v31 = vmul.f32 %v4592_v3, %v2003_v42  ;;  %vm2119_vm0 = vweird.f32 %v4585_v54  ;;  %v4687_v42 = vsel %vm4606_vm8, %v4583_v5, %v1785_v32  ;;  %vm2118_vm1 = vweird.f32 %v4514_v45 }
 0x373   : > { %1645 = vadd.xlane.f32.xlu0 %v4528_v56  ;;  %v1892_v56 = vmul.f32 %v3207_v62, %v1891_v1  ;;  %v2116_v21 = vmul.f32 %v4585_v54, %v2115_v57  ;;  %vm2007_vm4 = vweird.f32 %v4592_v3  ;;  %vm4692_vm5 = vcmp.eq.f32.partialorder %v2010_v10, 8.507059e+37 }
 0x374   : > { %v3211_v4 = vpop.eup %3210  ;;  %vm2454_vm7 = vweird.f32 %v4590_v58  ;;  %vm4700_vm8 = vcmp.eq.f32.partialorder %v2458_v48, 8.507059e+37  ;;  %v2005_v10 = vadd.f32 %v4592_v3, %v2004_v31  ;;  %v2461_v59 = vor.u32 1.1754944e-38, %v2460_v60  ;;  %vm4745_vm11 = vmor %vm2006_vm14, %vm2007_vm4 }
 0x375   : > { %v4670_v33 = vpop.xlane.xlu1 %1635  ;;  %v1893_v22 = vadd.f32 %v3207_v62, %v1892_v56  ;;  %v2450_v2 = vmul.f32 %v3211_v4, %v4590_v58  ;;  %v4682_v41 = vpop.eup %3212  ;;  %vm2455_vm9 = vweird.f32 %v3211_v4  ;;  %vm4768_vm15 = vcmp.eq.f32.partialorder %v2122_v7, 8.507059e+37 }
 0x376   : > { %3216 = vrcp.f32 %v4670_v33  ;;  %v1792_v35 = vmul.f32 %v4682_v41, %v4614_v9  ;;  %v4706_v57 = vpop.eup %3214  ;;  %v4727_v60 = vpop.xlane.xlu2 %1667  ;;  %vm2456_vm13 = vmor %vm2454_vm7, %vm2455_vm9  ;;  %vm2230_vm4 = vweird.f32 %v4638_v61 }
 0x377   : > { %v1897_v11 = vsel %vm1896_vm6, %v3207_v62, %v1893_v22  ;;  %v2451_v52 = vsub.f32 1.0, %v2450_v2  ;;  %v6432_v62 = vsel %vm3737_vm2, %v4518_v28, 0.0  ;;  %v2226_v31 = vmul.f32 %v4706_v57, %v4638_v61  ;;  %vm4786_vm6 = vmor %vm2118_vm1, %vm2119_vm0 }
 0x378   : > { %v1902_v32 = vsel %vm4649_vm12, %v1901_v27, %v1897_v11  ;;  %v1793_v48 = vsub.f32 1.0, %v1792_v35  ;;  %v4736_v2 = vadd.f32 %v4585_v54, %v2116_v21  ;;  %vm1796_vm12 = vweird.f32 %v4614_v9 }
 0x379   : > { %v2713_v43 = vsel %vm1227_vm3, %v1902_v32, %v2681_v18  ;;  %v2452_v27 = vmul.f32 %v3211_v4, %v2451_v52  ;;  %v1800_v18 = vand.u32 2147483647, %v4614_v9  ;;  %v2234_v52 = vand.u32 2147483647, %v4638_v61 }
 0x37a   : > { %1757 = vadd.xlane.f32.xlu1 %v6432_v62  ;;  %1679 = vadd.xlane.f32.xlu2 %v1616_v53  ;;  %v6435_v53 = vsel %vm3737_vm2, %v4505_v44, 0.0  ;;  %v2745_v11 = vmul.f32 %v4068_v13, %v2713_v43  ;;  %v2227_v62 = vsub.f32 1.0, %v2226_v31  ;;  %v2236_v21 = vand.u32 2147483648, %v4638_v61  ;;  %v4753_v43 = vpop.xlane.xlu0 %1761 }
 0x37b   : > { %1725 = vadd.xlane.f32.xlu0 %v6435_v53  ;;  %v2453_v32 = vadd.f32 %v3211_v4, %v2452_v27  ;;  %v2009_v53 = vsel %vm4745_vm11, %v4592_v3, %v2005_v10  ;;  %vm2231_vm14 = vweird.f32 %v4706_v57  ;;  %3218 = vrcp.f32 %v4727_v60 }
 0x37c   : > { %v4733_v22 = vpop.eup %3216  ;;  %v2777_v47 = vsel %vm4719_vm10, %v2745_v11, %v3746_v17  ;;  %v1794_v17 = vmul.f32 %v4682_v41, %v1793_v48  ;;  %v2228_v58 = vmul.f32 %v4706_v57, %v2227_v62  ;;  %v1802_v11 = vand.u32 2147483648, %v4614_v9  ;;  %vm2232_vm0 = vmor %vm2230_vm4, %vm2231_vm14 }
 0x37d   : > { %v1904_v13 = vmul.f32 %v4733_v22, %v4670_v33  ;;  %2809 = vst [vmem:[%s6337_s5 + $0x40] sm:$0xff] %v2777_v47  ;;  %v2457_v3 = vsel %vm2456_vm13, %v3211_v4, %v2453_v32  ;;  %3220 = vrcp.f32 %v4753_v43  ;;  %v2014_v4 = vsel %vm4692_vm5, %v4646_v40, %v2009_v53  ;;  %v4801_v45 = vpop.xlane.xlu1 %1715 }
 0x37e   : > { %v2462_v31 = vsel %vm4700_vm8, %v2461_v59, %v2457_v3  ;;  %vm4795_vm7 = vcmp.eq.f32.partialorder %v1800_v18, 8.507059e+37  ;;  %v2229_v61 = vadd.f32 %v4706_v57, %v2228_v58  ;;  %v2121_v35 = vsel %vm4786_vm6, %v4585_v54, %v4736_v2  ;;  %v4836_v47 = vpop.xlane.xlu2 %1747 }
 0x37f   : > { %v1905_v10 = vsub.f32 1.0, %v1904_v13  ;;  %v2689_v5 = vsel %vm3737_vm2, %v2462_v31, 1.0  ;;  %vm2235_vm1 = vcmp.eq.f32.partialorder %v2234_v52, 8.507059e+37  ;;  %v2237_v1 = vor.u32 1.1754944e-38, %v2236_v21 }
 0x380   : > { %v2721_v40 = vsel %vm1227_vm3, %v2014_v4, %v2689_v5  ;;  %v6444_v18 = vsel %vm3737_vm2, %v4554_v6, 0.0  ;;  %v1795_v62 = vadd.f32 %v4682_v41, %v1794_v17  ;;  %vm1797_vm5 = vweird.f32 %v4682_v41 }
 0x381   : > { %v1906_v48 = vmul.f32 %v4733_v22, %v1905_v10  ;;  %v2753_v32 = vmul.f32 %v4106_v8, %v2721_v40  ;;  %v2233_v54 = vsel %vm2232_vm0, %v4706_v57, %v2229_v61  ;;  %v6445_v2 = vsel %vm3737_vm2, %v4544_v26, 0.0  ;;  %v4824_v52 = vpop.eup %3218  ;;  %vm4845_vm9 = vmor %vm1796_vm12, %vm1797_vm5 }
 0x382   : > { %1647 = vadd.xlane.f32.xlu1 %v4576_v0  ;;  %1759 = vadd.xlane.f32.xlu2 %v6444_v18  ;;  %v2238_v0 = vsel %vm2235_vm1, %v2237_v1, %v2233_v54  ;;  %v1912_v21 = vand.u32 2147483647, %v4670_v33  ;;  %v1914_v13 = vand.u32 2147483648, %v4670_v33  ;;  %3222 = vrcp.f32 %v4801_v45  ;;  %v4880_v61 = vpop.xlane.xlu0 %1731 }
 0x383   : > { %1743 = vadd.xlane.f32.xlu0 %v6445_v2  ;;  %v2785_v8 = vsel %vm4719_vm10, %v2753_v32, %v3758_v24  ;;  %v2673_v57 = vsel %vm3737_vm2, %v2238_v0, 1.0  ;;  %v1907_v53 = vadd.f32 %v4733_v22, %v1906_v48  ;;  %vm1909_vm8 = vweird.f32 %v4733_v22  ;;  %v3221_v3 = vpop.eup %3220 }
 0x384   : > { %2817 = vst [vmem:[%s6337_s5 + $0x80] sm:$0xff] %v2785_v8  ;;  %v1803_v17 = vor.u32 1.1754944e-38, %v1802_v11  ;;  %v2705_v58 = vsel %vm1227_vm3, %v4687_v42, %v2673_v57  ;;  %vm1908_vm11 = vweird.f32 %v4670_v33  ;;  %v2128_v10 = vmul.f32 %v4824_v52, %v4727_v60 }
 0x385   : > { %v1799_v31 = vsel %vm4845_vm9, %v4682_v41, %v1795_v62  ;;  %v2737_v9 = vmul.f32 %v4076_v20, %v2705_v58  ;;  %v2138_v7 = vand.u32 2147483648, %v4727_v60  ;;  %v2562_v4 = vmul.f32 %v3221_v3, %v4753_v43  ;;  %vm4864_vm12 = vmor %vm1908_vm11, %vm1909_vm8  ;;  %v4902_v54 = vpop.xlane.xlu1 %1763 }
 0x386   : > { %v2126_v11 = vsel %vm4768_vm15, %v4640_v50, %v2121_v35  ;;  %vm4868_vm13 = vcmp.eq.f32.partialorder %v1912_v21, 8.507059e+37  ;;  %v1915_v5 = vor.u32 1.1754944e-38, %v1914_v13  ;;  %v2136_v41 = vand.u32 2147483647, %v4727_v60 }
 0x387   : > { %v2769_v20 = vsel %vm4719_vm10, %v2737_v9, %v3743_v16  ;;  %v1911_v27 = vsel %vm4864_vm12, %v4733_v22, %v1907_v53  ;;  %v2563_v50 = vsub.f32 1.0, %v2562_v4  ;;  %3224 = vrcp.f32 %v4836_v47 }
 0x388   : > { %v3223_v48 = vpop.eup %3222  ;;  %v4884_v35 = vsel %vm4795_vm7, %v1803_v17, %v1799_v31  ;;  %2801 = vst [vmem:[%s6337_s5] sm:$0xff] %v2769_v20  ;;  %v2129_v40 = vsub.f32 1.0, %v2128_v10  ;;  %v2570_v16 = vand.u32 2147483647, %v4753_v43  ;;  %v2572_v1 = vand.u32 2147483648, %v4753_v43  ;;  %v4920_v17 = vpop.xlane.xlu2 %1637 }
 0x389   : > { %v6452_v22 = vsel %vm3737_vm2, %v4566_v14, 0.0  ;;  %v6453_v59 = vsel %vm3737_vm2, %v4476_v29, 0.0  ;;  %v4899_v18 = vor.u32 1.1754944e-38, %v2138_v7  ;;  %v2564_v32 = vmul.f32 %v3221_v3, %v2563_v50 }
 0x38a   : > { %1727 = vadd.xlane.f32.xlu1 %v6452_v22  ;;  %1771 = vadd.xlane.f32.xlu2 %v6453_v59  ;;  %vm2567_vm14 = vweird.f32 %v3221_v3  ;;  %v2240_v62 = vmul.f32 %v3223_v48, %v4801_v45  ;;  %v4907_v2 = vsel %vm4868_vm13, %v1915_v5, %v1911_v27  ;;  %vm2566_vm15 = vweird.f32 %v4753_v43 }
 0x38b   : > { %1663 = vadd.xlane.f32.xlu0 %v4604_v49  ;;  %v2248_v0 = vand.u32 2147483647, %v4801_v45  ;;  %3226 = vrcp.f32 %v4880_v61  ;;  %vm2133_vm4 = vweird.f32 %v4824_v52  ;;  %v2565_v21 = vadd.f32 %v3221_v3, %v2564_v32  ;;  %vm2568_vm7 = vmor %vm2566_vm15, %vm2567_vm14 }
 0x38c   : > { %v2241_v13 = vsub.f32 1.0, %v2240_v62  ;;  %v2250_v8 = vand.u32 2147483648, %v4801_v45  ;;  %v2130_v57 = vmul.f32 %v4824_v52, %v2129_v40  ;;  %vm2132_vm6 = vweird.f32 %v4727_v60 }
 0x38d   : > { %vm2571_vm0 = vcmp.eq.f32.partialorder %v2570_v16, 8.507059e+37  ;;  %v2573_v49 = vor.u32 1.1754944e-38, %v2572_v1  ;;  %3228 = vrcp.f32 %v4902_v54  ;;  %v4917_v43 = vpop.eup %3224  ;;  %v2569_v53 = vsel %vm2568_vm7, %v3221_v3, %v2565_v21  ;;  %vm4981_vm7 = vmor %vm2132_vm6, %vm2133_vm4 }
 0x38e   : > { %v2242_v24 = vmul.f32 %v3223_v48, %v2241_v13  ;;  %vm2244_vm1 = vweird.f32 %v4801_v45  ;;  %vm2245_vm5 = vweird.f32 %v3223_v48  ;;  %vm4922_vm8 = vcmp.eq.f32.partialorder %v2248_v0, 8.507059e+37  ;;  %v4966_v13 = vpop.xlane.xlu0 %1651 }
 0x38f   : > { %v2574_v58 = vsel %vm2571_vm0, %v2573_v49, %v2569_v53  ;;  %v2464_v31 = vmul.f32 %v4917_v43, %v4836_v47  ;;  %v2472_v9 = vand.u32 2147483647, %v4836_v47  ;;  %v2251_v4 = vor.u32 1.1754944e-38, %v2250_v8  ;;  %vm2246_vm11 = vmor %vm2244_vm1, %vm2245_vm5 }
 0x390   : > { %v2697_v7 = vsel %vm3737_vm2, %v2574_v58, 1.0  ;;  %v2243_v3 = vadd.f32 %v3223_v48, %v2242_v24  ;;  %vm2468_vm9 = vweird.f32 %v4836_v47  ;;  %v4933_v42 = vadd.f32 %v4824_v52, %v2130_v57 }
 0x391   : > { %v3227_v45 = vpop.eup %3226  ;;  %v2729_v33 = vsel %vm1227_vm3, %v2126_v11, %v2697_v7  ;;  %v2465_v5 = vsub.f32 1.0, %v2464_v31  ;;  %3230 = vrcp.f32 %v4920_v17  ;;  %v2474_v50 = vand.u32 2147483648, %v4836_v47 }
 0x392   : > { %v2761_v20 = vmul.f32 %v4097_v55, %v2729_v33  ;;  %v2247_v27 = vsel %vm2246_vm11, %v3223_v48, %v2243_v3  ;;  %v2352_v40 = vmul.f32 %v3227_v45, %v4880_v61  ;;  %v6456_v16 = vsel %vm3737_vm2, %v4533_v34, 0.0  ;;  %v5006_v3 = vpop.xlane.xlu2 %1717 }
 0x393   : > { %1773 = vadd.xlane.f32.xlu0 %v6456_v16  ;;  %v3229_v1 = vpop.eup %3228  ;;  %v2252_v11 = vsel %vm4922_vm8, %v2251_v4, %v2247_v27  ;;  %v2466_v22 = vmul.f32 %v4917_v43, %v2465_v5  ;;  %vm4948_vm12 = vcmp.eq.f32.partialorder %v2472_v9, 8.507059e+37  ;;  %vm2356_vm13 = vweird.f32 %v4880_v61 }
 0x394   : > { %v2360_v55 = vand.u32 2147483647, %v4880_v61  ;;  %vm4956_vm14 = vcmp.eq.f32.partialorder %v2136_v41, 8.507059e+37  ;;  %v2793_v32 = vsel %vm4719_vm10, %v2761_v20, %v3761_v25  ;;  %v2674_v62 = vsel %vm3737_vm2, %v2252_v11, 1.0 }
 0x395   : > { %v2353_v0 = vsub.f32 1.0, %v2352_v40  ;;  %v2576_v21 = vmul.f32 %v3229_v1, %v4902_v54  ;;  %2825 = vst [vmem:[%s6337_s5 + $0xc0] sm:$0xff] %v2793_v32  ;;  %v2706_v41 = vsel %vm1227_vm3, %v4884_v35, %v2674_v62  ;;  %v2467_v8 = vadd.f32 %v4917_v43, %v2466_v22 }
 0x396   : > { %vm2469_vm15 = vweird.f32 %v4917_v43  ;;  %v2362_v25 = vand.u32 2147483648, %v4880_v61  ;;  %v2738_v49 = vmul.f32 %v4130_v36, %v2706_v41  ;;  %vm2357_vm0 = vweird.f32 %v3227_v45 }
 0x397   : > { %v2354_v53 = vmul.f32 %v3227_v45, %v2353_v0  ;;  %v2577_v24 = vsub.f32 1.0, %v2576_v21  ;;  %v4986_v35 = vpop.eup %3230  ;;  %v2135_v58 = vsel %vm4981_vm7, %v4824_v52, %v4933_v42  ;;  %v2584_v10 = vand.u32 2147483647, %v4902_v54  ;;  %vm5000_vm4 = vmor %vm2468_vm9, %vm2469_vm15  ;;  %v5004_v52 = vpop.xlane.xlu1 %1733 }
 0x398   : > { %v2586_v60 = vand.u32 2147483648, %v4902_v54  ;;  %3232 = vrcp.f32 %v4966_v13  ;;  %v2770_v36 = vsel %vm4719_vm10, %v2738_v49, %v3791_v39  ;;  %vm2581_vm6 = vweird.f32 %v3229_v1  ;;  %vm2358_vm1 = vmor %vm2356_vm13, %vm2357_vm0  ;;  %v5048_v21 = vpop.xlane.xlu0 %1621 }
 0x399   : > { %v2355_v9 = vadd.f32 %v3227_v45, %v2354_v53  ;;  %v2578_v7 = vmul.f32 %v3229_v1, %v2577_v24  ;;  %2802 = vst [vmem:[%s6337_s5 + $0x8] sm:$0xff] %v2770_v36  ;;  %v2471_v39 = vsel %vm5000_vm4, %v4917_v43, %v2467_v8  ;;  %v2475_v47 = vor.u32 1.1754944e-38, %v2474_v50 }
 0x39a   : > { %v2363_v4 = vor.u32 1.1754944e-38, %v2362_v25  ;;  %v1918_v42 = vmul.f32 %v4986_v35, %v4920_v17  ;;  %vm2361_vm5 = vcmp.eq.f32.partialorder %v2360_v55, 8.507059e+37  ;;  %vm2580_vm8 = vweird.f32 %v4902_v54  ;;  %v5065_v24 = vpop.xlane.xlu2 %1765 }
 0x39b   : > { %v2359_v33 = vsel %vm2358_vm1, %v3227_v45, %v2355_v9  ;;  %v2579_v5 = vadd.f32 %v3229_v1, %v2578_v7  ;;  %vm2582_vm9 = vmor %vm2580_vm8, %vm2581_vm6  ;;  %v2587_v27 = vor.u32 1.1754944e-38, %v2586_v60  ;;  %3234 = vrcp.f32 %v5004_v52 }
 0x39c   : > { %v2364_v20 = vsel %vm2361_vm5, %v2363_v4, %v2359_v33  ;;  %v1919_v40 = vsub.f32 1.0, %v1918_v42  ;;  %v2476_v43 = vsel %vm4948_vm12, %v2475_v47, %v2471_v39  ;;  %vm2585_vm11 = vcmp.eq.f32.partialorder %v2584_v10, 8.507059e+37 }
 0x39d   : > { %v2682_v61 = vsel %vm3737_vm2, %v2364_v20, 1.0  ;;  %v2583_v50 = vsel %vm2582_vm9, %v3229_v1, %v2579_v5  ;;  %v2140_v45 = vsel %vm4956_vm14, %v4899_v18, %v2135_v58  ;;  %v1926_v22 = vand.u32 2147483647, %v4920_v17 }
 0x39e   : > { %v3233_v16 = vpop.eup %3232  ;;  %v2714_v54 = vsel %vm1227_vm3, %v4907_v2, %v2682_v61  ;;  %v2588_v11 = vsel %vm2585_vm11, %v2587_v27, %v2583_v50  ;;  %vm1922_vm12 = vweird.f32 %v4920_v17  ;;  %v2690_v48 = vsel %vm3737_vm2, %v2476_v43, 1.0 }
 0x39f   : > { %v2746_v59 = vmul.f32 %v4145_v63, %v2714_v54  ;;  %v2698_v55 = vsel %vm3737_vm2, %v2588_v11, 1.0  ;;  %v2016_v1 = vmul.f32 %v3233_v16, %v4966_v13  ;;  %v1920_v2 = vmul.f32 %v4986_v35, %v1919_v40  ;;  %v5081_v7 = vpop.xlane.xlu1 %1653 }
 0x3a0   : > { %v2730_v18 = vsel %vm1227_vm3, %v2140_v45, %v2698_v55  ;;  %v1928_v32 = vand.u32 2147483648, %v4920_v17  ;;  %3236 = vrcp.f32 %v5006_v3  ;;  %vm5053_vm13 = vcmp.eq.f32.partialorder %v1926_v22, 8.507059e+37 }
 0x3a1   : > { %v2778_v63 = vsel %vm4719_vm10, %v2746_v59, %v3785_v37  ;;  %v2762_v62 = vmul.f32 %v4152_v19, %v2730_v18  ;;  %v2017_v0 = vsub.f32 1.0, %v2016_v1  ;;  %v3235_v41 = vpop.eup %3234  ;;  %vm2020_vm14 = vweird.f32 %v4966_v13  ;;  %v5117_v1 = vpop.xlane.xlu0 %1669 }
 0x3a2   : > { %2810 = vst [vmem:[%s6337_s5 + $0x48] sm:$0xff] %v2778_v63  ;;  %v2024_v37 = vand.u32 2147483647, %v4966_v13  ;;  %v2026_v19 = vand.u32 2147483648, %v4966_v13  ;;  %v2374_v25 = vand.u32 2147483647, %v5004_v52  ;;  %vm2021_vm15 = vweird.f32 %v3233_v16 }
 0x3a3   : > { %v2794_v57 = vsel %vm4719_vm10, %v2762_v62, %v3773_v30  ;;  %v2018_v49 = vmul.f32 %v3233_v16, %v2017_v0  ;;  %v2366_v53 = vmul.f32 %v3235_v41, %v5004_v52  ;;  %v1921_v58 = vadd.f32 %v4986_v35, %v1920_v2  ;;  %vm2022_vm4 = vmor %vm2020_vm14, %vm2021_vm15 }
 0x3a4   : > { %2826 = vst [vmem:[%s6337_s5 + $0xc8] sm:$0xff] %v2794_v57  ;;  %vm1923_vm7 = vweird.f32 %v4986_v35  ;;  %v2376_v10 = vand.u32 2147483648, %v5004_v52  ;;  %3238 = vrcp.f32 %v5048_v21  ;;  %v1929_v60 = vor.u32 1.1754944e-38, %v1928_v32  ;;  %v5140_v57 = vpop.xlane.xlu2 %1735 }
 0x3a5   : > { %v2019_v30 = vadd.f32 %v3233_v16, %v2018_v49  ;;  %v2367_v36 = vsub.f32 1.0, %v2366_v53  ;;  %vm2370_vm0 = vweird.f32 %v5004_v52  ;;  %vm2025_vm6 = vcmp.eq.f32.partialorder %v2024_v37, 8.507059e+37  ;;  %vm5085_vm1 = vmor %vm1922_vm12, %vm1923_vm7 }
 0x3a6   : > { %v2027_v31 = vor.u32 1.1754944e-38, %v2026_v19  ;;  %v1712_v9 = vsel %vm3737_vm2, %v4644_v51, 0.0  ;;  %3240 = vrcp.f32 %v5065_v24  ;;  %v3237_v39 = vpop.eup %3236  ;;  %vm2371_vm5 = vweird.f32 %v3235_v41 }
 0x3a7   : > { %v2023_v4 = vsel %vm2022_vm4, %v3233_v16, %v2019_v30  ;;  %v2368_v13 = vmul.f32 %v3235_v41, %v2367_v36  ;;  %vm5089_vm8 = vcmp.eq.f32.partialorder %v2374_v25, 8.507059e+37  ;;  %1775 = vadd.xlane.f32.xlu1 %v1712_v9  ;;  %v1925_v33 = vsel %vm5085_vm1, %v4986_v35, %v1921_v58  ;;  %vm2372_vm11 = vmor %vm2370_vm0, %vm2371_vm5 }
 0x3a8   : > { %v2028_v5 = vsel %vm2025_vm6, %v2027_v31, %v2023_v4  ;;  %v2377_v20 = vor.u32 1.1754944e-38, %v2376_v10  ;;  %v2254_v17 = vmul.f32 %v3237_v39, %v5006_v3  ;;  %vm2258_vm9 = vweird.f32 %v5006_v3 }
 0x3a9   : > { %v2722_v27 = vsel %vm1227_vm3, %v2028_v5, %v2690_v48  ;;  %v2369_v40 = vadd.f32 %v3235_v41, %v2368_v13  ;;  %v2264_v43 = vand.u32 2147483648, %v5006_v3  ;;  %v2262_v35 = vand.u32 2147483647, %v5006_v3  ;;  %v6473_v3 = vld [vmem:[#allocation5_spill] sm:$0xff] }
 0x3aa   : > { %v3239_v61 = vpop.eup %3238  ;;  %v2754_v50 = vmul.f32 %v4175_v46, %v2722_v27  ;;  %v2255_v16 = vsub.f32 1.0, %v2254_v17  ;;  %3242 = vrcp.f32 %v5081_v7  ;;  %v1930_v45 = vsel %vm5053_vm13, %v1929_v60, %v1925_v33  ;;  %v6474_v33 = vld [vmem:[#allocation28_spill] sm:$0xff] }
 0x3ab   : > { %v2373_v54 = vsel %vm2372_vm11, %v3235_v41, %v2369_v40  ;;  %v1806_v11 = vmul.f32 %v3239_v61, %v5048_v21  ;;  %v1814_v22 = vand.u32 2147483647, %v5048_v21  ;;  %vm2259_vm12 = vweird.f32 %v3237_v39  ;;  %v6475_v40 = vld [vmem:[#allocation4_spill] sm:$0xff] }
 0x3ac   : > { %v5110_v59 = vpop.eup %3240  ;;  %v2786_v46 = vsel %vm4719_vm10, %v2754_v50, %v3788_v38  ;;  %v2378_v52 = vsel %vm5089_vm8, %v2377_v20, %v2373_v54  ;;  %v2256_v55 = vmul.f32 %v3237_v39, %v2255_v16  ;;  %v2265_v18 = vor.u32 1.1754944e-38, %v2264_v43  ;;  %vm2260_vm14 = vmor %vm2258_vm9, %vm2259_vm12  ;;  %v5174_v16 = vpop.xlane.xlu0 %1749 }
 0x3ad   : > { %2818 = vst [vmem:[%s6337_s5 + $0x88] sm:$0xff] %v2786_v46  ;;  %v2683_v48 = vsel %vm3737_vm2, %v2378_v52, 1.0  ;;  %v1807_v2 = vsub.f32 1.0, %v1806_v11  ;;  %v2590_v32 = vmul.f32 %v5110_v59, %v5065_v24  ;;  %vm1811_vm13 = vweird.f32 %v3239_v61 }
 0x3ae   : > { %v2715_v38 = vsel %vm1227_vm3, %v1930_v45, %v2683_v48  ;;  %v2257_v63 = vadd.f32 %v3237_v39, %v2256_v55  ;;  %v1816_v62 = vand.u32 2147483648, %v5048_v21  ;;  %3244 = vrcp.f32 %v5117_v1 }
 0x3af   : > { %v2747_v0 = vmul.f32 %v4204_v23, %v2715_v38  ;;  %v1808_v41 = vmul.f32 %v3239_v61, %v1807_v2  ;;  %v2591_v8 = vsub.f32 1.0, %v2590_v32  ;;  %vm2263_vm15 = vcmp.eq.f32.partialorder %v2262_v35, 8.507059e+37  ;;  %v5142_v23 = vpop.xlane.xlu1 %1623 }
 0x3b0   : > { %v5133_v37 = vpop.eup %3242  ;;  %v2261_v19 = vsel %vm2260_vm14, %v3237_v39, %v2257_v63  ;;  %vm1810_vm7 = vweird.f32 %v5048_v21  ;;  %vm5136_vm0 = vcmp.eq.f32.partialorder %v1814_v22, 8.507059e+37  ;;  %v1817_v60 = vor.u32 1.1754944e-38, %v1816_v62  ;;  %v5200_v62 = vpop.xlane.xlu2 %1655 }
 0x3b1   : > { %v2779_v49 = vsel %vm4719_vm10, %v2747_v0, %v6473_v3  ;;  %v2266_v53 = vsel %vm2263_vm15, %v2265_v18, %v2261_v19  ;;  %v1809_v58 = vadd.f32 %v3239_v61, %v1808_v41  ;;  %v2592_v10 = vmul.f32 %v5110_v59, %v2591_v8  ;;  %vm1812_vm4 = vmor %vm1810_vm7, %vm1811_vm13 }
 0x3b2   : > { %2811 = vst [vmem:[%s6337_s5 + $0x50] sm:$0xff] %v2779_v49  ;;  %v2675_v21 = vsel %vm3737_vm2, %v2266_v53, 1.0  ;;  %v2600_v30 = vand.u32 2147483648, %v5065_v24  ;;  %v2030_v36 = vmul.f32 %v5133_v37, %v5081_v7  ;;  %vm2595_vm6 = vweird.f32 %v5110_v59 }
 0x3b3   : > { %v1813_v31 = vsel %vm1812_vm4, %v3239_v61, %v1809_v58  ;;  %v2593_v9 = vadd.f32 %v5110_v59, %v2592_v10  ;;  %3246 = vrcp.f32 %v5140_v57  ;;  %vm2594_vm1 = vweird.f32 %v5065_v24  ;;  %v6480_v10 = vld [vmem:[#allocation29_spill] sm:$0xff] }
 0x3b4   : > { %v1818_v39 = vsel %vm5136_vm0, %v1817_v60, %v1813_v31  ;;  %v2031_v47 = vsub.f32 1.0, %v2030_v36  ;;  %v3245_v4 = vpop.eup %3244  ;;  %v2598_v42 = vand.u32 2147483647, %v5065_v24  ;;  %vm2596_vm5 = vmor %vm2594_vm1, %vm2595_vm6  ;;  %v2601_v27 = vor.u32 1.1754944e-38, %v2600_v30  ;;  %v5226_v31 = vpop.xlane.xlu0 %1639 }
 0x3b5   : > { %v2707_v13 = vsel %vm1227_vm3, %v1818_v39, %v2675_v21  ;;  %v2142_v20 = vmul.f32 %v3245_v4, %v5117_v1  ;;  %v2597_v17 = vsel %vm2596_vm5, %v5110_v59, %v2593_v9  ;;  %3248 = vrcp.f32 %v5142_v23  ;;  %v6481_v39 = vld [vmem:[#allocation6_spill] sm:$0xff] }
 0x3b6   : > { %v2739_v5 = vmul.f32 %v6474_v33, %v2707_v13  ;;  %v2032_v61 = vmul.f32 %v5133_v37, %v2031_v47  ;;  %vm2599_vm8 = vcmp.eq.f32.partialorder %v2598_v42, 8.507059e+37  ;;  %v2150_v35 = vand.u32 2147483647, %v5117_v1  ;;  %v6495_v33 = vld [vmem:[#allocation7_spill] sm:$0xff] }
 0x3b7   : > { %v2143_v50 = vsub.f32 1.0, %v2142_v20  ;;  %v2152_v45 = vand.u32 2147483648, %v5117_v1  ;;  %v2602_v54 = vsel %vm2599_vm8, %v2601_v27, %v2597_v17  ;;  %vm2147_vm9 = vweird.f32 %v3245_v4  ;;  %v5185_v59 = vpop.xlane.xlu1 %1671 }
 0x3b8   : > { %v2771_v43 = vsel %vm4719_vm10, %v2739_v5, %v6475_v40  ;;  %v2038_v46 = vand.u32 2147483647, %v5081_v7  ;;  %v2040_v52 = vand.u32 2147483648, %v5081_v7  ;;  %vm2146_vm11 = vweird.f32 %v5117_v1 }
 0x3b9   : > { %v5176_v24 = vpop.eup %3246  ;;  %2803 = vst [vmem:[%s6337_s5 + $0x10] sm:$0xff] %v2771_v43  ;;  %v2144_v11 = vmul.f32 %v3245_v4, %v2143_v50  ;;  %3250 = vrcp.f32 %v5174_v16  ;;  %v2033_v55 = vadd.f32 %v5133_v37, %v2032_v61  ;;  %vm2035_vm12 = vweird.f32 %v5133_v37  ;;  %vm2148_vm13 = vmor %vm2146_vm11, %vm2147_vm9 }
 0x3ba   : > { %v2380_v22 = vmul.f32 %v5176_v24, %v5140_v57  ;;  %v2699_v2 = vsel %vm3737_vm2, %v2602_v54, 1.0  ;;  %v2153_v32 = vor.u32 1.1754944e-38, %v2152_v45  ;;  %3252 = vrcp.f32 %v5185_v59 }
 0x3bb   : > { %v2145_v48 = vadd.f32 %v3245_v4, %v2144_v11  ;;  %v5196_v38 = vpop.eup %3248  ;;  %vm2034_vm14 = vweird.f32 %v5081_v7  ;;  %vm2151_vm15 = vcmp.eq.f32.partialorder %v2150_v35, 8.507059e+37  ;;  %v2388_v8 = vand.u32 2147483647, %v5140_v57 }
 0x3bc   : > { %v2381_v18 = vsub.f32 1.0, %v2380_v22  ;;  %vm5202_vm7 = vmor %vm2034_vm14, %vm2035_vm12  ;;  %v2390_v19 = vand.u32 2147483648, %v5140_v57  ;;  %v1820_v25 = vmul.f32 %v5196_v38, %v5142_v23  ;;  %vm5213_vm0 = vcmp.eq.f32.partialorder %v2038_v46, 8.507059e+37 }
 0x3bd   : > { %v2149_v1 = vsel %vm2148_vm13, %v3245_v4, %v2145_v48  ;;  %v2037_v7 = vsel %vm5202_vm7, %v5133_v37, %v2033_v55  ;;  %v2041_v49 = vor.u32 1.1754944e-38, %v2040_v52  ;;  %vm2385_vm4 = vweird.f32 %v5176_v24  ;;  %v5278_v48 = vpop.xlane.xlu2 %1625 }
 0x3be   : > { %v2382_v63 = vmul.f32 %v5176_v24, %v2381_v18  ;;  %v2154_v41 = vsel %vm2151_vm15, %v2153_v32, %v2149_v1  ;;  %3254 = vrcp.f32 %v5200_v62  ;;  %vm2384_vm6 = vweird.f32 %v5140_v57 }
 0x3bf   : > { %v2731_v53 = vsel %vm1227_vm3, %v2154_v41, %v2699_v2  ;;  %v3251_v58 = vpop.eup %3250  ;;  %v1821_v37 = vsub.f32 1.0, %v1820_v25  ;;  %v1830_v30 = vand.u32 2147483648, %v5142_v23  ;;  %vm5233_vm1 = vcmp.eq.f32.partialorder %v2388_v8, 8.507059e+37  ;;  %vm5243_vm5 = vmor %vm2384_vm6, %vm2385_vm4  ;;  %v5250_v27 = vpop.xlane.xlu1 %1751 }
 0x3c0   : > { %v2763_v21 = vmul.f32 %v6480_v10, %v2731_v53  ;;  %v2383_v60 = vadd.f32 %v5176_v24, %v2382_v63  ;;  %v2478_v36 = vmul.f32 %v3251_v58, %v5174_v16  ;;  %v5228_v9 = vpop.eup %3252  ;;  %v2391_v13 = vor.u32 1.1754944e-38, %v2390_v19  ;;  %v5302_v53 = vpop.xlane.xlu0 %1719 }
 0x3c1   : > { %v2486_v57 = vand.u32 2147483647, %v5174_v16  ;;  %v2042_v42 = vsel %vm5213_vm0, %v2041_v49, %v2037_v7  ;;  %vm1824_vm8 = vweird.f32 %v5142_v23  ;;  %v1828_v5 = vand.u32 2147483647, %v5142_v23 }
 0x3c2   : > { %v2795_v47 = vsel %vm4719_vm10, %v2763_v21, %v6481_v39  ;;  %v2479_v20 = vsub.f32 1.0, %v2478_v36  ;;  %v2488_v17 = vand.u32 2147483648, %v5174_v16  ;;  %v2387_v40 = vsel %vm5243_vm5, %v5176_v24, %v2383_v60  ;;  %v6492_v39 = vld [vmem:[#allocation30_spill] sm:$0xff] }
 0x3c3   : > { %2827 = vst [vmem:[%s6337_s5 + $0xd0] sm:$0xff] %v2795_v47  ;;  %v2156_v43 = vmul.f32 %v5228_v9, %v5185_v59  ;;  %v2166_v61 = vand.u32 2147483648, %v5185_v59  ;;  %3256 = vrcp.f32 %v5226_v31  ;;  %v1822_v50 = vmul.f32 %v5196_v38, %v1821_v37 }
 0x3c4   : > { %v5260_v35 = vor.u32 1.1754944e-38, %v1830_v30  ;;  %v2480_v45 = vmul.f32 %v3251_v58, %v2479_v20  ;;  %vm2483_vm9 = vweird.f32 %v3251_v58  ;;  %v5262_v54 = vpop.eup %3254  ;;  %vm2482_vm11 = vweird.f32 %v5174_v16 }
 0x3c5   : > { %vm5265_vm12 = vcmp.eq.f32.partialorder %v2486_v57, 8.507059e+37  ;;  %v2164_v24 = vand.u32 2147483647, %v5185_v59  ;;  %3258 = vrcp.f32 %v5250_v27  ;;  %v5273_v22 = vsel %vm5233_vm1, %v2391_v13, %v2387_v40  ;;  %vm2484_vm14 = vmor %vm2482_vm11, %vm2483_vm9 }
 0x3c6   : > { %v2481_v46 = vadd.f32 %v3251_v58, %v2480_v45  ;;  %v2044_v52 = vmul.f32 %v5262_v54, %v5200_v62  ;;  %v2054_v55 = vand.u32 2147483648, %v5200_v62  ;;  %vm1825_vm13 = vweird.f32 %v5196_v38 }
 0x3c7   : > { %v2489_v16 = vor.u32 1.1754944e-38, %v2488_v17  ;;  %v2157_v18 = vsub.f32 1.0, %v2156_v43  ;;  %vm2160_vm15 = vweird.f32 %v5185_v59  ;;  %v5282_v2 = vor.u32 1.1754944e-38, %v2166_v61  ;;  %vm5308_vm1 = vmor %vm1824_vm8, %vm1825_vm13  ;;  %v5333_v17 = vpop.xlane.xlu1 %1641 }
 0x3c8   : > { %v1823_v32 = vadd.f32 %v5196_v38, %v1822_v50  ;;  %vm5285_vm7 = vcmp.eq.f32.partialorder %v1828_v5, 8.507059e+37  ;;  %v2485_v63 = vsel %vm2484_vm14, %v3251_v58, %v2481_v46  ;;  %v2045_v0 = vsub.f32 1.0, %v2044_v52 }
 0x3c9   : > { %v2052_v41 = vand.u32 2147483647, %v5200_v62  ;;  %v3257_v8 = vpop.eup %3256  ;;  %v2684_v19 = vsel %vm3737_vm2, %v5273_v22, 1.0  ;;  %v2490_v25 = vsel %vm5265_vm12, %v2489_v16, %v2485_v63  ;;  %vm2161_vm0 = vweird.f32 %v5228_v9 }
 0x3ca   : > { %vm2048_vm4 = vweird.f32 %v5200_v62  ;;  %3260 = vrcp.f32 %v5278_v48  ;;  %v2691_v7 = vsel %vm3737_vm2, %v2490_v25, 1.0  ;;  %v2055_v3 = vor.u32 1.1754944e-38, %v2054_v55  ;;  %vm5348_vm12 = vmor %vm2160_vm15, %vm2161_vm0  ;;  %v5382_v62 = vpop.xlane.xlu2 %1673  ;;  %v6502_v25 = vld [vmem:[#allocation32_spill] sm:$0xff] }
 0x3cb   : > { %v1932_v49 = vmul.f32 %v3257_v8, %v5226_v31  ;;  %vm1936_vm6 = vweird.f32 %v5226_v31  ;;  %v3259_v58 = vpop.eup %3258  ;;  %v2723_v21 = vsel %vm1227_vm3, %v2042_v42, %v2691_v7  ;;  %v2158_v60 = vmul.f32 %v5228_v9, %v2157_v18 }
 0x3cc   : > { %v2046_v37 = vmul.f32 %v5262_v54, %v2045_v0  ;;  %v1940_v30 = vand.u32 2147483647, %v5226_v31  ;;  %v1827_v36 = vsel %vm5308_vm1, %v5196_v38, %v1823_v32  ;;  %v2755_v47 = vmul.f32 %v6492_v39, %v2723_v21 }
 0x3cd   : > { %v1933_v23 = vsub.f32 1.0, %v1932_v49  ;;  %v2492_v4 = vmul.f32 %v3259_v58, %v5250_v27  ;;  %vm5322_vm5 = vcmp.eq.f32.partialorder %v2052_v41, 8.507059e+37  ;;  %v1942_v57 = vand.u32 2147483648, %v5226_v31 }
 0x3ce   : > { %vm2496_vm8 = vweird.f32 %v5250_v27  ;;  %v2500_v42 = vand.u32 2147483647, %v5250_v27  ;;  %3262 = vrcp.f32 %v5302_v53  ;;  %v2787_v38 = vsel %vm4719_vm10, %v2755_v47, %v6495_v33  ;;  %v6504_v47 = vld [vmem:[#allocation34_spill] sm:$0xff] }
 0x3cf   : > { %v1934_v5 = vmul.f32 %v3257_v8, %v1933_v23  ;;  %vm1937_vm9 = vweird.f32 %v3257_v8  ;;  %v2493_v20 = vsub.f32 1.0, %v2492_v4  ;;  %2819 = vst [vmem:[%s6337_s5 + $0x90] sm:$0xff] %v2787_v38  ;;  %v2159_v43 = vadd.f32 %v5228_v9, %v2158_v60  ;;  %v5419_v33 = vpop.xlane.xlu1 %1721  ;;  %v6505_v38 = vld [vmem:[#allocation12_spill] sm:$0xff] }
 0x3d0   : > { %v5335_v40 = vpop.eup %3260  ;;  %v2047_v61 = vadd.f32 %v5262_v54, %v2046_v37  ;;  %vm2049_vm11 = vweird.f32 %v5262_v54  ;;  %v2502_v50 = vand.u32 2147483648, %v5250_v27  ;;  %vm2497_vm13 = vweird.f32 %v3259_v58  ;;  %vm1938_vm14 = vmor %vm1936_vm6, %vm1937_vm9 }
 0x3d1   : > { %v1935_v11 = vadd.f32 %v3257_v8, %v1934_v5  ;;  %v2494_v22 = vmul.f32 %v3259_v58, %v2493_v20  ;;  %v1834_v46 = vmul.f32 %v5335_v40, %v5278_v48  ;;  %v5357_v52 = vsel %vm5285_vm7, %v5260_v35, %v1827_v36  ;;  %vm5371_vm0 = vmor %vm2048_vm4, %vm2049_vm11 }
 0x3d2   : > { %vm1941_vm1 = vcmp.eq.f32.partialorder %v1940_v30, 8.507059e+37  ;;  %v1943_v55 = vor.u32 1.1754944e-38, %v1942_v57  ;;  %3264 = vrcp.f32 %v5333_v17  ;;  %vm5365_vm15 = vcmp.eq.f32.partialorder %v2164_v24, 8.507059e+37  ;;  %vm2498_vm6 = vmor %vm2496_vm8, %vm2497_vm13 }
 0x3d3   : > { %v1939_v35 = vsel %vm1938_vm14, %v3257_v8, %v1935_v11  ;;  %v2495_v32 = vadd.f32 %v3259_v58, %v2494_v22  ;;  %vm2501_vm7 = vcmp.eq.f32.partialorder %v2500_v42, 8.507059e+37  ;;  %v1835_v31 = vsub.f32 1.0, %v1834_v46 }
 0x3d4   : > { %v3263_v1 = vpop.eup %3262  ;;  %v2051_v63 = vsel %vm5371_vm0, %v5262_v54, %v2047_v61  ;;  %v1944_v59 = vsel %vm1941_vm1, %v1943_v55, %v1939_v35  ;;  %v2503_v24 = vor.u32 1.1754944e-38, %v2502_v50  ;;  %vm1838_vm4 = vweird.f32 %v5278_v48  ;;  %v5452_v35 = vpop.xlane.xlu2 %1753 }
 0x3d5   : > { %v2163_v0 = vsel %vm5348_vm12, %v5228_v9, %v2159_v43  ;;  %v2716_v41 = vsel %vm1227_vm3, %v1944_v59, %v2684_v19  ;;  %v2499_v8 = vsel %vm2498_vm6, %v3259_v58, %v2495_v32  ;;  %v2268_v54 = vmul.f32 %v3263_v1, %v5302_v53  ;;  %v6503_v58 = vld [vmem:[#allocation8_spill] sm:$0xff] }
 0x3d6   : > { %v2748_v7 = vmul.f32 %v6502_v25, %v2716_v41  ;;  %v2504_v49 = vsel %vm2501_vm7, %v2503_v24, %v2499_v8  ;;  %v1836_v27 = vmul.f32 %v5335_v40, %v1835_v31  ;;  %v1842_v10 = vand.u32 2147483647, %v5278_v48  ;;  %v6512_v8 = vld [vmem:[#allocation31_spill] sm:$0xff] }
 0x3d7   : > { %v2056_v21 = vsel %vm5322_vm5, %v2055_v3, %v2051_v63  ;;  %v2692_v60 = vsel %vm3737_vm2, %v2504_v49, 1.0  ;;  %v2269_v9 = vsub.f32 1.0, %v2268_v54  ;;  %v2276_v37 = vand.u32 2147483647, %v5302_v53  ;;  %v5407_v3 = vpop.xlane.xlu0 %1767 }
 0x3d8   : > { %v5398_v19 = vpop.eup %3264  ;;  %v2780_v30 = vsel %vm4719_vm10, %v2748_v7, %v6503_v58  ;;  %v2724_v36 = vsel %vm1227_vm3, %v2056_v21, %v2692_v60  ;;  %v2278_v39 = vand.u32 2147483648, %v5302_v53  ;;  %3266 = vrcp.f32 %v5382_v62  ;;  %v6513_v21 = vld [vmem:[#allocation9_spill] sm:$0xff] }
 0x3d9   : > { %2812 = vst [vmem:[%s6337_s5 + $0x58] sm:$0xff] %v2780_v30  ;;  %v2756_v23 = vmul.f32 %v6504_v47, %v2724_v36  ;;  %v2270_v4 = vmul.f32 %v3263_v1, %v2269_v9  ;;  %vm2273_vm5 = vweird.f32 %v3263_v1  ;;  %v1946_v13 = vmul.f32 %v5398_v19, %v5333_v17  ;;  %v5495_v47 = vpop.xlane.xlu1 %1769  ;;  %v6528_v36 = vld [vmem:[#allocation35_spill] sm:$0xff] }
 0x3da   : > { %v1837_v57 = vadd.f32 %v5335_v40, %v1836_v27  ;;  %vm1839_vm8 = vweird.f32 %v5335_v40  ;;  %v1844_v42 = vand.u32 2147483648, %v5278_v48  ;;  %vm2272_vm9 = vweird.f32 %v5302_v53 }
 0x3db   : > { %v2788_v5 = vsel %vm4719_vm10, %v2756_v23, %v6505_v38  ;;  %v2271_v20 = vadd.f32 %v3263_v1, %v2270_v4  ;;  %v1947_v43 = vsub.f32 1.0, %v1946_v13  ;;  %3268 = vrcp.f32 %v5407_v3  ;;  %vm2274_vm11 = vmor %vm2272_vm9, %vm2273_vm5 }
 0x3dc   : > { %v5428_v61 = vsel %vm5365_vm15, %v5282_v2, %v2163_v0  ;;  %2820 = vst [vmem:[%s6337_s5 + $0x98] sm:$0xff] %v2788_v5  ;;  %v2279_v53 = vor.u32 1.1754944e-38, %v2278_v39  ;;  %v1954_v50 = vand.u32 2147483647, %v5333_v17  ;;  %v1956_v45 = vand.u32 2147483648, %v5333_v17  ;;  %vm5437_vm12 = vmor %vm1838_vm4, %vm1839_vm8 }
 0x3dd   : > { %vm5441_vm13 = vcmp.eq.f32.partialorder %v1842_v10, 8.507059e+37  ;;  %v2275_v2 = vsel %vm2274_vm11, %v3263_v1, %v2271_v20  ;;  %vm2277_vm14 = vcmp.eq.f32.partialorder %v2276_v37, 8.507059e+37  ;;  %3270 = vrcp.f32 %v5419_v33 }
 0x3de   : > { %v5446_v46 = vpop.eup %3266  ;;  %v1841_v55 = vsel %vm5437_vm12, %v5335_v40, %v1837_v57  ;;  %v1845_v16 = vor.u32 1.1754944e-38, %v1844_v42  ;;  %v2280_v48 = vsel %vm2277_vm14, %v2279_v53, %v2275_v2  ;;  %v1948_v18 = vmul.f32 %v5398_v19, %v1947_v43  ;;  %v6529_v42 = vld [vmem:[#allocation11_spill] sm:$0xff] }
 0x3df   : > { %v2676_v32 = vsel %vm3737_vm2, %v2280_v48, 1.0  ;;  %vm1950_vm1 = vweird.f32 %v5333_v17  ;;  %v2170_v31 = vmul.f32 %v5446_v46, %v5382_v62  ;;  %v2180_v1 = vand.u32 2147483648, %v5382_v62  ;;  %v5479_v27 = vpop.xlane.xlu0 %1737 }
 0x3e0   : > { %v2708_v40 = vsel %vm1227_vm3, %v5357_v52, %v2676_v32  ;;  %vm5463_vm15 = vcmp.eq.f32.partialorder %v1954_v50, 8.507059e+37  ;;  %v1957_v59 = vor.u32 1.1754944e-38, %v1956_v45  ;;  %v2612_v24 = vand.u32 2147483647, %v5407_v3  ;;  %v5524_v45 = vpop.xlane.xlu2 %1643 }
 0x3e1   : > { %v3269_v0 = vpop.eup %3268  ;;  %v5470_v41 = vsel %vm5441_vm13, %v1845_v16, %v1841_v55  ;;  %v2740_v54 = vmul.f32 %v6512_v8, %v2708_v40  ;;  %v2171_v25 = vsub.f32 1.0, %v2170_v31  ;;  %vm2174_vm0 = vweird.f32 %v5382_v62 }
 0x3e2   : > { %3272 = vrcp.f32 %v5452_v35  ;;  %v1949_v52 = vadd.f32 %v5398_v19, %v1948_v18  ;;  %vm1951_vm7 = vweird.f32 %v5398_v19  ;;  %v2178_v7 = vand.u32 2147483647, %v5382_v62 }
 0x3e3   : > { %v2604_v49 = vmul.f32 %v3269_v0, %v5407_v3  ;;  %v3271_v10 = vpop.eup %3270  ;;  %v2772_v60 = vsel %vm4719_vm10, %v2740_v54, %v6513_v21  ;;  %v2181_v9 = vor.u32 1.1754944e-38, %v2180_v1  ;;  %vm2608_vm6 = vweird.f32 %v5407_v3  ;;  %vm5501_vm5 = vmor %vm1950_vm1, %vm1951_vm7 }
 0x3e4   : > { %v2614_v37 = vand.u32 2147483648, %v5407_v3  ;;  %2804 = vst [vmem:[%s6337_s5 + $0x18] sm:$0xff] %v2772_v60  ;;  %v2172_v58 = vmul.f32 %v5446_v46, %v2171_v25  ;;  %vm5490_vm4 = vcmp.eq.f32.partialorder %v2612_v24, 8.507059e+37  ;;  %v2282_v39 = vmul.f32 %v3271_v10, %v5419_v33 }
 0x3e5   : > { %v2605_v30 = vsub.f32 1.0, %v2604_v49  ;;  %vm2286_vm8 = vweird.f32 %v5419_v33  ;;  %v2290_v4 = vand.u32 2147483647, %v5419_v33  ;;  %v2292_v13 = vand.u32 2147483648, %v5419_v33 }
 0x3e6   : > { %3274 = vrcp.f32 %v5479_v27  ;;  %v1953_v57 = vsel %vm5501_vm5, %v5398_v19, %v1949_v52  ;;  %vm5512_vm9 = vcmp.eq.f32.partialorder %v2178_v7, 8.507059e+37  ;;  %vm2609_vm11 = vweird.f32 %v3269_v0  ;;  %v6524_v52 = vld [vmem:[#allocation33_spill] sm:$0xff] }
 0x3e7   : > { %v2606_v17 = vmul.f32 %v3269_v0, %v2605_v30  ;;  %v2283_v38 = vsub.f32 1.0, %v2282_v39  ;;  %vm2175_vm12 = vweird.f32 %v5446_v46  ;;  %vm2287_vm13 = vweird.f32 %v3271_v10  ;;  %vm2610_vm14 = vmor %vm2608_vm6, %vm2609_vm11 }
 0x3e8   : > { %v5516_v5 = vpop.eup %3272  ;;  %v2516_v20 = vand.u32 2147483648, %v5452_v35  ;;  %3276 = vrcp.f32 %v5495_v47  ;;  %v2173_v43 = vadd.f32 %v5446_v46, %v2172_v58  ;;  %v5528_v11 = vsel %vm5463_vm15, %v1957_v59, %v1953_v57  ;;  %vm5538_vm7 = vmor %vm2174_vm0, %vm2175_vm12  ;;  %v6527_v58 = vld [vmem:[#allocation10_spill] sm:$0xff] }
 0x3e9   : > { %v2607_v53 = vadd.f32 %v3269_v0, %v2606_v17  ;;  %v2284_v19 = vmul.f32 %v3271_v10, %v2283_v38  ;;  %v2506_v50 = vmul.f32 %v5516_v5, %v5452_v35  ;;  %v2615_v22 = vor.u32 1.1754944e-38, %v2614_v37  ;;  %vm2288_vm15 = vmor %vm2286_vm8, %vm2287_vm13 }
 0x3ea   : > { %vm5532_vm1 = vcmp.eq.f32.partialorder %v2290_v4, 8.507059e+37  ;;  %v2293_v55 = vor.u32 1.1754944e-38, %v2292_v13  ;;  %v2514_v31 = vand.u32 2147483647, %v5452_v35  ;;  %vm2510_vm6 = vweird.f32 %v5452_v35 }
 0x3eb   : > { %v2611_v48 = vsel %vm2610_vm14, %v3269_v0, %v2607_v53  ;;  %v2285_v18 = vadd.f32 %v3271_v10, %v2284_v19  ;;  %v2507_v32 = vsub.f32 1.0, %v2506_v50  ;;  %v5549_v62 = vor.u32 1.1754944e-38, %v2516_v20  ;;  %v5601_v53 = vpop.xlane.xlu1 %1739  ;;  %v5603_v19 = vpop.xlane.xlu2 %1723 }
 0x3ec   : > { %v3275_v1 = vpop.eup %3274  ;;  %v2616_v3 = vsel %vm5490_vm4, %v2615_v22, %v2611_v48  ;;  %vm2398_vm0 = vweird.f32 %v5479_v27  ;;  %3278 = vrcp.f32 %v5524_v45  ;;  %v2177_v40 = vsel %vm5538_vm7, %v5446_v46, %v2173_v43 }
 0x3ed   : > { %v2700_v63 = vsel %vm3737_vm2, %v2616_v3, 1.0  ;;  %v2289_v59 = vsel %vm2288_vm15, %v3271_v10, %v2285_v18  ;;  %v2394_v24 = vmul.f32 %v3275_v1, %v5479_v27  ;;  %v2508_v54 = vmul.f32 %v5516_v5, %v2507_v32 }
 0x3ee   : > { %v3277_v33 = vpop.eup %3276  ;;  %v2732_v0 = vsel %vm1227_vm3, %v5428_v61, %v2700_v63  ;;  %v2294_v8 = vsel %vm5532_vm1, %v2293_v55, %v2289_v59  ;;  %v2402_v25 = vand.u32 2147483647, %v5479_v27  ;;  %v2404_v10 = vand.u32 2147483648, %v5479_v27  ;;  %v6532_v59 = vld [vmem:[#allocation36_spill] sm:$0xff] }
 0x3ef   : > { %v2764_v46 = vmul.f32 %v6524_v52, %v2732_v0  ;;  %v2677_v7 = vsel %vm3737_vm2, %v2294_v8, 1.0  ;;  %v2395_v49 = vsub.f32 1.0, %v2394_v24  ;;  %v2182_v21 = vsel %vm5512_vm9, %v2181_v9, %v2177_v40  ;;  %v5585_v9 = vpop.xlane.xlu0 %1657 }
 0x3f0   : > { %v2709_v61 = vsel %vm1227_vm3, %v5470_v41, %v2677_v7  ;;  %vm5575_vm4 = vcmp.eq.f32.partialorder %v2514_v31, 8.507059e+37  ;;  %v2618_v37 = vmul.f32 %v3277_v33, %v5495_v47  ;;  %vm2622_vm5 = vweird.f32 %v5495_v47 }
 0x3f1   : > { %v2796_v30 = vsel %vm4719_vm10, %v2764_v46, %v6527_v58  ;;  %v2741_v39 = vmul.f32 %v6528_v36, %v2709_v61  ;;  %v2396_v23 = vmul.f32 %v3275_v1, %v2395_v49  ;;  %vm2399_vm8 = vweird.f32 %v3275_v1  ;;  %v6536_v61 = vld [vmem:[#allocation37_spill] sm:$0xff] }
 0x3f2   : > { %v5587_v4 = vpop.eup %3278  ;;  %2828 = vst [vmem:[%s6337_s5 + $0xd8] sm:$0xff] %v2796_v30  ;;  %v2509_v41 = vadd.f32 %v5516_v5, %v2508_v54  ;;  %vm2511_vm9 = vweird.f32 %v5516_v5  ;;  %v2619_v13 = vsub.f32 1.0, %v2618_v37  ;;  %v2626_v57 = vand.u32 2147483647, %v5495_v47  ;;  %vm2400_vm11 = vmor %vm2398_vm0, %vm2399_vm8 }
 0x3f3   : > { %v2773_v17 = vsel %vm4719_vm10, %v2741_v39, %v6529_v42  ;;  %v2397_v38 = vadd.f32 %v3275_v1, %v2396_v23  ;;  %v2628_v20 = vand.u32 2147483648, %v5495_v47  ;;  %v1960_v43 = vmul.f32 %v5587_v4, %v5524_v45  ;;  %vm5616_vm13 = vmor %vm2510_vm6, %vm2511_vm9  ;;  %v5670_v39 = vpop.xlane.xlu2 %1741  ;;  %v6539_v23 = vld [vmem:[#allocation14_spill] sm:$0xff] }
 0x3f4   : > { %2805 = vst [vmem:[%s6337_s5 + $0x20] sm:$0xff] %v2773_v17  ;;  %v2405_v50 = vor.u32 1.1754944e-38, %v2404_v10  ;;  %v2620_v22 = vmul.f32 %v3277_v33, %v2619_v13  ;;  %vm2623_vm12 = vweird.f32 %v3277_v33  ;;  %3280 = vrcp.f32 %v5585_v9  ;;  %v6549_v13 = vld [vmem:[#allocation17_spill] sm:$0xff] }
 0x3f5   : > { %v2401_v55 = vsel %vm2400_vm11, %v3275_v1, %v2397_v38  ;;  %vm2403_vm14 = vcmp.eq.f32.partialorder %v2402_v25, 8.507059e+37  ;;  %v1961_v16 = vsub.f32 1.0, %v1960_v43  ;;  %v1968_v48 = vand.u32 2147483647, %v5524_v45  ;;  %vm2624_vm1 = vmor %vm2622_vm5, %vm2623_vm12 }
 0x3f6   : > { %v2513_v27 = vsel %vm5616_vm13, %v5516_v5, %v2509_v41  ;;  %v2406_v18 = vsel %vm2403_vm14, %v2405_v50, %v2401_v55  ;;  %v2621_v32 = vadd.f32 %v3277_v33, %v2620_v22  ;;  %3282 = vrcp.f32 %v5601_v53  ;;  %v5695_v22 = vpop.xlane.xlu1 %1659 }
 0x3f7   : > { %v2685_v35 = vsel %vm3737_vm2, %v2406_v18, 1.0  ;;  %vm2627_vm7 = vcmp.eq.f32.partialorder %v2626_v57, 8.507059e+37  ;;  %v2629_v31 = vor.u32 1.1754944e-38, %v2628_v20  ;;  %v1962_v1 = vmul.f32 %v5587_v4, %v1961_v16  ;;  %v5655_v7 = vpop.xlane.xlu0 %1627 }
 0x3f8   : > { %v2717_v3 = vsel %vm1227_vm3, %v5528_v11, %v2685_v35  ;;  %v2625_v40 = vsel %vm2624_vm1, %v3277_v33, %v2621_v32  ;;  %vm1964_vm15 = vweird.f32 %v5524_v45  ;;  %v1970_v5 = vand.u32 2147483648, %v5524_v45  ;;  %v6535_v33 = vld [vmem:[#allocation13_spill] sm:$0xff] }
 0x3f9   : > { %v2518_v63 = vsel %vm5575_vm4, %v5549_v62, %v2513_v27  ;;  %v2749_v47 = vmul.f32 %v6532_v59, %v2717_v3  ;;  %v2630_v24 = vsel %vm2627_vm7, %v2629_v31, %v2625_v40  ;;  %v2066_v0 = vand.u32 2147483647, %v5585_v9 }
 0x3fa   : > { %v3281_v8 = vpop.eup %3280  ;;  %v2701_v54 = vsel %vm3737_vm2, %v2630_v24, 1.0  ;;  %vm1965_vm6 = vweird.f32 %v5587_v4  ;;  %vm5643_vm0 = vcmp.eq.f32.partialorder %v1968_v48, 8.507059e+37  ;;  %3284 = vrcp.f32 %v5603_v19  ;;  %v6546_v24 = vld [vmem:[#allocation38_spill] sm:$0xff] }
 0x3fb   : > { %v2781_v62 = vsel %vm4719_vm10, %v2749_v47, %v6535_v33  ;;  %v2733_v25 = vsel %vm1227_vm3, %v2182_v21, %v2701_v54  ;;  %v1963_v52 = vadd.f32 %v5587_v4, %v1962_v1  ;;  %v2058_v46 = vmul.f32 %v3281_v8, %v5585_v9  ;;  %vm5679_vm8 = vmor %vm1964_vm15, %vm1965_vm6 }
 0x3fc   : > { %v3283_v49 = vpop.eup %3282  ;;  %v2693_v10 = vsel %vm3737_vm2, %v2518_v63, 1.0  ;;  %2813 = vst [vmem:[%s6337_s5 + $0x60] sm:$0xff] %v2781_v62  ;;  %v2765_v60 = vmul.f32 %v6536_v61, %v2733_v25  ;;  %v1971_v37 = vor.u32 1.1754944e-38, %v1970_v5  ;;  %v2068_v58 = vand.u32 2147483648, %v5585_v9 }
 0x3fd   : > { %v2059_v21 = vsub.f32 1.0, %v2058_v46  ;;  %vm2062_vm4 = vweird.f32 %v5585_v9  ;;  %vm5665_vm5 = vcmp.eq.f32.partialorder %v2066_v0, 8.507059e+37  ;;  %v2408_v36 = vmul.f32 %v3283_v49, %v5601_v53  ;;  %v6547_v46 = vld [vmem:[#allocation15_spill] sm:$0xff] }
 0x3fe   : > { %v2797_v41 = vsel %vm4719_vm10, %v2765_v60, %v6539_v23  ;;  %vm2412_vm9 = vweird.f32 %v5601_v53  ;;  %v2416_v57 = vand.u32 2147483647, %v5601_v53  ;;  %3286 = vrcp.f32 %v5655_v7 }
 0x3ff   : > { %2829 = vst [vmem:[%s6337_s5 + $0xe0] sm:$0xff] %v2797_v41  ;;  %v1967_v42 = vsel %vm5679_vm8, %v5587_v4, %v1963_v52  ;;  %v2060_v17 = vmul.f32 %v3281_v8, %v2059_v21  ;;  %vm2063_vm11 = vweird.f32 %v3281_v8  ;;  %v2409_v45 = vsub.f32 1.0, %v2408_v36  ;;  %v5726_v11 = vpop.xlane.xlu0 %1675  ;;  %v5751_v41 = vpop.xlane.xlu1 %1629 }
 0x400   : > { %v3285_v38 = vpop.eup %3284  ;;  %v2069_v20 = vor.u32 1.1754944e-38, %v2068_v58  ;;  %v2418_v43 = vand.u32 2147483648, %v5601_v53  ;;  %v2304_v50 = vand.u32 2147483647, %v5603_v19  ;;  %3288 = vrcp.f32 %v5670_v39  ;;  %vm2064_vm13 = vmor %vm2062_vm4, %vm2063_vm11 }
 0x401   : > { %v2061_v2 = vadd.f32 %v3281_v8, %v2060_v17  ;;  %v2410_v55 = vmul.f32 %v3283_v49, %v2409_v45  ;;  %vm2413_vm12 = vweird.f32 %v3283_v49  ;;  %v2296_v16 = vmul.f32 %v3285_v38, %v5603_v19 }
 0x402   : > { %v1972_v4 = vsel %vm5643_vm0, %v1971_v37, %v1967_v42  ;;  %vm5702_vm14 = vcmp.eq.f32.partialorder %v2416_v57, 8.507059e+37  ;;  %vm2300_vm1 = vweird.f32 %v5603_v19  ;;  %v2306_v27 = vand.u32 2147483648, %v5603_v19  ;;  %vm2414_vm7 = vmor %vm2412_vm9, %vm2413_vm12  ;;  %v6548_v37 = vld [vmem:[#allocation39_spill] sm:$0xff] }
 0x403   : > { %v2065_v18 = vsel %vm2064_vm13, %v3281_v8, %v2061_v2  ;;  %v2411_v32 = vadd.f32 %v3283_v49, %v2410_v55  ;;  %v2297_v35 = vsub.f32 1.0, %v2296_v16  ;;  %3290 = vrcp.f32 %v5695_v22  ;;  %v6550_v16 = vld [vmem:[#allocation40_spill] sm:$0xff] }
 0x404   : > { %v3287_v31 = vpop.eup %3286  ;;  %v2070_v1 = vsel %vm5665_vm5, %v2069_v20, %v2065_v18  ;;  %v2419_v9 = vor.u32 1.1754944e-38, %v2418_v43  ;;  %vm2301_vm15 = vweird.f32 %v3285_v38  ;;  %vm5713_vm6 = vcmp.eq.f32.partialorder %v2304_v50, 8.507059e+37  ;;  %v5765_v20 = vpop.xlane.xlu2 %1661 }
 0x405   : > { %v2725_v40 = vsel %vm1227_vm3, %v2070_v1, %v2693_v10  ;;  %v2415_v5 = vsel %vm2414_vm7, %v3283_v49, %v2411_v32  ;;  %v2298_v63 = vmul.f32 %v3285_v38, %v2297_v35  ;;  %v1848_v59 = vmul.f32 %v3287_v31, %v5655_v7  ;;  %vm2302_vm0 = vmor %vm2300_vm1, %vm2301_vm15 }
 0x406   : > { %v5720_v47 = vpop.eup %3288  ;;  %v2757_v0 = vmul.f32 %v6546_v24, %v2725_v40  ;;  %v2420_v53 = vsel %vm5702_vm14, %v2419_v9, %v2415_v5  ;;  %v2307_v8 = vor.u32 1.1754944e-38, %v2306_v27  ;;  %v1856_v54 = vand.u32 2147483647, %v5655_v7 }
 0x407   : > { %v2686_v33 = vsel %vm3737_vm2, %v2420_v53, 1.0  ;;  %v2299_v62 = vadd.f32 %v3285_v38, %v2298_v63  ;;  %v1849_v25 = vsub.f32 1.0, %v1848_v59  ;;  %v2422_v52 = vmul.f32 %v5720_v47, %v5670_v39  ;;  %v5775_v18 = vpop.xlane.xlu0 %1755  ;;  %v5802_v24 = vpop.xlane.xlu1 %1677 }
 0x408   : > { %v2789_v49 = vsel %vm4719_vm10, %v2757_v0, %v6547_v46  ;;  %v2718_v10 = vsel %vm1227_vm3, %v1972_v4, %v2686_v33  ;;  %vm1853_vm4 = vweird.f32 %v3287_v31  ;;  %v1858_v61 = vand.u32 2147483648, %v5655_v7 }
 0x409   : > { %v5741_v60 = vpop.eup %3290  ;;  %2821 = vst [vmem:[%s6337_s5 + $0xa0] sm:$0xff] %v2789_v49  ;;  %v2750_v58 = vmul.f32 %v6548_v37, %v2718_v10  ;;  %v2303_v21 = vsel %vm2302_vm0, %v3285_v38, %v2299_v62  ;;  %v1850_v30 = vmul.f32 %v3287_v31, %v1849_v25  ;;  %v2423_v36 = vsub.f32 1.0, %v2422_v52 }
 0x40a   : > { %v2308_v23 = vsel %vm5713_vm6, %v2307_v8, %v2303_v21  ;;  %v2072_v19 = vmul.f32 %v5741_v60, %v5695_v22  ;;  %vm1852_vm5 = vweird.f32 %v5655_v7  ;;  %v1859_v45 = vor.u32 1.1754944e-38, %v1858_v61 }
 0x40b   : > { %v2782_v57 = vsel %vm4719_vm10, %v2750_v58, %v6549_v13  ;;  %v1851_v42 = vadd.f32 %v3287_v31, %v1850_v30  ;;  %v2678_v17 = vsel %vm3737_vm2, %v2308_v23, 1.0  ;;  %vm1854_vm8 = vmor %vm1852_vm5, %vm1853_vm4  ;;  %v2424_v38 = vmul.f32 %v5720_v47, %v2423_v36 }
 0x40c   : > { %2814 = vst [vmem:[%s6337_s5 + $0x68] sm:$0xff] %v2782_v57  ;;  %3292 = vrcp.f32 %v5726_v11  ;;  %vm1857_vm9 = vcmp.eq.f32.partialorder %v1856_v54, 8.507059e+37  ;;  %v2073_v50 = vsub.f32 1.0, %v2072_v19  ;;  %v2430_v55 = vand.u32 2147483647, %v5670_v39  ;;  %v5814_v62 = vpop.xlane.xlu2 %1631 }
 0x40d   : > { %v1855_v43 = vsel %vm1854_vm8, %v3287_v31, %v1851_v42  ;;  %3294 = vrcp.f32 %v5751_v41  ;;  %v2425_v48 = vadd.f32 %v5720_v47, %v2424_v38  ;;  %vm2427_vm11 = vweird.f32 %v5720_v47  ;;  %v6551_v31 = vld [vmem:[#allocation16_spill] sm:$0xff] }
 0x40e   : > { %v1860_v7 = vsel %vm1857_vm9, %v1859_v45, %v1855_v43  ;;  %v2432_v27 = vand.u32 2147483648, %v5670_v39  ;;  %v2074_v32 = vmul.f32 %v5741_v60, %v2073_v50  ;;  %3296 = vrcp.f32 %v5765_v20  ;;  %v6572_v50 = vld [vmem:[#allocation41_spill] sm:$0xff] }
 0x40f   : > { %v2710_v2 = vsel %vm1227_vm3, %v1860_v7, %v2678_v17  ;;  %vm2426_vm12 = vweird.f32 %v5670_v39  ;;  %v2080_v9 = vand.u32 2147483647, %v5695_v22  ;;  %v2082_v3 = vand.u32 2147483648, %v5695_v22  ;;  %v5842_v57 = vpop.xlane.xlu0 %1645  ;;  %v5875_v40 = vpop.xlane.xlu1 %1757 }
 0x410   : > { %v2742_v4 = vmul.f32 %v6550_v16, %v2710_v2  ;;  %vm5790_vm13 = vmor %vm2426_vm12, %vm2427_vm11  ;;  %vm2431_vm14 = vcmp.eq.f32.partialorder %v2430_v55, 8.507059e+37  ;;  %v2433_v59 = vor.u32 1.1754944e-38, %v2432_v27  ;;  %3298 = vrcp.f32 %v5775_v18 }
 0x411   : > { %v2429_v39 = vsel %vm5790_vm13, %v5720_v47, %v2425_v48  ;;  %v2075_v0 = vadd.f32 %v5741_v60, %v2074_v32  ;;  %vm2077_vm1 = vweird.f32 %v5741_v60  ;;  %vm2076_vm7 = vweird.f32 %v5695_v22 }
 0x412   : > { %v5779_v35 = vpop.eup %3292  ;;  %v2774_v1 = vsel %vm4719_vm10, %v2742_v4, %v6551_v31  ;;  %vm5809_vm15 = vcmp.eq.f32.partialorder %v2080_v9, 8.507059e+37  ;;  %v2083_v47 = vor.u32 1.1754944e-38, %v2082_v3  ;;  %v2194_v33 = vand.u32 2147483648, %v5726_v11  ;;  %vm5822_vm0 = vmor %vm2076_vm7, %vm2077_vm1 }
 0x413   : > { %2806 = vst [vmem:[%s6337_s5 + $0x28] sm:$0xff] %v2774_v1  ;;  %v2184_v5 = vmul.f32 %v5779_v35, %v5726_v11  ;;  %v5796_v63 = vpop.eup %3294  ;;  %v5818_v52 = vsel %vm2431_vm14, %v2433_v59, %v2429_v39  ;;  %vm2188_vm6 = vweird.f32 %v5726_v11  ;;  %3300 = vrcp.f32 %v5802_v24 }
 0x414   : > { %v1862_v8 = vmul.f32 %v5796_v63, %v5751_v41  ;;  %v5816_v25 = vpop.eup %3296  ;;  %v2192_v49 = vand.u32 2147483647, %v5726_v11  ;;  %v1870_v10 = vand.u32 2147483647, %v5751_v41  ;;  %v1872_v61 = vand.u32 2147483648, %v5751_v41 }
 0x415   : > { %v2185_v53 = vsub.f32 1.0, %v2184_v5  ;;  %v2086_v37 = vmul.f32 %v5816_v25, %v5765_v20  ;;  %v2079_v58 = vsel %vm5822_vm0, %v5741_v60, %v2075_v0  ;;  %vm1866_vm4 = vweird.f32 %v5751_v41 }
 0x416   : > { %v1863_v46 = vsub.f32 1.0, %v1862_v8  ;;  %3302 = vrcp.f32 %v5814_v62  ;;  %v3299_v30 = vpop.eup %3298  ;;  %v2687_v36 = vsel %vm3737_vm2, %v5818_v52, 1.0  ;;  %v2195_v23 = vor.u32 1.1754944e-38, %v2194_v33 }
 0x417   : > { %v2186_v21 = vmul.f32 %v5779_v35, %v2185_v53  ;;  %v2096_v13 = vand.u32 2147483648, %v5765_v20  ;;  %v2087_v42 = vsub.f32 1.0, %v2086_v37  ;;  %v2094_v60 = vand.u32 2147483647, %v5765_v20  ;;  %v5967_v3 = vpop.xlane.xlu1 %1647 }
 0x418   : > { %v1864_v19 = vmul.f32 %v5796_v63, %v1863_v46  ;;  %v2520_v17 = vmul.f32 %v3299_v30, %v5775_v18  ;;  %v2528_v45 = vand.u32 2147483647, %v5775_v18  ;;  %v2084_v38 = vsel %vm5809_vm15, %v2083_v47, %v2079_v58  ;;  %v5908_v46 = vpop.xlane.xlu2 %1679 }
 0x419   : > { %vm2189_vm5 = vweird.f32 %v5779_v35  ;;  %vm5850_vm8 = vcmp.eq.f32.partialorder %v2192_v49, 8.507059e+37  ;;  %vm5854_vm9 = vcmp.eq.f32.partialorder %v1870_v10, 8.507059e+37  ;;  %v1873_v7 = vor.u32 1.1754944e-38, %v1872_v61  ;;  %v5859_v2 = vpop.eup %3300 }
 0x41a   : > { %vm2524_vm11 = vweird.f32 %v5775_v18  ;;  %v2187_v55 = vadd.f32 %v5779_v35, %v2186_v21  ;;  %vm2090_vm12 = vweird.f32 %v5765_v20  ;;  %v2521_v16 = vsub.f32 1.0, %v2520_v17  ;;  %vm5881_vm7 = vmor %vm2188_vm6, %vm2189_vm5  ;;  %v5925_v21 = vpop.xlane.xlu0 %1725 }
 0x41b   : > { %v2530_v4 = vand.u32 2147483648, %v5775_v18  ;;  %v2208_v48 = vand.u32 2147483648, %v5802_v24  ;;  %v1865_v27 = vadd.f32 %v5796_v63, %v1864_v19  ;;  %vm1867_vm13 = vweird.f32 %v5796_v63 }
 0x41c   : > { %v2097_v32 = vor.u32 1.1754944e-38, %v2096_v13  ;;  %3304 = vrcp.f32 %v5842_v57  ;;  %v5868_v31 = vpop.eup %3302  ;;  %v2088_v1 = vmul.f32 %v5816_v25, %v2087_v42  ;;  %v2522_v9 = vmul.f32 %v3299_v30, %v2521_v16  ;;  %vm5898_vm6 = vmor %vm1866_vm4, %vm1867_vm13 }
 0x41d   : > { %vm2525_vm14 = vweird.f32 %v3299_v30  ;;  %vm5871_vm1 = vcmp.eq.f32.partialorder %v2528_v45, 8.507059e+37  ;;  %vm2091_vm15 = vweird.f32 %v5816_v25  ;;  %v2198_v39 = vmul.f32 %v5859_v2, %v5802_v24 }
 0x41e   : > { %v2206_v59 = vand.u32 2147483647, %v5802_v24  ;;  %v1876_v0 = vmul.f32 %v5868_v31, %v5814_v62  ;;  %v2191_v53 = vsel %vm5881_vm7, %v5779_v35, %v2187_v55  ;;  %vm5902_vm0 = vcmp.eq.f32.partialorder %v2094_v60, 8.507059e+37  ;;  %vm2526_vm4 = vmor %vm2524_vm11, %vm2525_vm14 }
 0x41f   : > { %v2523_v54 = vadd.f32 %v3299_v30, %v2522_v9  ;;  %v2531_v47 = vor.u32 1.1754944e-38, %v2530_v4  ;;  %v5906_v33 = vor.u32 1.1754944e-38, %v2208_v48  ;;  %v1869_v35 = vsel %vm5898_vm6, %v5796_v63, %v1865_v27  ;;  %vm5942_vm11 = vmor %vm2090_vm12, %vm2091_vm15  ;;  %v6575_v27 = vld [vmem:[#allocation19_spill] sm:$0xff] }
 0x420   : > { %v1877_v41 = vsub.f32 1.0, %v1876_v0  ;;  %v1886_v22 = vand.u32 2147483648, %v5814_v62  ;;  %3306 = vrcp.f32 %v5875_v40  ;;  %v2089_v49 = vadd.f32 %v5816_v25, %v2088_v1 }
 0x421   : > { %v2527_v10 = vsel %vm2526_vm4, %v3299_v30, %v2523_v54  ;;  %vm1880_vm5 = vweird.f32 %v5814_v62  ;;  %v1884_v61 = vand.u32 2147483647, %v5814_v62  ;;  %v2199_v58 = vsub.f32 1.0, %v2198_v39 }
 0x422   : > { %v3305_v37 = vpop.eup %3304  ;;  %v2532_v63 = vsel %vm5871_vm1, %v2531_v47, %v2527_v10  ;;  %v1878_v18 = vmul.f32 %v5868_v31, %v1877_v41  ;;  %3308 = vrcp.f32 %v5908_v46  ;;  %v5929_v19 = vsel %vm5850_vm8, %v2195_v23, %v2191_v53 }
 0x423   : > { %v5933_v30 = vsel %vm5854_vm9, %v1873_v7, %v1869_v35  ;;  %v2694_v13 = vsel %vm3737_vm2, %v2532_v63, 1.0  ;;  %v1974_v42 = vmul.f32 %v3305_v37, %v5842_v57  ;;  %v1887_v17 = vor.u32 1.1754944e-38, %v1886_v22  ;;  %v5989_v35 = vpop.xlane.xlu2 %1759 }
 0x424   : > { %v2726_v23 = vsel %vm1227_vm3, %v2084_v38, %v2694_v13  ;;  %vm1978_vm8 = vweird.f32 %v5842_v57  ;;  %v1982_v45 = vand.u32 2147483647, %v5842_v57  ;;  %v2093_v43 = vsel %vm5942_vm11, %v5816_v25, %v2089_v49 }
 0x425   : > { %v2758_v7 = vmul.f32 %v6572_v50, %v2726_v23  ;;  %vm5954_vm9 = vcmp.eq.f32.partialorder %v1884_v61, 8.507059e+37  ;;  %v1975_v55 = vsub.f32 1.0, %v1974_v42  ;;  %v1984_v16 = vand.u32 2147483648, %v5842_v57 }
 0x426   : > { %v3307_v4 = vpop.eup %3306  ;;  %v2200_v38 = vmul.f32 %v5859_v2, %v2199_v58  ;;  %v1879_v48 = vadd.f32 %v5868_v31, %v1878_v18  ;;  %vm1881_vm12 = vweird.f32 %v5868_v31  ;;  %3310 = vrcp.f32 %v5925_v21  ;;  %v6011_v18 = vpop.xlane.xlu0 %1743 }
 0x427   : > { %v2790_v25 = vsel %vm4719_vm10, %v2758_v7, %v6575_v27  ;;  %v1976_v1 = vmul.f32 %v3305_v37, %v1975_v55  ;;  %vm1979_vm13 = vweird.f32 %v3305_v37  ;;  %v2534_v9 = vmul.f32 %v3307_v4, %v5875_v40  ;;  %vm5984_vm1 = vmor %vm1880_vm5, %vm1881_vm12 }
 0x428   : > { %v5969_v5 = vpop.eup %3308  ;;  %v2098_v39 = vsel %vm5902_vm0, %v2097_v32, %v2093_v43  ;;  %2822 = vst [vmem:[%s6337_s5 + $0xa8] sm:$0xff] %v2790_v25  ;;  %vm5976_vm14 = vcmp.eq.f32.partialorder %v1982_v45, 8.507059e+37  ;;  %v2542_v53 = vand.u32 2147483647, %v5875_v40  ;;  %v2544_v11 = vand.u32 2147483648, %v5875_v40  ;;  %vm1980_vm15 = vmor %vm1978_vm8, %vm1979_vm13  ;;  %v6582_v45 = vld [vmem:[#allocation42_spill] sm:$0xff] }
 0x429   : > { %v1977_v8 = vadd.f32 %v3305_v37, %v1976_v1  ;;  %v1985_v32 = vor.u32 1.1754944e-38, %v1984_v16  ;;  %v2535_v47 = vsub.f32 1.0, %v2534_v9  ;;  %vm2538_vm7 = vweird.f32 %v5875_v40 }
 0x42a   : > { %v5992_v41 = vadd.f32 %v5859_v2, %v2200_v38  ;;  %v1883_v22 = vsel %vm5984_vm1, %v5868_v31, %v1879_v48  ;;  %v2212_v62 = vmul.f32 %v5969_v5, %v5908_v46  ;;  %3312 = vrcp.f32 %v5967_v3  ;;  %v6583_v38 = vld [vmem:[#allocation20_spill] sm:$0xff] }
 0x42b   : > { %v1981_v49 = vsel %vm1980_vm15, %v3305_v37, %v1977_v8  ;;  %v2536_v10 = vmul.f32 %v3307_v4, %v2535_v47  ;;  %vm2539_vm6 = vweird.f32 %v3307_v4  ;;  %v2222_v61 = vand.u32 2147483648, %v5908_v46  ;;  %v6059_v47 = vpop.xlane.xlu1 %1727 }
 0x42c   : > { %v3311_v63 = vpop.eup %3310  ;;  %v1986_v58 = vsel %vm5976_vm14, %v1985_v32, %v1981_v49  ;;  %vm6006_vm0 = vcmp.eq.f32.partialorder %v2542_v53, 8.507059e+37  ;;  %v2545_v57 = vor.u32 1.1754944e-38, %v2544_v11  ;;  %3314 = vrcp.f32 %v5989_v35  ;;  %vm2540_vm4 = vmor %vm2538_vm7, %vm2539_vm6 }
 0x42d   : > { %v2719_v37 = vsel %vm1227_vm3, %v1986_v58, %v2687_v36  ;;  %v2537_v13 = vadd.f32 %v3307_v4, %v2536_v10  ;;  %v2220_v42 = vand.u32 2147483647, %v5908_v46  ;;  %v2310_v60 = vmul.f32 %v3311_v63, %v5925_v21 }
 0x42e   : > { %v6023_v23 = vsel %vm5954_vm9, %v1887_v17, %v1883_v22  ;;  %v2751_v43 = vmul.f32 %v6582_v45, %v2719_v37  ;;  %v2213_v50 = vsub.f32 1.0, %v2212_v62  ;;  %vm2314_vm5 = vweird.f32 %v5925_v21  ;;  %v6584_v22 = vld [vmem:[#allocation22_spill] sm:$0xff]  ;;  %v6077_v31 = vpop.xlane.xlu0 %1663  ;;  %v6087_v45 = vpop.xlane.xlu2 %1771 }
 0x42f   : > { %v2541_v52 = vsel %vm2540_vm4, %v3307_v4, %v2537_v13  ;;  %v6029_v7 = vor.u32 1.1754944e-38, %v2222_v61  ;;  %v2311_v36 = vsub.f32 1.0, %v2310_v60  ;;  %v2318_v55 = vand.u32 2147483647, %v5925_v21 }
 0x430   : > { %v6032_v16 = vpop.eup %3312  ;;  %v2783_v17 = vsel %vm4719_vm10, %v2751_v43, %v6583_v38  ;;  %v2546_v20 = vsel %vm6006_vm0, %v2545_v57, %v2541_v52  ;;  %vm2216_vm11 = vweird.f32 %v5908_v46  ;;  %vm2217_vm8 = vweird.f32 %v5969_v5 }
 0x431   : > { %v2320_v40 = vand.u32 2147483648, %v5925_v21  ;;  %2815 = vst [vmem:[%s6337_s5 + $0x70] sm:$0xff] %v2783_v17  ;;  %v2695_v4 = vsel %vm3737_vm2, %v2546_v20, 1.0  ;;  %v2312_v48 = vmul.f32 %v3311_v63, %v2311_v36  ;;  %vm2315_vm9 = vweird.f32 %v3311_v63  ;;  %vm6099_vm6 = vmor %vm2216_vm11, %vm2217_vm8 }
 0x432   : > { %v1988_v27 = vmul.f32 %v6032_v16, %v5967_v3  ;;  %v6049_v25 = vpop.eup %3314  ;;  %v2727_v1 = vsel %vm1227_vm3, %v2098_v39, %v2695_v4  ;;  %v2214_v9 = vmul.f32 %v5969_v5, %v2213_v50  ;;  %v1996_v0 = vand.u32 2147483647, %v5967_v3  ;;  %vm2316_vm12 = vmor %vm2314_vm5, %vm2315_vm9 }
 0x433   : > { %v1998_v53 = vand.u32 2147483648, %v5967_v3  ;;  %v2759_v11 = vmul.f32 %v4518_v28, %v2727_v1  ;;  %v2313_v54 = vadd.f32 %v3311_v63, %v2312_v48  ;;  %v2548_v32 = vmul.f32 %v6049_v25, %v5989_v35 }
 0x434   : > { %v1989_v8 = vsub.f32 1.0, %v1988_v27  ;;  %vm2319_vm13 = vcmp.eq.f32.partialorder %v2318_v55, 8.507059e+37  ;;  %v2321_v39 = vor.u32 1.1754944e-38, %v2320_v40  ;;  %vm1992_vm14 = vweird.f32 %v5967_v3 }
 0x435   : > { %3316 = vrcp.f32 %v6011_v18  ;;  %v2791_v28 = vsel %vm4719_vm10, %v2759_v11, %v6584_v22  ;;  %v2317_v62 = vsel %vm2316_vm12, %v3311_v63, %v2313_v54  ;;  %v2549_v10 = vsub.f32 1.0, %v2548_v32 }
 0x436   : > { %v1990_v49 = vmul.f32 %v6032_v16, %v1989_v8  ;;  %2823 = vst [vmem:[%s6337_s5 + $0xb0] sm:$0xff] %v2791_v28  ;;  %v6073_v21 = vadd.f32 %v5969_v5, %v2214_v9  ;;  %v2322_v61 = vsel %vm2319_vm13, %v2321_v39, %v2317_v62  ;;  %v2556_v58 = vand.u32 2147483647, %v5989_v35  ;;  %v6150_v39 = vpop.xlane.xlu1 %1775 }
 0x437   : > { %3318 = vrcp.f32 %v6059_v47  ;;  %v2679_v63 = vsel %vm3737_vm2, %v2322_v61, 1.0  ;;  %vm6081_vm1 = vcmp.eq.f32.partialorder %v1996_v0, 8.507059e+37  ;;  %v1999_v37 = vor.u32 1.1754944e-38, %v1998_v53 }
 0x438   : > { %v2550_v13 = vmul.f32 %v6049_v25, %v2549_v10  ;;  %v2558_v60 = vand.u32 2147483648, %v5989_v35  ;;  %v2711_v43 = vsel %vm1227_vm3, %v5933_v30, %v2679_v63  ;;  %vm1993_vm7 = vweird.f32 %v6032_v16  ;;  %v6168_v63 = vpop.xlane.xlu0 %1773 }
 0x439   : > { %vm2553_vm15 = vweird.f32 %v6049_v25  ;;  %v2444_v50 = vand.u32 2147483647, %v6011_v18  ;;  %v2743_v36 = vmul.f32 %v4505_v44, %v2711_v43  ;;  %v1991_v55 = vadd.f32 %v6032_v16, %v1990_v49  ;;  %v6591_v44 = vld [vmem:[#allocation21_spill] sm:$0xff]  ;;  %vm6133_vm8 = vmor %vm1992_vm14, %vm1993_vm7 }
 0x43a   : > { %v2551_v30 = vadd.f32 %v6049_v25, %v2550_v13  ;;  %v2446_v38 = vand.u32 2147483648, %v6011_v18  ;;  %v2219_v20 = vsel %vm6099_vm6, %v5969_v5, %v6073_v21  ;;  %vm2552_vm0 = vweird.f32 %v5989_v35 }
 0x43b   : > { %v3317_v17 = vpop.eup %3316  ;;  %vm6112_vm4 = vcmp.eq.f32.partialorder %v2556_v58, 8.507059e+37  ;;  %3320 = vrcp.f32 %v6087_v45  ;;  %v2775_v4 = vsel %vm4719_vm10, %v2743_v36, %v6591_v44  ;;  %vm6120_vm5 = vmor %vm2552_vm0, %vm2553_vm15  ;;  %v2559_v27 = vor.u32 1.1754944e-38, %v2558_v60 }
 0x43c   : > { %v2436_v1 = vmul.f32 %v3317_v17, %v6011_v18  ;;  %vm2440_vm11 = vweird.f32 %v6011_v18  ;;  %2807 = vst [vmem:[%s6337_s5 + $0x30] sm:$0xff] %v2775_v4  ;;  %v2555_v0 = vsel %vm6120_vm5, %v6049_v25, %v2551_v30  ;;  %vm6140_vm9 = vcmp.eq.f32.partialorder %v2444_v50, 8.507059e+37 }
 0x43d   : > { %v3319_v35 = vpop.eup %3318  ;;  %vm2328_vm12 = vweird.f32 %v6059_v47  ;;  %v2332_v11 = vand.u32 2147483647, %v6059_v47  ;;  %v1995_v3 = vsel %vm6133_vm8, %v6032_v16, %v1991_v55  ;;  %v2447_v8 = vor.u32 1.1754944e-38, %v2446_v38 }
 0x43e   : > { %v2437_v54 = vsub.f32 1.0, %v2436_v1  ;;  %v2324_v32 = vmul.f32 %v3319_v35, %v6059_v47  ;;  %v2334_v25 = vand.u32 2147483648, %v6059_v47  ;;  %v2640_v22 = vand.u32 2147483647, %v6087_v45 }
 0x43f   : > { %v2642_v28 = vand.u32 2147483648, %v6087_v45  ;;  %3322 = vrcp.f32 %v6077_v31  ;;  %v6158_v62 = vsel %vm6112_vm4, %v2559_v27, %v2555_v0  ;;  %vm2441_vm13 = vweird.f32 %v3317_v17 }
 0x440   : > { %v2438_v49 = vmul.f32 %v3317_v17, %v2437_v54  ;;  %v2325_v16 = vsub.f32 1.0, %v2324_v32  ;;  %v2000_v61 = vsel %vm6081_vm1, %v1999_v37, %v1995_v3  ;;  %vm6162_vm14 = vcmp.eq.f32.partialorder %v2332_v11, 8.507059e+37  ;;  %vm2442_vm1 = vmor %vm2440_vm11, %vm2441_vm13 }
 0x441   : > { %v3321_v10 = vpop.eup %3320  ;;  %vm2636_vm7 = vweird.f32 %v6087_v45  ;;  %3324 = vrcp.f32 %v6150_v39  ;;  %vm2329_vm15 = vweird.f32 %v3319_v35  ;;  %v2696_v57 = vsel %vm3737_vm2, %v6158_v62, 1.0 }
 0x442   : > { %v2439_v13 = vadd.f32 %v3317_v17, %v2438_v49  ;;  %v2326_v60 = vmul.f32 %v3319_v35, %v2325_v16  ;;  %v2632_v43 = vmul.f32 %v3321_v10, %v6087_v45  ;;  %v2335_v37 = vor.u32 1.1754944e-38, %v2334_v25  ;;  %vm2330_vm5 = vmor %vm2328_vm12, %vm2329_vm15 }
 0x443   : > { %vm6176_vm0 = vcmp.eq.f32.partialorder %v2640_v22, 8.507059e+37  ;;  %v2643_v36 = vor.u32 1.1754944e-38, %v2642_v28  ;;  %vm2104_vm4 = vweird.f32 %v6077_v31  ;;  %3326 = vrcp.f32 %v6168_v63  ;;  %v6604_v28 = vld [vmem:[#allocation25_spill] sm:$0xff] }
 0x444   : > { %v2443_v55 = vsel %vm2442_vm1, %v3317_v17, %v2439_v13  ;;  %v2327_v30 = vadd.f32 %v3319_v35, %v2326_v60  ;;  %v2633_v38 = vsub.f32 1.0, %v2632_v43  ;;  %vm2637_vm11 = vweird.f32 %v3321_v10  ;;  %v6607_v13 = vld [vmem:[#allocation24_spill] sm:$0xff] }
 0x445   : > { %v3323_v40 = vpop.eup %3322  ;;  %v2448_v44 = vsel %vm6140_vm9, %v2447_v8, %v2443_v55  ;;  %v2108_v18 = vand.u32 2147483647, %v6077_v31  ;;  %v2110_v4 = vand.u32 2147483648, %v6077_v31  ;;  %vm2203_vm8 = vweird.f32 %v5859_v2 }
 0x446   : > { %v2688_v17 = vsel %vm3737_vm2, %v2448_v44, 1.0  ;;  %v2331_v48 = vsel %vm2330_vm5, %v3319_v35, %v2327_v30  ;;  %v2634_v27 = vmul.f32 %v3321_v10, %v2633_v38  ;;  %v2100_v1 = vmul.f32 %v3323_v40, %v6077_v31 }
 0x447   : > { %v3325_v9 = vpop.eup %3324  ;;  %v2720_v0 = vsel %vm1227_vm3, %v2000_v61, %v2688_v17  ;;  %v2336_v47 = vsel %vm6162_vm14, %v2335_v37, %v2331_v48  ;;  %vm2664_vm9 = vweird.f32 %v6150_v39  ;;  %v2668_v53 = vand.u32 2147483647, %v6150_v39  ;;  %vm2638_vm14 = vmor %vm2636_vm7, %vm2637_vm11 }
 0x448   : > { %vm2202_vm12 = vweird.f32 %v5802_v24  ;;  %v2752_v11 = vmul.f32 %v4544_v26, %v2720_v0  ;;  %v2680_v35 = vsel %vm3737_vm2, %v2336_v47, 1.0  ;;  %v2635_v3 = vadd.f32 %v3321_v10, %v2634_v27  ;;  %v6612_v24 = vld [vmem:[#allocation26_spill] sm:$0xff] }
 0x449   : > { %v2101_v54 = vsub.f32 1.0, %v2100_v1  ;;  %vm6204_vm13 = vcmp.eq.f32.partialorder %v2220_v42, 8.507059e+37  ;;  %v2712_v32 = vsel %vm1227_vm3, %v6023_v23, %v2680_v35  ;;  %vm2105_vm15 = vweird.f32 %v3323_v40  ;;  %v3327_v22 = vpop.eup %3326 }
 0x44a   : > { %v2660_v26 = vmul.f32 %v3325_v9, %v6150_v39  ;;  %v2670_v25 = vand.u32 2147483648, %v6150_v39  ;;  %v2784_v46 = vsel %vm4719_vm10, %v2752_v11, %v6604_v28  ;;  %v2744_v42 = vmul.f32 %v4566_v14, %v2712_v32  ;;  %vm2106_vm1 = vmor %vm2104_vm4, %vm2105_vm15  ;;  %v6613_v11 = vld [vmem:[#allocation23_spill] sm:$0xff] }
 0x44b   : > { %v2639_v49 = vsel %vm2638_vm14, %v3321_v10, %v2635_v3  ;;  %v2102_v16 = vmul.f32 %v3323_v40, %v2101_v54  ;;  %2816 = vst [vmem:[%s6337_s5 + $0x78] sm:$0xff] %v2784_v46  ;;  %vm6225_vm7 = vcmp.eq.f32.partialorder %v2108_v18, 8.507059e+37  ;;  %v2646_v58 = vmul.f32 %v3327_v22, %v6168_v63  ;;  %vm6264_vm14 = vmor %vm2202_vm12, %vm2203_vm8 }
 0x44c   : > { %v2644_v23 = vsel %vm6176_vm0, %v2643_v36, %v2639_v49  ;;  %v2661_v61 = vsub.f32 1.0, %v2660_v26  ;;  %v2776_v14 = vsel %vm4719_vm10, %v2744_v42, %v6607_v13  ;;  %v2111_v43 = vor.u32 1.1754944e-38, %v2110_v4 }
 0x44d   : > { %v2702_v10 = vsel %vm3737_vm2, %v2644_v23, 1.0  ;;  %v2103_v60 = vadd.f32 %v3323_v40, %v2102_v16  ;;  %2808 = vst [vmem:[%s6337_s5 + $0x38] sm:$0xff] %v2776_v14  ;;  %vm2665_vm0 = vweird.f32 %v3325_v9  ;;  %v2647_v36 = vsub.f32 1.0, %v2646_v58 }
 0x44e   : > { %v2734_v37 = vsel %vm1227_vm3, %v5929_v19, %v2702_v10  ;;  %v2662_v50 = vmul.f32 %v3325_v9, %v2661_v61  ;;  %v2654_v38 = vand.u32 2147483647, %v6168_v63  ;;  %v2656_v44 = vand.u32 2147483648, %v6168_v63  ;;  %v6608_v19 = vld [vmem:[#allocation18_spill] sm:$0xff]  ;;  %vm2666_vm4 = vmor %vm2664_vm9, %vm2665_vm0 }
 0x44f   : > { %v2766_v55 = vmul.f32 %v4476_v29, %v2734_v37  ;;  %v2107_v30 = vsel %vm2106_vm1, %v3323_v40, %v2103_v60  ;;  %v2648_v17 = vmul.f32 %v3327_v22, %v2647_v36  ;;  %vm2651_vm5 = vweird.f32 %v3327_v22 }
 0x450   : > { %v2112_v18 = vsel %vm6225_vm7, %v2111_v43, %v2107_v30  ;;  %v2663_v4 = vadd.f32 %v3325_v9, %v2662_v50  ;;  %vm2669_vm11 = vcmp.eq.f32.partialorder %v2668_v53, 8.507059e+37  ;;  %v2671_v40 = vor.u32 1.1754944e-38, %v2670_v25 }
 0x451   : > { %v2798_v31 = vsel %vm4719_vm10, %v2766_v55, %v6608_v19  ;;  %v2728_v29 = vsel %vm1227_vm3, %v2112_v18, %v2696_v57  ;;  %v2649_v27 = vadd.f32 %v3327_v22, %v2648_v17  ;;  %vm2650_vm9 = vweird.f32 %v6168_v63 }
 0x452   : > { %2830 = vst [vmem:[%s6337_s5 + $0xe8] sm:$0xff] %v2798_v31  ;;  %v2760_v62 = vmul.f32 %v4554_v6, %v2728_v29  ;;  %v2667_v57 = vsel %vm2666_vm4, %v3325_v9, %v2663_v4  ;;  %v2205_v39 = vsel %vm6264_vm14, %v5859_v2, %v5992_v41  ;;  %v2224_v1 = vsel %vm6204_vm13, %v6029_v7, %v2219_v20  ;;  %vm2652_vm8 = vmor %vm2650_vm9, %vm2651_vm5  ;;  %v6611_v9 = vld [vmem:[#allocation27_spill] sm:$0xff] }
 0x453   : > { %v2672_v0 = vsel %vm2669_vm11, %v2671_v40, %v2667_v57  ;;  %v2657_v6 = vor.u32 1.1754944e-38, %v2656_v44  ;;  %v2653_v41 = vsel %vm2652_vm8, %v3327_v22, %v2649_v27  ;;  %vm2655_vm12 = vcmp.eq.f32.partialorder %v2654_v38, 8.507059e+37 }
 0x454   : > { %v2792_v63 = vsel %vm4719_vm10, %v2760_v62, %v6611_v9  ;;  %v2704_v2 = vsel %vm3737_vm2, %v2672_v0, 1.0  ;;  %vm2207_vm6 = vcmp.eq.f32.partialorder %v2206_v59, 8.507059e+37 }
 0x455   : > { %2824 = vst [vmem:[%s6337_s5 + $0xb8] sm:$0xff] %v2792_v63  ;;  %v2736_v5 = vsel %vm1227_vm3, %v2224_v1, %v2704_v2  ;;  %v2658_v7 = vsel %vm2655_vm12, %v2657_v6, %v2653_v41  ;;  %v2210_v21 = vsel %vm2207_vm6, %v5906_v33, %v2205_v39 }
 0x456   : > { %v2768_v52 = vmul.f32 %v4644_v51, %v2736_v5  ;;  %v2703_v20 = vsel %vm3737_vm2, %v2658_v7, 1.0 }
 0x457   : > { %v2735_v47 = vsel %vm1227_vm3, %v2210_v21, %v2703_v20 }
 0x458   : > { %v2800_v59 = vsel %vm4719_vm10, %v2768_v52, %v6612_v24  ;;  %v2767_v53 = vmul.f32 %v4533_v34, %v2735_v47 }
 0x459   : > { %2832 = vst [vmem:[%s6337_s5 + $0xf8] sm:$0xff] %v2800_v59 }
 0x45a   : > { %v2799_v51 = vsel %vm4719_vm10, %v2767_v53, %v6613_v11 }
 0x45b   : > { %2831 = vst [vmem:[%s6337_s5 + $0xf0] sm:$0xff] %v2799_v51 }
 0x45c PF: > { %s15_s22 = sadd.s32 1, %s3366_s22   ;;  %s6614_s18 = smov %s3354_s19 }
 0x45d   : > { %p12_p12 = scmp.ge.s32.totalorder %s15_s22, 4   ;;  %s6615_s19 = smov %s3434_s26 }
 0x45e   : > { %s6616_s20 = smov %s3362_s21  ;;  %s6617_s21 = smov %s6619_s23 }
 0x45f   :  { %14 = sbr.rel (!%p12_p12) target bundleno = 3 (0x3), region = 109 }

</bundles_post_ra>
